<compile_context>
chip_gen: v7x
topology: tpu7x:2x2x1
jax: 0.10.0
libtpu: 0.0.40
codegen_flags: <defaults>
</compile_context>

<pallas_src>
import functools

import jax
import jax.numpy as jnp
from jax import lax
from jax.experimental import pallas as pl
from jax.experimental.pallas import tpu as pltpu

KERNEL_SIZE = 7
PAD = KERNEL_SIZE // 2   # 3 rows/cols of zero padding for the "same" conv
ROW_PAD = 8              # zero rows kept above/below the reduced map; >= PAD and
                         # a multiple of 8 so scratch reads/writes stay 8-aligned


def _sa_kernel(w_ref, x_ref, o_ref, red_ref, xprev_ref, *, C, W, tile_h, num_h):
    """One grid step: reduce tile h over channels, emit output tile h-1.

    w_ref    : SMEM (98,)                 flattened (2, 7, 7) conv weights
    x_ref    : VMEM (C, tile_h, W)        current x tile (native dtype)
    o_ref    : VMEM (C, tile_h, W)        output tile h-1 (written when h >= 1)
    red_ref  : VMEM (2, H+2*ROW_PAD, W)   zero-padded [avg; max] map, f32
    xprev_ref: VMEM (C, tile_h, W)        x tile from the previous grid step
    """
    h = pl.program_id(1)
    win_h = tile_h + 2 * ROW_PAD
    sl_w = 2 * W + 2 * PAD           # width of one tap slice ([avg | gap | max])

    # ---- once per batch element: zero the padded reduced-map scratch --------
    @pl.when(h == 0)
    def _init():
        red_ref[...] = jnp.zeros_like(red_ref)

    # ---- fused mean/max channel reduction of the current tile (one pass) ----
    @pl.when(h < num_h)
    def _reduce():
        # C is static and modest here; for very large C switch to lax.fori_loop.
        x0 = x_ref[0].astype(jnp.float32)              # (tile_h, W)
        acc_sum = x0
        acc_max = x0
        for c in range(1, C):
            xc = x_ref[c].astype(jnp.float32)
            acc_sum = acc_sum + xc
            acc_max = jnp.maximum(acc_max, xc)
        row0 = ROW_PAD + h * tile_h                    # 8-aligned store offset
        red_ref[0, pl.ds(row0, tile_h), :] = acc_sum * jnp.float32(1.0 / C)
        red_ref[1, pl.ds(row0, tile_h), :] = acc_max

    # ---- 7x7 conv + sigmoid + multiply for the previous tile ----------------
    @pl.when(h >= 1)
    def _emit():
        g0 = (h - 1) * tile_h                          # 8-aligned window start
        a_win = red_ref[0, pl.ds(g0, win_h), :]        # (win_h, W) f32
        m_win = red_ref[1, pl.ds(g0, win_h), :]
        z3 = jnp.zeros((win_h, PAD), jnp.float32)
        z6 = jnp.zeros((win_h, 2 * PAD), jnp.float32)
        # lane-stacked, zero-padded 2-channel plane: [0 avg 0 | 0 max 0]
        s_pad = jnp.concatenate([z3, a_win, z6, m_win, z3], axis=1)

        u = jnp.zeros((tile_h, sl_w), jnp.float32)     # avg-channel taps
        v = jnp.zeros((tile_h, sl_w), jnp.float32)     # max-channel taps
        for i in range(KERNEL_SIZE):
            r0 = i + ROW_PAD - PAD                     # static row offset
            for j in range(KERNEL_SIZE):
                tap = s_pad[r0:r0 + tile_h, j:j + sl_w]
                u = u + w_ref[i * KERNEL_SIZE + j] * tap
                v = v + w_ref[KERNEL_SIZE * KERNEL_SIZE
                              + i * KERNEL_SIZE + j] * tap
        conv = u[:, 0:W] + v[:, W + 2 * PAD:2 * W + 2 * PAD]   # (tile_h, W)
        attn = jax.nn.sigmoid(conv).astype(xprev_ref.dtype)

        # minimal store epilogue: one broadcast multiply, one store.
        o_ref[...] = (xprev_ref[...] * attn[None, :, :]).astype(o_ref.dtype)

    # ---- keep the current x tile around for next step's multiply ------------
    @pl.when(h < num_h)
    def _stash():
        xprev_ref[...] = x_ref[...]


def _choose_tile_h(C, H, W, itemsize, tile_h):
    """Pick an H tile: a multiple of 8 dividing H, with ~<=2 MiB x-blocks."""
    if tile_h is not None:
        if H % tile_h != 0 or (tile_h != H and tile_h % 8 != 0):
            raise ValueError("tile_h must divide H and be a multiple of 8")
        return int(tile_h)
    if H % 8 != 0:
        return H                          # fallback: one tile per batch element
    target_bytes = 2 * 1024 * 1024
    cands = [d for d in range(8, H + 1, 8) if H % d == 0]
    fitting = [d for d in cands if C * d * W * itemsize <= target_bytes]
    return max(fitting) if fitting else min(cands)


@functools.partial(jax.jit, static_argnames=("tile_h",))
def sa_layer(x, w, tile_h=None):
    """x: (B, C, H, W); w: (2, 7, 7) conv1 weight (squeezed OIHW, no bias)."""
    B, C, H, W = x.shape
    th = _choose_tile_h(C, H, W, x.dtype.itemsize, tile_h)
    num_h = H // th
    w_flat = w.reshape(-1).astype(jnp.float32)         # (98,) scalars for SMEM

    kernel = functools.partial(_sa_kernel, C=C, W=W, tile_h=th, num_h=num_h)

    # VMEM: double-buffered x/out blocks + lagged x tile + padded reduced map.
    blk_bytes = C * th * W * x.dtype.itemsize
    vmem_need = 5 * blk_bytes + 2 * (H + 2 * ROW_PAD) * W * 4
    vmem_limit = int(min(48 * 1024 * 1024, max(32 * 1024 * 1024, 2 * vmem_need)))

    return pl.pallas_call(
        kernel,
        out_shape=jax.ShapeDtypeStruct((B, C, H, W), x.dtype),
        grid=(B, num_h + 1),
        in_specs=[
            pl.BlockSpec(memory_space=pltpu.MemorySpace.SMEM),        # weights
            pl.BlockSpec((None, C, th, W),                            # x tiles
                         lambda b, h: (b, 0, jnp.minimum(h, num_h - 1), 0)),
        ],
        out_specs=pl.BlockSpec((None, C, th, W),            # lagged by one tile
                               lambda b, h: (b, 0, jnp.maximum(h - 1, 0), 0)),
        scratch_shapes=[
            pltpu.VMEM((2, H + 2 * ROW_PAD, W), jnp.float32),  # [avg; max] map
            pltpu.VMEM((C, th, W), x.dtype),                   # previous x tile
        ],
        compiler_params=pltpu.CompilerParams(
            dimension_semantics=("parallel", "arbitrary"),
            vmem_limit_bytes=vmem_limit),
    )(w_flat, x)


def sa_layer_reference(x, w):
    """Pure-JAX reference mirroring the PyTorch module (NCHW conv)."""
    avg = jnp.mean(x, axis=1, keepdims=True)
    mx = jnp.max(x, axis=1, keepdims=True)
    y = jnp.concatenate([avg, mx], axis=1)                  # (B, 2, H, W)
    conv = lax.conv_general_dilated(
        y, w[None], window_strides=(1, 1),
        padding=((PAD, PAD), (PAD, PAD)),
        dimension_numbers=("NCHW", "OIHW", "NCHW"))
    return x * jax.nn.sigmoid(conv)


if __name__ == "__main__":
    key = jax.random.PRNGKey(0)
    kx, kw = jax.random.split(key)

    B, C, H, W = 2, 4, 16, 16
    x = jax.random.normal(kx, (B, C, H, W), dtype=jnp.float32)

    # nn.Conv2d(2, 1, 7, bias=False) weight is (1, 2, 7, 7); stored squeezed.
    fan_in = 2 * KERNEL_SIZE * KERNEL_SIZE
    bound = 1.0 / float(fan_in) ** 0.5
    w = jax.random.uniform(kw, (2, KERNEL_SIZE, KERNEL_SIZE),
                           dtype=jnp.float32, minval=-bound, maxval=bound)

    ref = sa_layer_reference(x, w)

    # Default tiling (here a single 16-row tile per batch element).
    out = jax.block_until_ready(sa_layer(x, w))
    assert out.shape == (B, C, H, W)
    err = float(jnp.max(jnp.abs(out - ref)))
    assert jnp.allclose(out, ref, rtol=1e-4, atol=1e-4), err

    # Force 8-row tiles to exercise the multi-tile halo / lagged-output path.
    out_tiled = jax.block_until_ready(sa_layer(x, w, tile_h=8))
    err_tiled = float(jnp.max(jnp.abs(out_tiled - ref)))
    assert jnp.allclose(out_tiled, ref, rtol=1e-4, atol=1e-4), err_tiled

    print("KERNEL_OK")
</pallas_src>

<mosaic_0001>
module attributes {stable_mosaic.version = 11 : i64} {
  func.func @_sa_kernel(%arg0: i32, %arg1: i32, %arg2: memref<98xf32, #tpu.memory_space<smem>>, %arg3: memref<1x4x16x16xf32, #tpu.memory_space<vmem>>, %arg4: memref<1x4x16x16xf32, #tpu.memory_space<vmem>>, %arg5: memref<2x32x16xf32, #tpu.memory_space<vmem>>, %arg6: memref<4x16x16xf32, #tpu.memory_space<vmem>>) attributes {dimension_semantics = [#tpu.dimension_semantics<parallel>, #tpu.dimension_semantics<arbitrary>], iteration_bounds = array<i64: 2, 2>, scalar_prefetch = 0 : i64, scratch_operands = 2 : i64, tpu.core_type = #tpu.core_type<tc>, window_params = [{transform_indices = @transform_0, window_bounds = array<i64: 98>}, {transform_indices = @transform_1, window_bounds = array<i64: 1, 4, 16, 16>}, {transform_indices = @transform_2, window_bounds = array<i64: 1, 4, 16, 16>}]} {
    %c0_i32 = arith.constant 0 : i32
    %0 = arith.cmpi eq, %arg1, %c0_i32 : i32
    %1 = arith.extui %0 : i1 to i32
    %c0_i32_0 = arith.constant 0 : i32
    %2 = arith.cmpi ne, %1, %c0_i32_0 : i32
    scf.if %2 {
      %cst = arith.constant 0.000000e+00 : f32
      %12 = vector.broadcast %cst : f32 to vector<2x32x16xf32>
      %c0 = arith.constant 0 : index
      %c0_6 = arith.constant 0 : index
      %c0_7 = arith.constant 0 : index
      %13 = vector.load %arg5[%c0, %c0_6, %c0_7] : memref<2x32x16xf32, #tpu.memory_space<vmem>>, vector<2x32x16xf32>
      tpu.vector_store %arg5[%c0, %c0_6, %c0_7], %12 {strides = array<i32>} : memref<2x32x16xf32, #tpu.memory_space<vmem>>, vector<2x32x16xf32>,
    } else {
    }
    %c1_i32 = arith.constant 1 : i32
    %3 = arith.cmpi slt, %arg1, %c1_i32 : i32
    %4 = arith.extui %3 : i1 to i32
    %c0_i32_1 = arith.constant 0 : i32
    %5 = arith.cmpi ne, %4, %c0_i32_1 : i32
    scf.if %5 {
      %c0 = arith.constant 0 : index
      %c0_6 = arith.constant 0 : index
      %c0_7 = arith.constant 0 : index
      %c0_8 = arith.constant 0 : index
      %12 = vector.load %arg3[%c0, %c0_6, %c0_7, %c0_8] : memref<1x4x16x16xf32, #tpu.memory_space<vmem>>, vector<1x1x16x16xf32>
      %13 = vector.shape_cast %12 : vector<1x1x16x16xf32> to vector<16x16xf32>
      %c0_9 = arith.constant 0 : index
      %c1 = arith.constant 1 : index
      %c0_10 = arith.constant 0 : index
      %c0_11 = arith.constant 0 : index
      %14 = vector.load %arg3[%c0_9, %c1, %c0_10, %c0_11] : memref<1x4x16x16xf32, #tpu.memory_space<vmem>>, vector<1x1x16x16xf32>
      %15 = vector.shape_cast %14 : vector<1x1x16x16xf32> to vector<16x16xf32>
      %16 = arith.addf %13, %15 : vector<16x16xf32>
      %17 = arith.maximumf %13, %15 : vector<16x16xf32>
      %c0_12 = arith.constant 0 : index
      %c2 = arith.constant 2 : index
      %c0_13 = arith.constant 0 : index
      %c0_14 = arith.constant 0 : index
      %18 = vector.load %arg3[%c0_12, %c2, %c0_13, %c0_14] : memref<1x4x16x16xf32, #tpu.memory_space<vmem>>, vector<1x1x16x16xf32>
      %19 = vector.shape_cast %18 : vector<1x1x16x16xf32> to vector<16x16xf32>
      %20 = arith.addf %16, %19 : vector<16x16xf32>
      %21 = arith.maximumf %17, %19 : vector<16x16xf32>
      %c0_15 = arith.constant 0 : index
      %c3 = arith.constant 3 : index
      %c0_16 = arith.constant 0 : index
      %c0_17 = arith.constant 0 : index
      %22 = vector.load %arg3[%c0_15, %c3, %c0_16, %c0_17] : memref<1x4x16x16xf32, #tpu.memory_space<vmem>>, vector<1x1x16x16xf32>
      %23 = vector.shape_cast %22 : vector<1x1x16x16xf32> to vector<16x16xf32>
      %24 = arith.addf %20, %23 : vector<16x16xf32>
      %25 = arith.maximumf %21, %23 : vector<16x16xf32>
      %c16_i32 = arith.constant 16 : i32
      %26 = arith.muli %arg1, %c16_i32 : i32
      %c8_i32 = arith.constant 8 : i32
      %27 = arith.addi %c8_i32, %26 : i32
      %cst = arith.constant 2.500000e-01 : f32
      %28 = vector.broadcast %cst : f32 to vector<16x16xf32>
      %29 = arith.mulf %24, %28 : vector<16x16xf32>
      %c0_18 = arith.constant 0 : index
      %30 = arith.index_cast %27 : i32 to index
      %c0_19 = arith.constant 0 : index
      %31 = vector.load %arg5[%c0_18, %30, %c0_19] : memref<2x32x16xf32, #tpu.memory_space<vmem>>, vector<1x16x16xf32>
      %32 = vector.shape_cast %31 : vector<1x16x16xf32> to vector<16x16xf32>
      %33 = vector.shape_cast %29 : vector<16x16xf32> to vector<1x16x16xf32>
      tpu.vector_store %arg5[%c0_18, %30, %c0_19], %33 {strides = array<i32>} : memref<2x32x16xf32, #tpu.memory_space<vmem>>, vector<1x16x16xf32>,
      %c1_20 = arith.constant 1 : index
      %34 = arith.index_cast %27 : i32 to index
      %c0_21 = arith.constant 0 : index
      %35 = vector.load %arg5[%c1_20, %34, %c0_21] : memref<2x32x16xf32, #tpu.memory_space<vmem>>, vector<1x16x16xf32>
      %36 = vector.shape_cast %35 : vector<1x16x16xf32> to vector<16x16xf32>
      %37 = vector.shape_cast %25 : vector<16x16xf32> to vector<1x16x16xf32>
      tpu.vector_store %arg5[%c1_20, %34, %c0_21], %37 {strides = array<i32>} : memref<2x32x16xf32, #tpu.memory_space<vmem>>, vector<1x16x16xf32>,
    } else {
    }
    %c1_i32_2 = arith.constant 1 : i32
    %6 = arith.cmpi sge, %arg1, %c1_i32_2 : i32
    %7 = arith.extui %6 : i1 to i32
    %c0_i32_3 = arith.constant 0 : i32
    %8 = arith.cmpi ne, %7, %c0_i32_3 : i32
    scf.if %8 {
      %c1_i32_6 = arith.constant 1 : i32
      %12 = arith.subi %arg1, %c1_i32_6 : i32
      %c16_i32 = arith.constant 16 : i32
      %13 = arith.muli %12, %c16_i32 : i32
      %c0 = arith.constant 0 : index
      %14 = arith.index_cast %13 : i32 to index
      %c0_7 = arith.constant 0 : index
      %15 = vector.load %arg5[%c0, %14, %c0_7] : memref<2x32x16xf32, #tpu.memory_space<vmem>>, vector<1x32x16xf32>
      %16 = vector.shape_cast %15 : vector<1x32x16xf32> to vector<32x16xf32>
      %c1 = arith.constant 1 : index
      %17 = arith.index_cast %13 : i32 to index
      %c0_8 = arith.constant 0 : index
      %18 = vector.load %arg5[%c1, %17, %c0_8] : memref<2x32x16xf32, #tpu.memory_space<vmem>>, vector<1x32x16xf32>
      %19 = vector.shape_cast %18 : vector<1x32x16xf32> to vector<32x16xf32>
      %cst = arith.constant 0.000000e+00 : f32
      %20 = vector.broadcast %cst : f32 to vector<32x3xf32>
      %cst_9 = arith.constant 0.000000e+00 : f32
      %21 = vector.broadcast %cst_9 : f32 to vector<32x6xf32>
      %22 = tpu.concatenate %20, %16, %21, %19, %20 in 1 : vector<32x3xf32>, vector<32x16xf32>, vector<32x6xf32>, vector<32x16xf32>, vector<32x3xf32> -> vector<32x44xf32>
      %cst_10 = arith.constant 0.000000e+00 : f32
      %23 = vector.broadcast %cst_10 : f32 to vector<16x38xf32>
      %cst_11 = arith.constant 0.000000e+00 : f32
      %24 = vector.broadcast %cst_11 : f32 to vector<16x38xf32>
      %25 = vector.extract_strided_slice %22 {offsets = [5, 0], sizes = [16, 38], strides = [1, 1]} : vector<32x44xf32> to vector<16x38xf32>
      %c0_12 = arith.constant 0 : index
      %26 = memref.load %arg2[%c0_12] : memref<98xf32, #tpu.memory_space<smem>>
      %27 = vector.broadcast %26 : f32 to vector<16x38xf32>
      %28 = arith.mulf %27, %25 : vector<16x38xf32>
      %29 = arith.addf %23, %28 : vector<16x38xf32>
      %c49 = arith.constant 49 : index
      %30 = memref.load %arg2[%c49] : memref<98xf32, #tpu.memory_space<smem>>
      %31 = vector.broadcast %30 : f32 to vector<16x38xf32>
      %32 = arith.mulf %31, %25 : vector<16x38xf32>
      %33 = arith.addf %24, %32 : vector<16x38xf32>
      %34 = vector.extract_strided_slice %22 {offsets = [5, 1], sizes = [16, 38], strides = [1, 1]} : vector<32x44xf32> to vector<16x38xf32>
      %c1_13 = arith.constant 1 : index
      %35 = memref.load %arg2[%c1_13] : memref<98xf32, #tpu.memory_space<smem>>
      %36 = vector.broadcast %35 : f32 to vector<16x38xf32>
      %37 = arith.mulf %36, %34 : vector<16x38xf32>
      %38 = arith.addf %29, %37 : vector<16x38xf32>
      %c50 = arith.constant 50 : index
      %39 = memref.load %arg2[%c50] : memref<98xf32, #tpu.memory_space<smem>>
      %40 = vector.broadcast %39 : f32 to vector<16x38xf32>
      %41 = arith.mulf %40, %34 : vector<16x38xf32>
      %42 = arith.addf %33, %41 : vector<16x38xf32>
      %43 = vector.extract_strided_slice %22 {offsets = [5, 2], sizes = [16, 38], strides = [1, 1]} : vector<32x44xf32> to vector<16x38xf32>
      %c2 = arith.constant 2 : index
      %44 = memref.load %arg2[%c2] : memref<98xf32, #tpu.memory_space<smem>>
      %45 = vector.broadcast %44 : f32 to vector<16x38xf32>
      %46 = arith.mulf %45, %43 : vector<16x38xf32>
      %47 = arith.addf %38, %46 : vector<16x38xf32>
      %c51 = arith.constant 51 : index
      %48 = memref.load %arg2[%c51] : memref<98xf32, #tpu.memory_space<smem>>
      %49 = vector.broadcast %48 : f32 to vector<16x38xf32>
      %50 = arith.mulf %49, %43 : vector<16x38xf32>
      %51 = arith.addf %42, %50 : vector<16x38xf32>
      %52 = vector.extract_strided_slice %22 {offsets = [5, 3], sizes = [16, 38], strides = [1, 1]} : vector<32x44xf32> to vector<16x38xf32>
      %c3 = arith.constant 3 : index
      %53 = memref.load %arg2[%c3] : memref<98xf32, #tpu.memory_space<smem>>
      %54 = vector.broadcast %53 : f32 to vector<16x38xf32>
      %55 = arith.mulf %54, %52 : vector<16x38xf32>
      %56 = arith.addf %47, %55 : vector<16x38xf32>
      %c52 = arith.constant 52 : index
      %57 = memref.load %arg2[%c52] : memref<98xf32, #tpu.memory_space<smem>>
      %58 = vector.broadcast %57 : f32 to vector<16x38xf32>
      %59 = arith.mulf %58, %52 : vector<16x38xf32>
      %60 = arith.addf %51, %59 : vector<16x38xf32>
      %61 = vector.extract_strided_slice %22 {offsets = [5, 4], sizes = [16, 38], strides = [1, 1]} : vector<32x44xf32> to vector<16x38xf32>
      %c4 = arith.constant 4 : index
      %62 = memref.load %arg2[%c4] : memref<98xf32, #tpu.memory_space<smem>>
      %63 = vector.broadcast %62 : f32 to vector<16x38xf32>
      %64 = arith.mulf %63, %61 : vector<16x38xf32>
      %65 = arith.addf %56, %64 : vector<16x38xf32>
      %c53 = arith.constant 53 : index
      %66 = memref.load %arg2[%c53] : memref<98xf32, #tpu.memory_space<smem>>
      %67 = vector.broadcast %66 : f32 to vector<16x38xf32>
      %68 = arith.mulf %67, %61 : vector<16x38xf32>
      %69 = arith.addf %60, %68 : vector<16x38xf32>
      %70 = vector.extract_strided_slice %22 {offsets = [5, 5], sizes = [16, 38], strides = [1, 1]} : vector<32x44xf32> to vector<16x38xf32>
      %c5 = arith.constant 5 : index
      %71 = memref.load %arg2[%c5] : memref<98xf32, #tpu.memory_space<smem>>
      %72 = vector.broadcast %71 : f32 to vector<16x38xf32>
      %73 = arith.mulf %72, %70 : vector<16x38xf32>
      %74 = arith.addf %65, %73 : vector<16x38xf32>
      %c54 = arith.constant 54 : index
      %75 = memref.load %arg2[%c54] : memref<98xf32, #tpu.memory_space<smem>>
      %76 = vector.broadcast %75 : f32 to vector<16x38xf32>
      %77 = arith.mulf %76, %70 : vector<16x38xf32>
      %78 = arith.addf %69, %77 : vector<16x38xf32>
      %79 = vector.extract_strided_slice %22 {offsets = [5, 6], sizes = [16, 38], strides = [1, 1]} : vector<32x44xf32> to vector<16x38xf32>
      %c6 = arith.constant 6 : index
      %80 = memref.load %arg2[%c6] : memref<98xf32, #tpu.memory_space<smem>>
      %81 = vector.broadcast %80 : f32 to vector<16x38xf32>
      %82 = arith.mulf %81, %79 : vector<16x38xf32>
      %83 = arith.addf %74, %82 : vector<16x38xf32>
      %c55 = arith.constant 55 : index
      %84 = memref.load %arg2[%c55] : memref<98xf32, #tpu.memory_space<smem>>
      %85 = vector.broadcast %84 : f32 to vector<16x38xf32>
      %86 = arith.mulf %85, %79 : vector<16x38xf32>
      %87 = arith.addf %78, %86 : vector<16x38xf32>
      %88 = vector.extract_strided_slice %22 {offsets = [6, 0], sizes = [16, 38], strides = [1, 1]} : vector<32x44xf32> to vector<16x38xf32>
      %c7 = arith.constant 7 : index
      %89 = memref.load %arg2[%c7] : memref<98xf32, #tpu.memory_space<smem>>
      %90 = vector.broadcast %89 : f32 to vector<16x38xf32>
      %91 = arith.mulf %90, %88 : vector<16x38xf32>
      %92 = arith.addf %83, %91 : vector<16x38xf32>
      %c56 = arith.constant 56 : index
      %93 = memref.load %arg2[%c56] : memref<98xf32, #tpu.memory_space<smem>>
      %94 = vector.broadcast %93 : f32 to vector<16x38xf32>
      %95 = arith.mulf %94, %88 : vector<16x38xf32>
      %96 = arith.addf %87, %95 : vector<16x38xf32>
      %97 = vector.extract_strided_slice %22 {offsets = [6, 1], sizes = [16, 38], strides = [1, 1]} : vector<32x44xf32> to vector<16x38xf32>
      %c8 = arith.constant 8 : index
      %98 = memref.load %arg2[%c8] : memref<98xf32, #tpu.memory_space<smem>>
      %99 = vector.broadcast %98 : f32 to vector<16x38xf32>
      %100 = arith.mulf %99, %97 : vector<16x38xf32>
      %101 = arith.addf %92, %100 : vector<16x38xf32>
      %c57 = arith.constant 57 : index
      %102 = memref.load %arg2[%c57] : memref<98xf32, #tpu.memory_space<smem>>
      %103 = vector.broadcast %102 : f32 to vector<16x38xf32>
      %104 = arith.mulf %103, %97 : vector<16x38xf32>
      %105 = arith.addf %96, %104 : vector<16x38xf32>
      %106 = vector.extract_strided_slice %22 {offsets = [6, 2], sizes = [16, 38], strides = [1, 1]} : vector<32x44xf32> to vector<16x38xf32>
      %c9 = arith.constant 9 : index
      %107 = memref.load %arg2[%c9] : memref<98xf32, #tpu.memory_space<smem>>
      %108 = vector.broadcast %107 : f32 to vector<16x38xf32>
      %109 = arith.mulf %108, %106 : vector<16x38xf32>
      %110 = arith.addf %101, %109 : vector<16x38xf32>
      %c58 = arith.constant 58 : index
      %111 = memref.load %arg2[%c58] : memref<98xf32, #tpu.memory_space<smem>>
      %112 = vector.broadcast %111 : f32 to vector<16x38xf32>
      %113 = arith.mulf %112, %106 : vector<16x38xf32>
      %114 = arith.addf %105, %113 : vector<16x38xf32>
      %115 = vector.extract_strided_slice %22 {offsets = [6, 3], sizes = [16, 38], strides = [1, 1]} : vector<32x44xf32> to vector<16x38xf32>
      %c10 = arith.constant 10 : index
      %116 = memref.load %arg2[%c10] : memref<98xf32, #tpu.memory_space<smem>>
      %117 = vector.broadcast %116 : f32 to vector<16x38xf32>
      %118 = arith.mulf %117, %115 : vector<16x38xf32>
      %119 = arith.addf %110, %118 : vector<16x38xf32>
      %c59 = arith.constant 59 : index
      %120 = memref.load %arg2[%c59] : memref<98xf32, #tpu.memory_space<smem>>
      %121 = vector.broadcast %120 : f32 to vector<16x38xf32>
      %122 = arith.mulf %121, %115 : vector<16x38xf32>
      %123 = arith.addf %114, %122 : vector<16x38xf32>
      %124 = vector.extract_strided_slice %22 {offsets = [6, 4], sizes = [16, 38], strides = [1, 1]} : vector<32x44xf32> to vector<16x38xf32>
      %c11 = arith.constant 11 : index
      %125 = memref.load %arg2[%c11] : memref<98xf32, #tpu.memory_space<smem>>
      %126 = vector.broadcast %125 : f32 to vector<16x38xf32>
      %127 = arith.mulf %126, %124 : vector<16x38xf32>
      %128 = arith.addf %119, %127 : vector<16x38xf32>
      %c60 = arith.constant 60 : index
      %129 = memref.load %arg2[%c60] : memref<98xf32, #tpu.memory_space<smem>>
      %130 = vector.broadcast %129 : f32 to vector<16x38xf32>
      %131 = arith.mulf %130, %124 : vector<16x38xf32>
      %132 = arith.addf %123, %131 : vector<16x38xf32>
      %133 = vector.extract_strided_slice %22 {offsets = [6, 5], sizes = [16, 38], strides = [1, 1]} : vector<32x44xf32> to vector<16x38xf32>
      %c12 = arith.constant 12 : index
      %134 = memref.load %arg2[%c12] : memref<98xf32, #tpu.memory_space<smem>>
      %135 = vector.broadcast %134 : f32 to vector<16x38xf32>
      %136 = arith.mulf %135, %133 : vector<16x38xf32>
      %137 = arith.addf %128, %136 : vector<16x38xf32>
      %c61 = arith.constant 61 : index
      %138 = memref.load %arg2[%c61] : memref<98xf32, #tpu.memory_space<smem>>
      %139 = vector.broadcast %138 : f32 to vector<16x38xf32>
      %140 = arith.mulf %139, %133 : vector<16x38xf32>
      %141 = arith.addf %132, %140 : vector<16x38xf32>
      %142 = vector.extract_strided_slice %22 {offsets = [6, 6], sizes = [16, 38], strides = [1, 1]} : vector<32x44xf32> to vector<16x38xf32>
      %c13 = arith.constant 13 : index
      %143 = memref.load %arg2[%c13] : memref<98xf32, #tpu.memory_space<smem>>
      %144 = vector.broadcast %143 : f32 to vector<16x38xf32>
      %145 = arith.mulf %144, %142 : vector<16x38xf32>
      %146 = arith.addf %137, %145 : vector<16x38xf32>
      %c62 = arith.constant 62 : index
      %147 = memref.load %arg2[%c62] : memref<98xf32, #tpu.memory_space<smem>>
      %148 = vector.broadcast %147 : f32 to vector<16x38xf32>
      %149 = arith.mulf %148, %142 : vector<16x38xf32>
      %150 = arith.addf %141, %149 : vector<16x38xf32>
      %151 = vector.extract_strided_slice %22 {offsets = [7, 0], sizes = [16, 38], strides = [1, 1]} : vector<32x44xf32> to vector<16x38xf32>
      %c14 = arith.constant 14 : index
      %152 = memref.load %arg2[%c14] : memref<98xf32, #tpu.memory_space<smem>>
      %153 = vector.broadcast %152 : f32 to vector<16x38xf32>
      %154 = arith.mulf %153, %151 : vector<16x38xf32>
      %155 = arith.addf %146, %154 : vector<16x38xf32>
      %c63 = arith.constant 63 : index
      %156 = memref.load %arg2[%c63] : memref<98xf32, #tpu.memory_space<smem>>
      %157 = vector.broadcast %156 : f32 to vector<16x38xf32>
      %158 = arith.mulf %157, %151 : vector<16x38xf32>
      %159 = arith.addf %150, %158 : vector<16x38xf32>
      %160 = vector.extract_strided_slice %22 {offsets = [7, 1], sizes = [16, 38], strides = [1, 1]} : vector<32x44xf32> to vector<16x38xf32>
      %c15 = arith.constant 15 : index
      %161 = memref.load %arg2[%c15] : memref<98xf32, #tpu.memory_space<smem>>
      %162 = vector.broadcast %161 : f32 to vector<16x38xf32>
      %163 = arith.mulf %162, %160 : vector<16x38xf32>
      %164 = arith.addf %155, %163 : vector<16x38xf32>
      %c64 = arith.constant 64 : index
      %165 = memref.load %arg2[%c64] : memref<98xf32, #tpu.memory_space<smem>>
      %166 = vector.broadcast %165 : f32 to vector<16x38xf32>
      %167 = arith.mulf %166, %160 : vector<16x38xf32>
      %168 = arith.addf %159, %167 : vector<16x38xf32>
      %169 = vector.extract_strided_slice %22 {offsets = [7, 2], sizes = [16, 38], strides = [1, 1]} : vector<32x44xf32> to vector<16x38xf32>
      %c16 = arith.constant 16 : index
      %170 = memref.load %arg2[%c16] : memref<98xf32, #tpu.memory_space<smem>>
      %171 = vector.broadcast %170 : f32 to vector<16x38xf32>
      %172 = arith.mulf %171, %169 : vector<16x38xf32>
      %173 = arith.addf %164, %172 : vector<16x38xf32>
      %c65 = arith.constant 65 : index
      %174 = memref.load %arg2[%c65] : memref<98xf32, #tpu.memory_space<smem>>
      %175 = vector.broadcast %174 : f32 to vector<16x38xf32>
      %176 = arith.mulf %175, %169 : vector<16x38xf32>
      %177 = arith.addf %168, %176 : vector<16x38xf32>
      %178 = vector.extract_strided_slice %22 {offsets = [7, 3], sizes = [16, 38], strides = [1, 1]} : vector<32x44xf32> to vector<16x38xf32>
      %c17 = arith.constant 17 : index
      %179 = memref.load %arg2[%c17] : memref<98xf32, #tpu.memory_space<smem>>
      %180 = vector.broadcast %179 : f32 to vector<16x38xf32>
      %181 = arith.mulf %180, %178 : vector<16x38xf32>
      %182 = arith.addf %173, %181 : vector<16x38xf32>
      %c66 = arith.constant 66 : index
      %183 = memref.load %arg2[%c66] : memref<98xf32, #tpu.memory_space<smem>>
      %184 = vector.broadcast %183 : f32 to vector<16x38xf32>
      %185 = arith.mulf %184, %178 : vector<16x38xf32>
      %186 = arith.addf %177, %185 : vector<16x38xf32>
      %187 = vector.extract_strided_slice %22 {offsets = [7, 4], sizes = [16, 38], strides = [1, 1]} : vector<32x44xf32> to vector<16x38xf32>
      %c18 = arith.constant 18 : index
      %188 = memref.load %arg2[%c18] : memref<98xf32, #tpu.memory_space<smem>>
      %189 = vector.broadcast %188 : f32 to vector<16x38xf32>
      %190 = arith.mulf %189, %187 : vector<16x38xf32>
      %191 = arith.addf %182, %190 : vector<16x38xf32>
      %c67 = arith.constant 67 : index
      %192 = memref.load %arg2[%c67] : memref<98xf32, #tpu.memory_space<smem>>
      %193 = vector.broadcast %192 : f32 to vector<16x38xf32>
      %194 = arith.mulf %193, %187 : vector<16x38xf32>
      %195 = arith.addf %186, %194 : vector<16x38xf32>
      %196 = vector.extract_strided_slice %22 {offsets = [7, 5], sizes = [16, 38], strides = [1, 1]} : vector<32x44xf32> to vector<16x38xf32>
      %c19 = arith.constant 19 : index
      %197 = memref.load %arg2[%c19] : memref<98xf32, #tpu.memory_space<smem>>
      %198 = vector.broadcast %197 : f32 to vector<16x38xf32>
      %199 = arith.mulf %198, %196 : vector<16x38xf32>
      %200 = arith.addf %191, %199 : vector<16x38xf32>
      %c68 = arith.constant 68 : index
      %201 = memref.load %arg2[%c68] : memref<98xf32, #tpu.memory_space<smem>>
      %202 = vector.broadcast %201 : f32 to vector<16x38xf32>
      %203 = arith.mulf %202, %196 : vector<16x38xf32>
      %204 = arith.addf %195, %203 : vector<16x38xf32>
      %205 = vector.extract_strided_slice %22 {offsets = [7, 6], sizes = [16, 38], strides = [1, 1]} : vector<32x44xf32> to vector<16x38xf32>
      %c20 = arith.constant 20 : index
      %206 = memref.load %arg2[%c20] : memref<98xf32, #tpu.memory_space<smem>>
      %207 = vector.broadcast %206 : f32 to vector<16x38xf32>
      %208 = arith.mulf %207, %205 : vector<16x38xf32>
      %209 = arith.addf %200, %208 : vector<16x38xf32>
      %c69 = arith.constant 69 : index
      %210 = memref.load %arg2[%c69] : memref<98xf32, #tpu.memory_space<smem>>
      %211 = vector.broadcast %210 : f32 to vector<16x38xf32>
      %212 = arith.mulf %211, %205 : vector<16x38xf32>
      %213 = arith.addf %204, %212 : vector<16x38xf32>
      %214 = vector.extract_strided_slice %22 {offsets = [8, 0], sizes = [16, 38], strides = [1, 1]} : vector<32x44xf32> to vector<16x38xf32>
      %c21 = arith.constant 21 : index
      %215 = memref.load %arg2[%c21] : memref<98xf32, #tpu.memory_space<smem>>
      %216 = vector.broadcast %215 : f32 to vector<16x38xf32>
      %217 = arith.mulf %216, %214 : vector<16x38xf32>
      %218 = arith.addf %209, %217 : vector<16x38xf32>
      %c70 = arith.constant 70 : index
      %219 = memref.load %arg2[%c70] : memref<98xf32, #tpu.memory_space<smem>>
      %220 = vector.broadcast %219 : f32 to vector<16x38xf32>
      %221 = arith.mulf %220, %214 : vector<16x38xf32>
      %222 = arith.addf %213, %221 : vector<16x38xf32>
      %223 = vector.extract_strided_slice %22 {offsets = [8, 1], sizes = [16, 38], strides = [1, 1]} : vector<32x44xf32> to vector<16x38xf32>
      %c22 = arith.constant 22 : index
      %224 = memref.load %arg2[%c22] : memref<98xf32, #tpu.memory_space<smem>>
      %225 = vector.broadcast %224 : f32 to vector<16x38xf32>
      %226 = arith.mulf %225, %223 : vector<16x38xf32>
      %227 = arith.addf %218, %226 : vector<16x38xf32>
      %c71 = arith.constant 71 : index
      %228 = memref.load %arg2[%c71] : memref<98xf32, #tpu.memory_space<smem>>
      %229 = vector.broadcast %228 : f32 to vector<16x38xf32>
      %230 = arith.mulf %229, %223 : vector<16x38xf32>
      %231 = arith.addf %222, %230 : vector<16x38xf32>
      %232 = vector.extract_strided_slice %22 {offsets = [8, 2], sizes = [16, 38], strides = [1, 1]} : vector<32x44xf32> to vector<16x38xf32>
      %c23 = arith.constant 23 : index
      %233 = memref.load %arg2[%c23] : memref<98xf32, #tpu.memory_space<smem>>
      %234 = vector.broadcast %233 : f32 to vector<16x38xf32>
      %235 = arith.mulf %234, %232 : vector<16x38xf32>
      %236 = arith.addf %227, %235 : vector<16x38xf32>
      %c72 = arith.constant 72 : index
      %237 = memref.load %arg2[%c72] : memref<98xf32, #tpu.memory_space<smem>>
      %238 = vector.broadcast %237 : f32 to vector<16x38xf32>
      %239 = arith.mulf %238, %232 : vector<16x38xf32>
      %240 = arith.addf %231, %239 : vector<16x38xf32>
      %241 = vector.extract_strided_slice %22 {offsets = [8, 3], sizes = [16, 38], strides = [1, 1]} : vector<32x44xf32> to vector<16x38xf32>
      %c24 = arith.constant 24 : index
      %242 = memref.load %arg2[%c24] : memref<98xf32, #tpu.memory_space<smem>>
      %243 = vector.broadcast %242 : f32 to vector<16x38xf32>
      %244 = arith.mulf %243, %241 : vector<16x38xf32>
      %245 = arith.addf %236, %244 : vector<16x38xf32>
      %c73 = arith.constant 73 : index
      %246 = memref.load %arg2[%c73] : memref<98xf32, #tpu.memory_space<smem>>
      %247 = vector.broadcast %246 : f32 to vector<16x38xf32>
      %248 = arith.mulf %247, %241 : vector<16x38xf32>
      %249 = arith.addf %240, %248 : vector<16x38xf32>
      %250 = vector.extract_strided_slice %22 {offsets = [8, 4], sizes = [16, 38], strides = [1, 1]} : vector<32x44xf32> to vector<16x38xf32>
      %c25 = arith.constant 25 : index
      %251 = memref.load %arg2[%c25] : memref<98xf32, #tpu.memory_space<smem>>
      %252 = vector.broadcast %251 : f32 to vector<16x38xf32>
      %253 = arith.mulf %252, %250 : vector<16x38xf32>
      %254 = arith.addf %245, %253 : vector<16x38xf32>
      %c74 = arith.constant 74 : index
      %255 = memref.load %arg2[%c74] : memref<98xf32, #tpu.memory_space<smem>>
      %256 = vector.broadcast %255 : f32 to vector<16x38xf32>
      %257 = arith.mulf %256, %250 : vector<16x38xf32>
      %258 = arith.addf %249, %257 : vector<16x38xf32>
      %259 = vector.extract_strided_slice %22 {offsets = [8, 5], sizes = [16, 38], strides = [1, 1]} : vector<32x44xf32> to vector<16x38xf32>
      %c26 = arith.constant 26 : index
      %260 = memref.load %arg2[%c26] : memref<98xf32, #tpu.memory_space<smem>>
      %261 = vector.broadcast %260 : f32 to vector<16x38xf32>
      %262 = arith.mulf %261, %259 : vector<16x38xf32>
      %263 = arith.addf %254, %262 : vector<16x38xf32>
      %c75 = arith.constant 75 : index
      %264 = memref.load %arg2[%c75] : memref<98xf32, #tpu.memory_space<smem>>
      %265 = vector.broadcast %264 : f32 to vector<16x38xf32>
      %266 = arith.mulf %265, %259 : vector<16x38xf32>
      %267 = arith.addf %258, %266 : vector<16x38xf32>
      %268 = vector.extract_strided_slice %22 {offsets = [8, 6], sizes = [16, 38], strides = [1, 1]} : vector<32x44xf32> to vector<16x38xf32>
      %c27 = arith.constant 27 : index
      %269 = memref.load %arg2[%c27] : memref<98xf32, #tpu.memory_space<smem>>
      %270 = vector.broadcast %269 : f32 to vector<16x38xf32>
      %271 = arith.mulf %270, %268 : vector<16x38xf32>
      %272 = arith.addf %263, %271 : vector<16x38xf32>
      %c76 = arith.constant 76 : index
      %273 = memref.load %arg2[%c76] : memref<98xf32, #tpu.memory_space<smem>>
      %274 = vector.broadcast %273 : f32 to vector<16x38xf32>
      %275 = arith.mulf %274, %268 : vector<16x38xf32>
      %276 = arith.addf %267, %275 : vector<16x38xf32>
      %277 = vector.extract_strided_slice %22 {offsets = [9, 0], sizes = [16, 38], strides = [1, 1]} : vector<32x44xf32> to vector<16x38xf32>
      %c28 = arith.constant 28 : index
      %278 = memref.load %arg2[%c28] : memref<98xf32, #tpu.memory_space<smem>>
      %279 = vector.broadcast %278 : f32 to vector<16x38xf32>
      %280 = arith.mulf %279, %277 : vector<16x38xf32>
      %281 = arith.addf %272, %280 : vector<16x38xf32>
      %c77 = arith.constant 77 : index
      %282 = memref.load %arg2[%c77] : memref<98xf32, #tpu.memory_space<smem>>
      %283 = vector.broadcast %282 : f32 to vector<16x38xf32>
      %284 = arith.mulf %283, %277 : vector<16x38xf32>
      %285 = arith.addf %276, %284 : vector<16x38xf32>
      %286 = vector.extract_strided_slice %22 {offsets = [9, 1], sizes = [16, 38], strides = [1, 1]} : vector<32x44xf32> to vector<16x38xf32>
      %c29 = arith.constant 29 : index
      %287 = memref.load %arg2[%c29] : memref<98xf32, #tpu.memory_space<smem>>
      %288 = vector.broadcast %287 : f32 to vector<16x38xf32>
      %289 = arith.mulf %288, %286 : vector<16x38xf32>
      %290 = arith.addf %281, %289 : vector<16x38xf32>
      %c78 = arith.constant 78 : index
      %291 = memref.load %arg2[%c78] : memref<98xf32, #tpu.memory_space<smem>>
      %292 = vector.broadcast %291 : f32 to vector<16x38xf32>
      %293 = arith.mulf %292, %286 : vector<16x38xf32>
      %294 = arith.addf %285, %293 : vector<16x38xf32>
      %295 = vector.extract_strided_slice %22 {offsets = [9, 2], sizes = [16, 38], strides = [1, 1]} : vector<32x44xf32> to vector<16x38xf32>
      %c30 = arith.constant 30 : index
      %296 = memref.load %arg2[%c30] : memref<98xf32, #tpu.memory_space<smem>>
      %297 = vector.broadcast %296 : f32 to vector<16x38xf32>
      %298 = arith.mulf %297, %295 : vector<16x38xf32>
      %299 = arith.addf %290, %298 : vector<16x38xf32>
      %c79 = arith.constant 79 : index
      %300 = memref.load %arg2[%c79] : memref<98xf32, #tpu.memory_space<smem>>
      %301 = vector.broadcast %300 : f32 to vector<16x38xf32>
      %302 = arith.mulf %301, %295 : vector<16x38xf32>
      %303 = arith.addf %294, %302 : vector<16x38xf32>
      %304 = vector.extract_strided_slice %22 {offsets = [9, 3], sizes = [16, 38], strides = [1, 1]} : vector<32x44xf32> to vector<16x38xf32>
      %c31 = arith.constant 31 : index
      %305 = memref.load %arg2[%c31] : memref<98xf32, #tpu.memory_space<smem>>
      %306 = vector.broadcast %305 : f32 to vector<16x38xf32>
      %307 = arith.mulf %306, %304 : vector<16x38xf32>
      %308 = arith.addf %299, %307 : vector<16x38xf32>
      %c80 = arith.constant 80 : index
      %309 = memref.load %arg2[%c80] : memref<98xf32, #tpu.memory_space<smem>>
      %310 = vector.broadcast %309 : f32 to vector<16x38xf32>
      %311 = arith.mulf %310, %304 : vector<16x38xf32>
      %312 = arith.addf %303, %311 : vector<16x38xf32>
      %313 = vector.extract_strided_slice %22 {offsets = [9, 4], sizes = [16, 38], strides = [1, 1]} : vector<32x44xf32> to vector<16x38xf32>
      %c32 = arith.constant 32 : index
      %314 = memref.load %arg2[%c32] : memref<98xf32, #tpu.memory_space<smem>>
      %315 = vector.broadcast %314 : f32 to vector<16x38xf32>
      %316 = arith.mulf %315, %313 : vector<16x38xf32>
      %317 = arith.addf %308, %316 : vector<16x38xf32>
      %c81 = arith.constant 81 : index
      %318 = memref.load %arg2[%c81] : memref<98xf32, #tpu.memory_space<smem>>
      %319 = vector.broadcast %318 : f32 to vector<16x38xf32>
      %320 = arith.mulf %319, %313 : vector<16x38xf32>
      %321 = arith.addf %312, %320 : vector<16x38xf32>
      %322 = vector.extract_strided_slice %22 {offsets = [9, 5], sizes = [16, 38], strides = [1, 1]} : vector<32x44xf32> to vector<16x38xf32>
      %c33 = arith.constant 33 : index
      %323 = memref.load %arg2[%c33] : memref<98xf32, #tpu.memory_space<smem>>
      %324 = vector.broadcast %323 : f32 to vector<16x38xf32>
      %325 = arith.mulf %324, %322 : vector<16x38xf32>
      %326 = arith.addf %317, %325 : vector<16x38xf32>
      %c82 = arith.constant 82 : index
      %327 = memref.load %arg2[%c82] : memref<98xf32, #tpu.memory_space<smem>>
      %328 = vector.broadcast %327 : f32 to vector<16x38xf32>
      %329 = arith.mulf %328, %322 : vector<16x38xf32>
      %330 = arith.addf %321, %329 : vector<16x38xf32>
      %331 = vector.extract_strided_slice %22 {offsets = [9, 6], sizes = [16, 38], strides = [1, 1]} : vector<32x44xf32> to vector<16x38xf32>
      %c34 = arith.constant 34 : index
      %332 = memref.load %arg2[%c34] : memref<98xf32, #tpu.memory_space<smem>>
      %333 = vector.broadcast %332 : f32 to vector<16x38xf32>
      %334 = arith.mulf %333, %331 : vector<16x38xf32>
      %335 = arith.addf %326, %334 : vector<16x38xf32>
      %c83 = arith.constant 83 : index
      %336 = memref.load %arg2[%c83] : memref<98xf32, #tpu.memory_space<smem>>
      %337 = vector.broadcast %336 : f32 to vector<16x38xf32>
      %338 = arith.mulf %337, %331 : vector<16x38xf32>
      %339 = arith.addf %330, %338 : vector<16x38xf32>
      %340 = vector.extract_strided_slice %22 {offsets = [10, 0], sizes = [16, 38], strides = [1, 1]} : vector<32x44xf32> to vector<16x38xf32>
      %c35 = arith.constant 35 : index
      %341 = memref.load %arg2[%c35] : memref<98xf32, #tpu.memory_space<smem>>
      %342 = vector.broadcast %341 : f32 to vector<16x38xf32>
      %343 = arith.mulf %342, %340 : vector<16x38xf32>
      %344 = arith.addf %335, %343 : vector<16x38xf32>
      %c84 = arith.constant 84 : index
      %345 = memref.load %arg2[%c84] : memref<98xf32, #tpu.memory_space<smem>>
      %346 = vector.broadcast %345 : f32 to vector<16x38xf32>
      %347 = arith.mulf %346, %340 : vector<16x38xf32>
      %348 = arith.addf %339, %347 : vector<16x38xf32>
      %349 = vector.extract_strided_slice %22 {offsets = [10, 1], sizes = [16, 38], strides = [1, 1]} : vector<32x44xf32> to vector<16x38xf32>
      %c36 = arith.constant 36 : index
      %350 = memref.load %arg2[%c36] : memref<98xf32, #tpu.memory_space<smem>>
      %351 = vector.broadcast %350 : f32 to vector<16x38xf32>
      %352 = arith.mulf %351, %349 : vector<16x38xf32>
      %353 = arith.addf %344, %352 : vector<16x38xf32>
      %c85 = arith.constant 85 : index
      %354 = memref.load %arg2[%c85] : memref<98xf32, #tpu.memory_space<smem>>
      %355 = vector.broadcast %354 : f32 to vector<16x38xf32>
      %356 = arith.mulf %355, %349 : vector<16x38xf32>
      %357 = arith.addf %348, %356 : vector<16x38xf32>
      %358 = vector.extract_strided_slice %22 {offsets = [10, 2], sizes = [16, 38], strides = [1, 1]} : vector<32x44xf32> to vector<16x38xf32>
      %c37 = arith.constant 37 : index
      %359 = memref.load %arg2[%c37] : memref<98xf32, #tpu.memory_space<smem>>
      %360 = vector.broadcast %359 : f32 to vector<16x38xf32>
      %361 = arith.mulf %360, %358 : vector<16x38xf32>
      %362 = arith.addf %353, %361 : vector<16x38xf32>
      %c86 = arith.constant 86 : index
      %363 = memref.load %arg2[%c86] : memref<98xf32, #tpu.memory_space<smem>>
      %364 = vector.broadcast %363 : f32 to vector<16x38xf32>
      %365 = arith.mulf %364, %358 : vector<16x38xf32>
      %366 = arith.addf %357, %365 : vector<16x38xf32>
      %367 = vector.extract_strided_slice %22 {offsets = [10, 3], sizes = [16, 38], strides = [1, 1]} : vector<32x44xf32> to vector<16x38xf32>
      %c38 = arith.constant 38 : index
      %368 = memref.load %arg2[%c38] : memref<98xf32, #tpu.memory_space<smem>>
      %369 = vector.broadcast %368 : f32 to vector<16x38xf32>
      %370 = arith.mulf %369, %367 : vector<16x38xf32>
      %371 = arith.addf %362, %370 : vector<16x38xf32>
      %c87 = arith.constant 87 : index
      %372 = memref.load %arg2[%c87] : memref<98xf32, #tpu.memory_space<smem>>
      %373 = vector.broadcast %372 : f32 to vector<16x38xf32>
      %374 = arith.mulf %373, %367 : vector<16x38xf32>
      %375 = arith.addf %366, %374 : vector<16x38xf32>
      %376 = vector.extract_strided_slice %22 {offsets = [10, 4], sizes = [16, 38], strides = [1, 1]} : vector<32x44xf32> to vector<16x38xf32>
      %c39 = arith.constant 39 : index
      %377 = memref.load %arg2[%c39] : memref<98xf32, #tpu.memory_space<smem>>
      %378 = vector.broadcast %377 : f32 to vector<16x38xf32>
      %379 = arith.mulf %378, %376 : vector<16x38xf32>
      %380 = arith.addf %371, %379 : vector<16x38xf32>
      %c88 = arith.constant 88 : index
      %381 = memref.load %arg2[%c88] : memref<98xf32, #tpu.memory_space<smem>>
      %382 = vector.broadcast %381 : f32 to vector<16x38xf32>
      %383 = arith.mulf %382, %376 : vector<16x38xf32>
      %384 = arith.addf %375, %383 : vector<16x38xf32>
      %385 = vector.extract_strided_slice %22 {offsets = [10, 5], sizes = [16, 38], strides = [1, 1]} : vector<32x44xf32> to vector<16x38xf32>
      %c40 = arith.constant 40 : index
      %386 = memref.load %arg2[%c40] : memref<98xf32, #tpu.memory_space<smem>>
      %387 = vector.broadcast %386 : f32 to vector<16x38xf32>
      %388 = arith.mulf %387, %385 : vector<16x38xf32>
      %389 = arith.addf %380, %388 : vector<16x38xf32>
      %c89 = arith.constant 89 : index
      %390 = memref.load %arg2[%c89] : memref<98xf32, #tpu.memory_space<smem>>
      %391 = vector.broadcast %390 : f32 to vector<16x38xf32>
      %392 = arith.mulf %391, %385 : vector<16x38xf32>
      %393 = arith.addf %384, %392 : vector<16x38xf32>
      %394 = vector.extract_strided_slice %22 {offsets = [10, 6], sizes = [16, 38], strides = [1, 1]} : vector<32x44xf32> to vector<16x38xf32>
      %c41 = arith.constant 41 : index
      %395 = memref.load %arg2[%c41] : memref<98xf32, #tpu.memory_space<smem>>
      %396 = vector.broadcast %395 : f32 to vector<16x38xf32>
      %397 = arith.mulf %396, %394 : vector<16x38xf32>
      %398 = arith.addf %389, %397 : vector<16x38xf32>
      %c90 = arith.constant 90 : index
      %399 = memref.load %arg2[%c90] : memref<98xf32, #tpu.memory_space<smem>>
      %400 = vector.broadcast %399 : f32 to vector<16x38xf32>
      %401 = arith.mulf %400, %394 : vector<16x38xf32>
      %402 = arith.addf %393, %401 : vector<16x38xf32>
      %403 = vector.extract_strided_slice %22 {offsets = [11, 0], sizes = [16, 38], strides = [1, 1]} : vector<32x44xf32> to vector<16x38xf32>
      %c42 = arith.constant 42 : index
      %404 = memref.load %arg2[%c42] : memref<98xf32, #tpu.memory_space<smem>>
      %405 = vector.broadcast %404 : f32 to vector<16x38xf32>
      %406 = arith.mulf %405, %403 : vector<16x38xf32>
      %407 = arith.addf %398, %406 : vector<16x38xf32>
      %c91 = arith.constant 91 : index
      %408 = memref.load %arg2[%c91] : memref<98xf32, #tpu.memory_space<smem>>
      %409 = vector.broadcast %408 : f32 to vector<16x38xf32>
      %410 = arith.mulf %409, %403 : vector<16x38xf32>
      %411 = arith.addf %402, %410 : vector<16x38xf32>
      %412 = vector.extract_strided_slice %22 {offsets = [11, 1], sizes = [16, 38], strides = [1, 1]} : vector<32x44xf32> to vector<16x38xf32>
      %c43 = arith.constant 43 : index
      %413 = memref.load %arg2[%c43] : memref<98xf32, #tpu.memory_space<smem>>
      %414 = vector.broadcast %413 : f32 to vector<16x38xf32>
      %415 = arith.mulf %414, %412 : vector<16x38xf32>
      %416 = arith.addf %407, %415 : vector<16x38xf32>
      %c92 = arith.constant 92 : index
      %417 = memref.load %arg2[%c92] : memref<98xf32, #tpu.memory_space<smem>>
      %418 = vector.broadcast %417 : f32 to vector<16x38xf32>
      %419 = arith.mulf %418, %412 : vector<16x38xf32>
      %420 = arith.addf %411, %419 : vector<16x38xf32>
      %421 = vector.extract_strided_slice %22 {offsets = [11, 2], sizes = [16, 38], strides = [1, 1]} : vector<32x44xf32> to vector<16x38xf32>
      %c44 = arith.constant 44 : index
      %422 = memref.load %arg2[%c44] : memref<98xf32, #tpu.memory_space<smem>>
      %423 = vector.broadcast %422 : f32 to vector<16x38xf32>
      %424 = arith.mulf %423, %421 : vector<16x38xf32>
      %425 = arith.addf %416, %424 : vector<16x38xf32>
      %c93 = arith.constant 93 : index
      %426 = memref.load %arg2[%c93] : memref<98xf32, #tpu.memory_space<smem>>
      %427 = vector.broadcast %426 : f32 to vector<16x38xf32>
      %428 = arith.mulf %427, %421 : vector<16x38xf32>
      %429 = arith.addf %420, %428 : vector<16x38xf32>
      %430 = vector.extract_strided_slice %22 {offsets = [11, 3], sizes = [16, 38], strides = [1, 1]} : vector<32x44xf32> to vector<16x38xf32>
      %c45 = arith.constant 45 : index
      %431 = memref.load %arg2[%c45] : memref<98xf32, #tpu.memory_space<smem>>
      %432 = vector.broadcast %431 : f32 to vector<16x38xf32>
      %433 = arith.mulf %432, %430 : vector<16x38xf32>
      %434 = arith.addf %425, %433 : vector<16x38xf32>
      %c94 = arith.constant 94 : index
      %435 = memref.load %arg2[%c94] : memref<98xf32, #tpu.memory_space<smem>>
      %436 = vector.broadcast %435 : f32 to vector<16x38xf32>
      %437 = arith.mulf %436, %430 : vector<16x38xf32>
      %438 = arith.addf %429, %437 : vector<16x38xf32>
      %439 = vector.extract_strided_slice %22 {offsets = [11, 4], sizes = [16, 38], strides = [1, 1]} : vector<32x44xf32> to vector<16x38xf32>
      %c46 = arith.constant 46 : index
      %440 = memref.load %arg2[%c46] : memref<98xf32, #tpu.memory_space<smem>>
      %441 = vector.broadcast %440 : f32 to vector<16x38xf32>
      %442 = arith.mulf %441, %439 : vector<16x38xf32>
      %443 = arith.addf %434, %442 : vector<16x38xf32>
      %c95 = arith.constant 95 : index
      %444 = memref.load %arg2[%c95] : memref<98xf32, #tpu.memory_space<smem>>
      %445 = vector.broadcast %444 : f32 to vector<16x38xf32>
      %446 = arith.mulf %445, %439 : vector<16x38xf32>
      %447 = arith.addf %438, %446 : vector<16x38xf32>
      %448 = vector.extract_strided_slice %22 {offsets = [11, 5], sizes = [16, 38], strides = [1, 1]} : vector<32x44xf32> to vector<16x38xf32>
      %c47 = arith.constant 47 : index
      %449 = memref.load %arg2[%c47] : memref<98xf32, #tpu.memory_space<smem>>
      %450 = vector.broadcast %449 : f32 to vector<16x38xf32>
      %451 = arith.mulf %450, %448 : vector<16x38xf32>
      %452 = arith.addf %443, %451 : vector<16x38xf32>
      %c96 = arith.constant 96 : index
      %453 = memref.load %arg2[%c96] : memref<98xf32, #tpu.memory_space<smem>>
      %454 = vector.broadcast %453 : f32 to vector<16x38xf32>
      %455 = arith.mulf %454, %448 : vector<16x38xf32>
      %456 = arith.addf %447, %455 : vector<16x38xf32>
      %457 = vector.extract_strided_slice %22 {offsets = [11, 6], sizes = [16, 38], strides = [1, 1]} : vector<32x44xf32> to vector<16x38xf32>
      %c48 = arith.constant 48 : index
      %458 = memref.load %arg2[%c48] : memref<98xf32, #tpu.memory_space<smem>>
      %459 = vector.broadcast %458 : f32 to vector<16x38xf32>
      %460 = arith.mulf %459, %457 : vector<16x38xf32>
      %461 = arith.addf %452, %460 : vector<16x38xf32>
      %c97 = arith.constant 97 : index
      %462 = memref.load %arg2[%c97] : memref<98xf32, #tpu.memory_space<smem>>
      %463 = vector.broadcast %462 : f32 to vector<16x38xf32>
      %464 = arith.mulf %463, %457 : vector<16x38xf32>
      %465 = arith.addf %456, %464 : vector<16x38xf32>
      %466 = vector.extract_strided_slice %461 {offsets = [0, 0], sizes = [16, 16], strides = [1, 1]} : vector<16x38xf32> to vector<16x16xf32>
      %467 = vector.extract_strided_slice %465 {offsets = [0, 22], sizes = [16, 16], strides = [1, 1]} : vector<16x38xf32> to vector<16x16xf32>
      %468 = arith.addf %466, %467 : vector<16x16xf32>
      %469 = arith.negf %468 : vector<16x16xf32>
      %470 = math.exp %469 : vector<16x16xf32>
      %cst_14 = arith.constant 1.000000e+00 : f32
      %471 = vector.broadcast %cst_14 : f32 to vector<16x16xf32>
      %472 = arith.addf %471, %470 : vector<16x16xf32>
      %473 = arith.divf %471, %472 : vector<16x16xf32>
      %c0_15 = arith.constant 0 : index
      %c0_16 = arith.constant 0 : index
      %c0_17 = arith.constant 0 : index
      %474 = vector.load %arg6[%c0_15, %c0_16, %c0_17] : memref<4x16x16xf32, #tpu.memory_space<vmem>>, vector<4x16x16xf32>
      %475 = vector.shape_cast %473 : vector<16x16xf32> to vector<1x16x16xf32>
      %476 = vector.broadcast %475 : vector<1x16x16xf32> to vector<4x16x16xf32>
      %477 = arith.mulf %474, %476 : vector<4x16x16xf32>
      %c0_18 = arith.constant 0 : index
      %c0_19 = arith.constant 0 : index
      %c0_20 = arith.constant 0 : index
      %c0_21 = arith.constant 0 : index
      %478 = vector.load %arg4[%c0_18, %c0_19, %c0_20, %c0_21] : memref<1x4x16x16xf32, #tpu.memory_space<vmem>>, vector<1x4x16x16xf32>
      %479 = vector.shape_cast %478 : vector<1x4x16x16xf32> to vector<4x16x16xf32>
      %480 = vector.shape_cast %477 : vector<4x16x16xf32> to vector<1x4x16x16xf32>
      tpu.vector_store %arg4[%c0_18, %c0_19, %c0_20, %c0_21], %480 {strides = array<i32>} : memref<1x4x16x16xf32, #tpu.memory_space<vmem>>, vector<1x4x16x16xf32>,
    } else {
    }
    %c1_i32_4 = arith.constant 1 : i32
    %9 = arith.cmpi slt, %arg1, %c1_i32_4 : i32
    %10 = arith.extui %9 : i1 to i32
    %c0_i32_5 = arith.constant 0 : i32
    %11 = arith.cmpi ne, %10, %c0_i32_5 : i32
    scf.if %11 {
      %c0 = arith.constant 0 : index
      %c0_6 = arith.constant 0 : index
      %c0_7 = arith.constant 0 : index
      %c0_8 = arith.constant 0 : index
      %12 = vector.load %arg3[%c0, %c0_6, %c0_7, %c0_8] : memref<1x4x16x16xf32, #tpu.memory_space<vmem>>, vector<1x4x16x16xf32>
      %13 = vector.shape_cast %12 : vector<1x4x16x16xf32> to vector<4x16x16xf32>
      %c0_9 = arith.constant 0 : index
      %c0_10 = arith.constant 0 : index
      %c0_11 = arith.constant 0 : index
      %14 = vector.load %arg6[%c0_9, %c0_10, %c0_11] : memref<4x16x16xf32, #tpu.memory_space<vmem>>, vector<4x16x16xf32>
      tpu.vector_store %arg6[%c0_9, %c0_10, %c0_11], %13 {strides = array<i32>} : memref<4x16x16xf32, #tpu.memory_space<vmem>>, vector<4x16x16xf32>,
    } else {
    }
    return
  }
  func.func @transform_0(%arg0: i32, %arg1: i32) -> i32 {
    %c0_i32 = arith.constant 0 : i32
    %c0_i32_0 = arith.constant 0 : i32
    return %c0_i32 : i32
  }
  func.func @transform_1(%arg0: i32, %arg1: i32) -> (i32, i32, i32, i32) {
    %c0_i32 = arith.constant 0 : i32
    %0 = arith.minsi %arg1, %c0_i32 : i32
    %c0_i32_0 = arith.constant 0 : i32
    %c0_i32_1 = arith.constant 0 : i32
    %c0_i32_2 = arith.constant 0 : i32
    return %arg0, %c0_i32_0, %0, %c0_i32_1 : i32, i32, i32, i32
  }
  func.func @transform_2(%arg0: i32, %arg1: i32) -> (i32, i32, i32, i32) {
    %c1_i32 = arith.constant 1 : i32
    %0 = arith.subi %arg1, %c1_i32 : i32
    %c0_i32 = arith.constant 0 : i32
    %1 = arith.maxsi %0, %c0_i32 : i32
    %c0_i32_0 = arith.constant 0 : i32
    %c0_i32_1 = arith.constant 0 : i32
    %c0_i32_2 = arith.constant 0 : i32
    return %arg0, %c0_i32_0, %1, %c0_i32_1 : i32, i32, i32, i32
  }
}

</mosaic_0001>

<bundles_post_ra>
// kernel: sa_layer.1
= control target key start
LH: loop header
LB: loop body
LE: loop exit
PB: predicated region body
PF: predicated region fallthrough
CT: control target
= control target key end

     0   :  { %s5033_s0 = inlined_call_operand.vmem [shape: f32[98], index: 0, kind: input, shape index: {}]   ;;  %s5034_s1 = inlined_call_operand.hbm [shape: f32[2,4,16,16], index: 1, kind: input, shape index: {}]   ;;  %s5035_s2 = inlined_call_operand.hbm [shape: f32[2,4,16,16], index: 2, kind: output, shape index: {}]  }
   0x1   :  { %5052 = sst [smem:[#allocation55_spill]] %s5033_s0 }
   0x2   :  { %7 = vsyncpa [#allocation7], 0 }
   0x3   :  { %8 = vsyncpa [#allocation5], 0 }
   0x4   :  { %10 = vsyncpa [#allocation5 + $0x1], 0 }
   0x5   :  { %11 = vsyncpa [#allocation6], 0 }
   0x6   :  { %13 = vsyncpa [#allocation6 + $0x1], 0  ;;  %s3278_s9 = smov 0   ;;  %s3280_s10 = smov 0  }
   0x7   :  { %s3282_s11 = smov 0   ;;  %s3284_s12 = smov 0  }
   0x8   :  { %s3286_s13 = smov 0   ;;  %s3288_s14 = smov 0  }
   0x9   :  { %s3290_s15 = smov 0   ;;  %s3292_s16 = smov 0  }
   0xa   :  { %s3294_s17 = smov 0   ;;  %s3296_s18 = smov 0  }
   0xb   :  { %s3298_s19 = smov 0  }
   0xc LB: > { %5053 = sst [smem:[#allocation13_spill]] %s3236_s17  ;;  %s2788_s20 = sadd.s32 4294967295, %s3244_s19   ;;  %s3244_s19 = sphi %s3298_s19, %s19_s19   ;;  %s3240_s18 = sphi %s3296_s18, %s5181_s18   ;;  %s3236_s17 = sphi %s3294_s17, %s5180_s17   ;;  %s3232_s16 = sphi %s3292_s16, %s5179_s16   ;;  %s3228_s15 = sphi %s3290_s15, %s5170_s15   ;;  %s3224_s14 = sphi %s3288_s14, %s5178_s14   ;;  %s3220_s13 = sphi %s3286_s13, %s5177_s13   ;;  %s3216_s12 = sphi %s3284_s12, %s5176_s12   ;;  %s3212_s11 = sphi %s3282_s11, %s5175_s11   ;;  %s3208_s10 = sphi %s3280_s10, %s5174_s10   ;;  %s3204_s9 = sphi %s3278_s9, %s5173_s9  }
   0xd   : > { %s2789_s21 = sadd.s32 4294967294, %s3244_s19   ;;  %s65_s22 = sadd.s32 1, %s3224_s14 }
   0xe   : > { %p72_p0 = scmp.ne.s32.totalorder %s3224_s14, %s3220_s13  ;;  %p73_p1 = scmp.eq.s32.totalorder %s3244_s19, 0 }
   0xf   : > { %p78_p2 = scmp.ne.s32.totalorder %s3220_s13, %s3216_s12  ;;  %p3338_p3 = scmp.eq.s32.totalorder %s2788_s20, 0 }
  0x10   : > { %p3343_p4 = por %p73_p1, %p72_p0  ;;  %p109_p5 = scmp.ne.s32.totalorder %s3212_s11, %s3208_s10 }
  0x11   : > { %p3351_p6 = por %p3338_p3, %p78_p2  ;;  %p110_p7 = scmp.eq.s32.totalorder %s2788_s20, 3 }
  0x12   : > { %p115_p8 = scmp.ne.s32.totalorder %s3208_s10, %s3204_s9  ;;  %p116_p9 = scmp.eq.s32.totalorder %s2789_s21, 3 }
  0x13   : > { %s5056_s26 = scalar_select %p3351_p6, 1, 0 }
  0x14   : > { %p3357_p10 = por %p110_p7, %p109_p5  ;;  %p2792_p11 = scmp.ge.s32.totalorder %s3244_s19, 1 }
  0x15   : > { %p3362_p12 = por %p116_p9, %p115_p8  ;;  %p123_p13 = scmp.lt.s32.totalorder %s3244_s19, 5 }
  0x16   : > { %s5057_s27 = scalar_select %p3357_p10, 1, 0 }
  0x17   : > { %s5058_s28 = scalar_select %p3362_p12, 1, 0 }
  0x18   : > { %s5059_s0 = sld [smem:[#allocation55_spill]]  ;;  %p3370_p0 = pnand %p2792_p11, %p123_p13 }
  0x19   : > { %p2954_p2 = scmp.lt.s32.totalorder %s3244_s19, 4 }
  0x1a   : > { %s5060_s4 = scalar_select %p3370_p0, 1, 0 }
  0x1b   : > { %p2941_p1 = pneg %p3370_p0  ;;  %p3381_p7 = pnand %p2954_p2, %p3343_p4 }
  0x1d   : > { %p2942_p5 = pnand %p2941_p1, %p3338_p3 }
  0x1e   : > { %s136_s3 = sshll.u32 %s5059_s0, 4  ;;  %s137_s3 = int_to_ptr.vmem [resolvable:$true] %s136_s3 }
  0x1f   : > { %s3072_s6 = scalar_lea.vmem %s137_s3, 16  ;;  %p3074_p9 = pneg %p2942_p5 }
  0x20   : > { %p3073_p8 = scmp.ne.s32.totalorder %s137_s3, %s3072_s6  ;;  %p3080_p13 = scmp.lt.s32.totalorder %s137_s3, %s137_s3 }
  0x21   : > { %p3081_p10 = scmp.lt.s32.totalorder %s3072_s6, %s3072_s6 }
  0x22   : > { %p3075_p12 = pnand %p3074_p9, %p3073_p8 }
  0x23   : > { %p3082_p6 = por %p3081_p10, %p3080_p13 }
  0x24   : > { %p3076_p11 = pneg %p3075_p12 }
  0x26   : > { %p3083_p0 = pnand %p3082_p6, %p3076_p11 }
  0x28   : > { %3086 = shalt.err (!%p3083_p0)
}
  0x29   : > { %s3246_s7 = smov [#allocation4]   ;;  %s28_s8 = sadd.s32 1, %s3236_s17 }
  0x2a   : > { %2944 = dma.vmem_to_smem (!%p2942_p5), %s137_s3, 16, %s3246_s7, [#allocation7]  }
  0x2b   : > { %s31_s12 = sadd.s32 1, %s3240_s18  ;;  %p29_p4 = scmp.ge.s32.totalorder %s28_s8, 2 }
  0x2c   : > { %s147_s20 = sand.u32 1, %s3224_s14   ;;  %s3201_s30 = sshll.u32 %s3240_s18, 10 }
  0x2d   : > { %s5183_s8 = smov (%p29_p4, %s28_s8), 0  ;;  %s5185_s12 = smov (!%p29_p4, %s31_s12), %s3240_s18 }
  0x2e   : > { %5062 = sst [smem:[#allocation14_spill]] %s5183_s8  ;;  %p33_p6 = scmp.ge.s32.totalorder %s5185_s12, 2 }
  0x2f   : > { %s2795_s25 = sshll.u32 %s147_s20, 6  ;;  %s3404_s7 = scalar_lea.hbm %s5034_s1, %s3201_s30 }
  0x30   : > { %s5187_s12 = smov (%p33_p6, %s5185_s12), 0  ;;  %s151_s24 = scalar_lea.vmem [#allocation8], %s2795_s25 }
  0x31   : > { %s60_s21 = ssub.s32 %s3240_s18, %s5187_s12  ;;  %s162_s0 = sshll.u32 %s151_s24, 4  ;;  %s3411_s0 = int_to_ptr.vmem [resolvable:$true] %s162_s0 }
  0x32   : > { %p63_p10 = scmp.eq.s32.totalorder %s60_s21, 0  ;;  %s5063_s8 = sadd.s32 1, %s3212_s11 }
  0x33   : > { %s3413_s21 = scalar_lea.sflag [#allocation5], %s147_s20  ;;  %p3089_p0 = pneg %p3381_p7 }
  0x34   : > { %s3398_s29 = scalar_select %p63_p10, %s3224_s14, %s65_s22  }
  0x35   : > { %s3409_s17 = scalar_select %p63_p10, %s3212_s11, %s5063_s8  }
  0x36   : > { %s3087_s22 = scalar_lea.hbm %s3404_s7, 1024  ;;  %s3092_s25 = scalar_lea.hbm %s5034_s1, 2048 }
  0x37   : > { %p3088_p12 = scmp.ne.s32.totalorder %s3404_s7, %s3087_s22  ;;  %p3093_p5 = scmp.lt.u32.totalorder %s3404_s7, %s5034_s1 }
  0x38   : > { %p3094_p8 = scmp.lt.u32.totalorder %s3092_s25, %s3087_s22  ;;  %p3096_p11 = scmp.lt.u32.totalorder %s3087_s22, %s3404_s7 }
  0x39   : > { %p3090_p1 = pnand %p3089_p0, %p3088_p12 }
  0x3a   : > { %p3095_p9 = por %p3094_p8, %p3093_p5 }
  0x3b   : > { %p3091_p2 = pneg %p3090_p1 }
  0x3c   : > { %p3097_p13 = por %p3096_p11, %p3095_p9 }
  0x3e   : > { %p3098_p4 = pnand %p3097_p13, %p3091_p2 }
  0x40   : > { %3101 = shalt.err (!%p3098_p4)
}
  0x41   : > { %s3102_s8 = scalar_lea.vmem %s3411_s0, 1024  ;;  %s3247_s20 = smov [#allocation8]  }
  0x42   : > { %p3103_p6 = scmp.ne.s32.totalorder %s3411_s0, %s3102_s8  ;;  %s3107_s30 = sshll.u32 %s3247_s20, 4  ;;  %s3108_s30 = int_to_ptr.vmem [resolvable:$false] %s3107_s30 }
  0x43   : > { %s3109_s3 = scalar_lea.vmem %s3108_s30, 2048  ;;  %p3110_p1 = scmp.lt.s32.totalorder %s3411_s0, %s3108_s30 }
  0x44   : > { %p3105_p10 = pnand %p3103_p6, %p3089_p0  ;;  %p3111_p5 = scmp.lt.s32.totalorder %s3109_s3, %s3102_s8 }
  0x46   : > { %p3106_p12 = pneg %p3105_p10  ;;  %p3112_p8 = por %p3111_p5, %p3110_p1 }
  0x48   : > { %p3113_p9 = pnand %p3112_p8, %p3106_p12 }
  0x4a   : > { %3116 = shalt.err (!%p3113_p9)
}
  0x4b   : > { %s3248_s22 = smov 128   ;;  %s3249_s25 = smov 8  }
  0x4c   : > { %2948 = dma.hbm_to_vmem [thread:$0]  (!%p3381_p7), %s3404_s7, 1024, %s3411_s0, %s3413_s21, %s3248_s22, %s3248_s22, %s3249_s25  }
  0x4d   : > { %p5064_p0 = scmp.ne.s32.totalorder %s5060_s4, 0 }
  0x4f   : > { %174 = sbr.rel (%p5064_p0) target bundleno = 975 (0x3cf), region = 28 }
  0x56   : > { %3190 = dma.done.wait (%p3338_p3), [#allocation7], 16  }
  0x57   : > { %3192 = vsyncadd (%p3338_p3), [#allocation7], 4294967280  ;;  %s180_s24 = sand.u32 1, %s3220_s13   ;;  %p5065_p2 = scmp.ne.s32.totalorder %s5056_s26, 0 }
  0x58   : > { %s2801_s6 = sshll.u32 %s180_s24, 6  ;;  %s181_s8 = scalar_lea.sflag [#allocation5], %s180_s24 }
  0x59   : > { %s3448_s20 = scalar_lea.vmem [#allocation8], %s2801_s6 }
  0x5a   : > { %3194 = dma.done.wait (%p5065_p2), %s181_s8, 1024  }
  0x5b   : > { %3196 = vsyncadd (%p5065_p2), %s181_s8, 4294966272 }
  0x5c   : > { %189 = sfence }
  0x5d   : > { %s5040_s0 = sand.u32 1, %s3208_s10   ;;  %p2803_p3 = scmp.ne.s32.totalorder %s3228_s15, 0 }
  0x5e   : > { %s2802_s4 = sshll.u32 %s5040_s0, 6  ;;  %vm217_vm0 = vcmask (!%p2803_p3), 130048   ;;  %v3250_v0 = vmov (!%p2803_p3), 0.0  }
  0x5f   : > { %s3457_s23 = scalar_lea.vmem [#allocation9], %s2802_s4  ;;  %216 = sbr.rel (%p2803_p3) target bundleno = 102 (0x66), region = 40  ;;  %218 = vst.msk [vmem:[#allocation2] sm:$0xff] (!%p2803_p3), %vm217_vm0, %v3250_v0  ;;  %219 = vst.msk [vmem:[#allocation2 + $0x8] sm:$0xff] (!%p2803_p3), %vm217_vm0, %v3250_v0 }
  0x60   : > { %220 = vst.msk [vmem:[#allocation2 + $0x10] sm:$0xff] (!%p2803_p3), %vm217_vm0, %v3250_v0  ;;  %221 = vst.msk [vmem:[#allocation2 + $0x18] sm:$0xff] (!%p2803_p3), %vm217_vm0, %v3250_v0 }
  0x61   : > { %222 = vst.msk [vmem:[#allocation2 + $0x20] sm:$0xff] (!%p2803_p3), %vm217_vm0, %v3250_v0  ;;  %223 = vst.msk [vmem:[#allocation2 + $0x28] sm:$0xff] (!%p2803_p3), %vm217_vm0, %v3250_v0 }
  0x62   : > { %224 = vst.msk [vmem:[#allocation2 + $0x30] sm:$0xff] (!%p2803_p3), %vm217_vm0, %v3250_v0  ;;  %225 = vst.msk [vmem:[#allocation2 + $0x38] sm:$0xff] (!%p2803_p3), %vm217_vm0, %v3250_v0 }
  0x66 PF: > { %p2804_p7 = scmp.ge.s32.totalorder %s3228_s15, 1 }
  0x67   : > { %v230_v1 = vld [vmem:[%s3448_s20] sm:$0xff] (!%p2804_p7)  ;;  %v2805_v2 = vld [vmem:[%s3448_s20 + $0x10] sm:$0xff] (!%p2804_p7)  ;;  %s2811_s26 = sshll.u32 (!%p2804_p7), %s3228_s15, 4  ;;  %v231_v5 = vld [vmem:[%s3448_s20 + $0x8] sm:$0xff] (!%p2804_p7)  ;;  %vm258_vm1 = vcmask (!%p2804_p7), 130048  }
  0x68   : > { %229 = sbr.rel (%p2804_p7) target bundleno = 114 (0x72), region = 44  ;;  %v2807_v3 = vld [vmem:[%s3448_s20 + $0x20] sm:$0xff] (!%p2804_p7)  ;;  %v235_v4 = vadd.f32 (!%p2804_p7), %v2805_v2, %v230_v1  ;;  %v2806_v6 = vld [vmem:[%s3448_s20 + $0x18] sm:$0xff] (!%p2804_p7)  ;;  %v237_v7 = vmax.f32 (!%p2804_p7), %v230_v1, %v2805_v2  ;;  %v2809_v8 = vld [vmem:[%s3448_s20 + $0x30] sm:$0xff] (!%p2804_p7)  ;;  %s2723_s5 = scalar_lea.vmem (!%p2804_p7), [#allocation2], %s2811_s26 }
  0x69   : > { %v236_v9 = vadd.f32 (!%p2804_p7), %v2806_v6, %v231_v5  ;;  %v2808_v10 = vld [vmem:[%s3448_s20 + $0x28] sm:$0xff] (!%p2804_p7)  ;;  %v238_v11 = vmax.f32 (!%p2804_p7), %v231_v5, %v2806_v6  ;;  %v2810_v13 = vld [vmem:[%s3448_s20 + $0x38] sm:$0xff] (!%p2804_p7) }
  0x6a   : > { %v242_v12 = vadd.f32 (!%p2804_p7), %v2807_v3, %v235_v4  ;;  %v244_v14 = vmax.f32 (!%p2804_p7), %v237_v7, %v2807_v3 }
  0x6b   : > { %v243_v15 = vadd.f32 (!%p2804_p7), %v2808_v10, %v236_v9  ;;  %v245_v16 = vmax.f32 (!%p2804_p7), %v238_v11, %v2808_v10 }
  0x6c   : > { %v249_v17 = vadd.f32 (!%p2804_p7), %v2809_v8, %v242_v12  ;;  %v251_v18 = vmax.f32 (!%p2804_p7), %v244_v14, %v2809_v8 }
  0x6d   : > { %v250_v19 = vadd.f32 (!%p2804_p7), %v2810_v13, %v243_v15  ;;  %v252_v20 = vmax.f32 (!%p2804_p7), %v245_v16, %v2810_v13 }
  0x6e   : > { %v255_v21 = vmul.f32 (!%p2804_p7), 0.25, %v249_v17  ;;  %2815 = vst.msk [vmem:[%s2723_s5 + $0x28] sm:$0xff] (!%p2804_p7), %vm258_vm1, %v251_v18 }
  0x6f   : > { %v256_v22 = vmul.f32 0.25, %v250_v19  ;;  %2816 = vst.msk [vmem:[%s2723_s5 + $0x30] sm:$0xff] %vm258_vm1, %v252_v20 }
  0x70   : > { %2812 = vst.msk [vmem:[%s2723_s5 + $0x8] sm:$0xff] %vm258_vm1, %v255_v21 }
  0x71   : > { %2813 = vst.msk [vmem:[%s2723_s5 + $0x10] sm:$0xff] %vm258_vm1, %v256_v22 }
  0x72 PF: > { %p2817_p11 = scmp.lt.s32.totalorder %s3228_s15, 1 }
  0x74   : > { %268 = sbr.rel (%p2817_p11) target bundleno = 938 (0x3aa), region = 48 }
  0x7b   : > { %s2818_s7 = sadd.s32 4294967295, %s3228_s15  ;;  %s3251_s3 = smov 3   ;;  %vm314_vm2 = vcmask 23552   ;;  %vm319_vm3 = vcmask 154624   ;;  %vm324_vm4 = vcmask 203776   ;;  %vm329_vm5 = vcmask 334848  }
  0x7c   : > { %s2819_s21 = sshll.u32 %s2818_s7, 4  ;;  %s3252_s22 = smov 25   ;;  %vm598_vm6 = vcmask 1046528   ;;  %vm1559_vm7 = vcmask 1043456   ;;  %vm937_vm8 = vcmask 1045504   ;;  %vm1274_vm9 = vcmask 1044480  }
  0x7d   : > { %s271_s30 = scalar_lea.vmem [#allocation2], %s2819_s21  ;;  %s2826_s25 = sld [smem:[#allocation4 + $0x1]]  ;;  %vm1898_vm10 = vcmask 1042432   ;;  %vm2237_vm11 = vcmask 1041408   ;;  %vm2627_vm12 = vcmask 130048  }
  0x7e   : > { %v274_v23 = vld [vmem:[%s271_s30 + $0x10] sm:$0xff]  ;;  %v272_v24 = vld [vmem:[%s271_s30] sm:$0xff]  ;;  %v275_v25 = vld [vmem:[%s271_s30 + $0x18] sm:$0xff]  ;;  %s2827_s24 = sld [smem:[#allocation4 + $0x32]]  ;;  %s3253_s8 = smov 127  }
  0x7f   : > { %290 = vrot.lane.b32.xlu1 %v274_v23, %s3251_s3  ;;  %286 = vrot.lane.b32.xlu0 %v272_v24, %s3251_s3  ;;  %v273_v26 = vld [vmem:[%s271_s30 + $0x8] sm:$0xff]  ;;  %v2821_v28 = vld [vmem:[%s271_s30 + $0x20] sm:$0xff]  ;;  %s2828_s6 = sld [smem:[#allocation4 + $0x2]]  ;;  %s2829_s4 = sld [smem:[#allocation4 + $0x33]] }
  0x80   : > { %v2822_v27 = vld [vmem:[%s271_s30 + $0x28] sm:$0xff]  ;;  %v2824_v29 = vld [vmem:[%s271_s30 + $0x38] sm:$0xff]  ;;  %v2823_v30 = vld [vmem:[%s271_s30 + $0x30] sm:$0xff]  ;;  %s2830_s26 = sld [smem:[#allocation4 + $0x3]]  ;;  %s3254_s5 = smov 126  }
  0x81   : > { %s2831_s7 = sld [smem:[#allocation4 + $0x34]]  ;;  %s3255_s30 = smov 125  }
  0x82   : > { %s2832_s21 = sld [smem:[#allocation4 + $0x4]]  ;;  %s2844_s0 = sld [smem:[#allocation4 + $0xa]] }
  0x83   : > { %292 = vrot.lane.b32.xlu1 %v275_v25, %s3251_s3  ;;  %288 = vrot.lane.b32.xlu0 %v273_v26, %s3251_s3  ;;  %v351_v43 = vstv %s2826_s25  ;;  %s2833_s3 = sld [smem:[#allocation4 + $0x35]]  ;;  %s3256_s25 = smov 124  }
  0x84   : > { %v371_v54 = vstv %s2827_s24  ;;  %s2835_s24 = sld [smem:[#allocation4 + $0x36]] }
  0x85   : > { %v391_v63 = vstv %s2828_s6  ;;  %v411_v2 = vstv %s2829_s4  ;;  %s2836_s6 = sld [smem:[#allocation4 + $0x6]]  ;;  %s3257_s4 = smov 123  }
  0x86   : > { %v431_v7 = vstv %s2830_s26  ;;  %s2837_s26 = sld [smem:[#allocation4 + $0x37]] }
  0x87   : > { %304 = vrot.lane.b32.xlu1 %v2822_v27, %s3252_s22  ;;  %302 = vrot.lane.b32.xlu0 %v2821_v28, %s3252_s22  ;;  %v451_v10 = vstv %s2831_s7  ;;  %s2841_s7 = sld [smem:[#allocation4 + $0x39]] }
  0x88   : > { %v471_v15 = vstv %s2832_s21  ;;  %s2840_s21 = sld [smem:[#allocation4 + $0x8]] }
  0x89   : > { %v491_v18 = vstv %s2833_s3  ;;  %s3258_s3 = smov 122  }
  0x8a   : > { %v531_v26 = vstv %s2835_s24  ;;  %s2842_s24 = sld [smem:[#allocation4 + $0x9]] }
  0x8b   : > { %308 = vrot.lane.b32.xlu1 %v2824_v29, %s3252_s22  ;;  %306 = vrot.lane.b32.xlu0 %v2823_v30, %s3252_s22  ;;  %s2834_s22 = sld [smem:[#allocation4 + $0x5]] }
  0x91   : > { %v511_v23 = vstv %s2834_s22  ;;  %s2843_s22 = sld [smem:[#allocation4 + $0x3a]] }
  0xf1   : > { %v291_v31 = vpop.permute.xlu1 %290  ;;  %v287_v32 = vpop.permute.xlu0 %286 }
  0xf2   : > { %v315_v35 = vsel %vm314_vm2, 0.0, %v287_v32  ;;  %v317_v44 = vsel %vm314_vm2, 0.0, %v291_v31  ;;  %v551_v31 = vstv %s2836_s6  ;;  %s2845_s6 = sld [smem:[#allocation4 + $0x3b]] }
  0xf3   : > { %v320_v39 = vsel %vm319_vm3, %v315_v35, 0.0  ;;  %v322_v51 = vsel %vm319_vm3, %v317_v44, 0.0  ;;  %v680_v44 = vstv %s2842_s24  ;;  %s2851_s24 = sld [smem:[#allocation4 + $0x3e]] }
  0xf5   : > { %v293_v33 = vpop.permute.xlu1 %292  ;;  %v289_v34 = vpop.permute.xlu0 %288 }
  0xf6   : > { %v318_v36 = vsel %vm314_vm2, 0.0, %v293_v33  ;;  %v316_v37 = vsel %vm314_vm2, 0.0, %v289_v34  ;;  %v571_v34 = vstv %s2837_s26  ;;  %s2846_s26 = sld [smem:[#allocation4 + $0xb]] }
  0xf7   : > { %v323_v38 = vsel %vm319_vm3, %v318_v36, 0.0  ;;  %v321_v40 = vsel %vm319_vm3, %v316_v37, 0.0  ;;  %v655_v37 = vstv %s2841_s7  ;;  %s2848_s7 = sld [smem:[#allocation4 + $0xc]] }
  0xf9   : > { %v305_v41 = vpop.permute.xlu1 %304  ;;  %v303_v42 = vpop.permute.xlu0 %302 }
  0xfa   : > { %v326_v45 = vsel %vm324_vm4, %v321_v40, %v305_v41  ;;  %v325_v46 = vsel %vm324_vm4, %v320_v39, %v303_v42 }
  0xfb   : > { %v3484_v47 = vsel %vm329_vm5, %v326_v45, 0.0  ;;  %v3487_v48 = vsel %vm329_vm5, %v325_v46, 0.0 }
  0xfc   : > { %v353_v49 = vmul.f32 %v351_v43, %v3484_v47  ;;  %v352_v50 = vmul.f32 %v351_v43, %v3487_v48  ;;  %v372_v59 = vmul.f32 %v371_v54, %v3487_v48  ;;  %v373_v62 = vmul.f32 %v371_v54, %v3484_v47 }
  0xfd   : > { %v309_v52 = vpop.permute.xlu1 %308  ;;  %v307_v53 = vpop.permute.xlu0 %306  ;;  %v393_v0 = vmul.f32 %v391_v63, %v3484_v47  ;;  %v392_v1 = vmul.f32 %v391_v63, %v3487_v48  ;;  %v412_v3 = vmul.f32 %v411_v2, %v3487_v48  ;;  %v413_v6 = vmul.f32 %v411_v2, %v3484_v47 }
  0xfe   : > { %v328_v55 = vsel %vm324_vm4, %v323_v38, %v309_v52  ;;  %v327_v56 = vsel %vm324_vm4, %v322_v51, %v307_v53  ;;  %360 = vrot.lane.b32.xlu1 %v353_v49, %s3253_s8  ;;  %358 = vrot.lane.b32.xlu0 %v352_v50, %s3253_s8  ;;  %v433_v8 = vmul.f32 %v431_v7, %v3484_v47  ;;  %v630_v38 = vstv %s2840_s21  ;;  %s2849_s21 = sld [smem:[#allocation4 + $0x3d]] }
  0xff   : > { %v3497_v57 = vsel %vm329_vm5, %v328_v55, 0.0  ;;  %v3500_v58 = vsel %vm329_vm5, %v327_v56, 0.0  ;;  %v432_v9 = vmul.f32 %v431_v7, %v3487_v48  ;;  %v452_v11 = vmul.f32 %v451_v10, %v3487_v48 }
 0x100   : > { %v354_v60 = vmul.f32 %v351_v43, %v3500_v58  ;;  %v374_v61 = vmul.f32 %v371_v54, %v3500_v58  ;;  %v394_v4 = vmul.f32 %v391_v63, %v3500_v58  ;;  %v414_v5 = vmul.f32 %v411_v2, %v3500_v58 }
 0x101   : > { %v434_v12 = vmul.f32 %v431_v7, %v3500_v58  ;;  %v454_v13 = vmul.f32 %v451_v10, %v3500_v58  ;;  %v453_v14 = vmul.f32 %v451_v10, %v3484_v47  ;;  %v473_v16 = vmul.f32 %v471_v15, %v3484_v47 }
 0x102   : > { %378 = vrot.lane.b32.xlu1 %v372_v59, %s3253_s8  ;;  %362 = vrot.lane.b32.xlu0 %v354_v60, %s3253_s8  ;;  %v472_v17 = vmul.f32 %v471_v15, %v3487_v48  ;;  %v492_v19 = vmul.f32 %v491_v18, %v3487_v48  ;;  %v474_v20 = vmul.f32 %v471_v15, %v3500_v58  ;;  %v705_v43 = vstv %s2843_s22  ;;  %s2850_s22 = sld [smem:[#allocation4 + $0xd]] }
 0x103   : > { %v494_v21 = vmul.f32 %v491_v18, %v3500_v58  ;;  %v493_v22 = vmul.f32 %v491_v18, %v3484_v47  ;;  %v513_v24 = vmul.f32 %v511_v23, %v3484_v47  ;;  %v512_v25 = vmul.f32 %v511_v23, %v3487_v48 }
 0x104   : > { %v532_v27 = vmul.f32 %v531_v26, %v3487_v48  ;;  %v514_v28 = vmul.f32 %v511_v23, %v3500_v58  ;;  %v534_v29 = vmul.f32 %v531_v26, %v3500_v58  ;;  %v533_v30 = vmul.f32 %v531_v26, %v3484_v47 }
 0x105   : > { %v553_v32 = vmul.f32 %v551_v31, %v3484_v47  ;;  %v552_v33 = vmul.f32 %v551_v31, %v3487_v48  ;;  %v572_v35 = vmul.f32 %v571_v34, %v3487_v48  ;;  %v554_v36 = vmul.f32 %v551_v31, %v3500_v58 }
 0x106   : > { %382 = vrot.lane.b32.xlu1 %v374_v61, %s3253_s8  ;;  %380 = vrot.lane.b32.xlu0 %v373_v62, %s3253_s8  ;;  %v574_v39 = vmul.f32 %v571_v34, %v3500_v58  ;;  %v573_v40 = vmul.f32 %v571_v34, %v3484_v47  ;;  %v658_v41 = vmul.f32 %v655_v37, %v3500_v58  ;;  %v755_v51 = vstv %s2845_s6  ;;  %s2888_s6 = sld [smem:[#allocation4 + $0x20]] }
 0x107   : > { %v633_v42 = vmul.f32 %v630_v38, %v3500_v58  ;;  %v708_v49 = vmul.f32 %v705_v43, %v3500_v58  ;;  %v683_v50 = vmul.f32 %v680_v44, %v3500_v58  ;;  %v730_v52 = vstv %s2844_s0  ;;  %s2847_s0 = sld [smem:[#allocation4 + $0x3c]] }
 0x108   : > { %v665_v45 = vrot.slane %v658_v41, 1  ;;  %v3577_v55 = vmul.f32 %v755_v51, %v3500_v58  ;;  %v733_v56 = vmul.f32 %v730_v52, %v3500_v58  ;;  %v632_v59 = vmul.f32 %v630_v38, %v3484_v47 }
 0x109   : > { %v640_v46 = vrot.slane %v633_v42, 1  ;;  %v715_v53 = vrot.slane %v708_v49, 1  ;;  %v690_v54 = vrot.slane %v683_v50, 1  ;;  %v780_v60 = vstv %s2846_s26  ;;  %s2854_s26 = sld [smem:[#allocation4 + $0xf]] }
 0x10a   : > { %400 = vrot.lane.b32.xlu1 %v393_v0, %s3254_s5  ;;  %398 = vrot.lane.b32.xlu0 %v392_v1, %s3254_s5  ;;  %v765_v61 = vrot.slane %v3577_v55, 1  ;;  %v740_v62 = vrot.slane %v733_v56, 1  ;;  %v3585_v63 = vmul.f32 %v780_v60, %v3500_v58  ;;  %v656_v0 = vmul.f32 %v655_v37, %v3487_v48 }
 0x10b   : > { %v657_v1 = vmul.f32 %v655_v37, %v3484_v47  ;;  %v631_v2 = vmul.f32 %v630_v38, %v3487_v48  ;;  %v706_v10 = vmul.f32 %v705_v43, %v3487_v48  ;;  %v731_v26 = vmul.f32 %v730_v52, %v3487_v48 }
 0x10c   : > { %v782_v34 = vmul.f32 %v780_v60, %v3484_v47  ;;  %v855_v56 = vstv %s2849_s21  ;;  %s2857_s21 = sld [smem:[#allocation4 + $0x41]] }
 0x10d   : > { %v663_v7 = vrot.slane %v657_v1, 1  ;;  %v856_v1 = vmul.f32 %v855_v56, %v3487_v48 }
 0x10e   : > { %418 = vrot.lane.b32.xlu1 %v412_v3, %s3254_s5  ;;  %402 = vrot.lane.b32.xlu0 %v394_v4, %s3254_s5  ;;  %v638_v3 = vrot.slane %v632_v59, 1  ;;  %v790_v4 = vrot.slane %v3585_v63, 1 }
 0x10f   : > { %v666_v18 = vsel %vm598_vm6, %v663_v7, %v665_v45 }
 0x112   : > { %422 = vrot.lane.b32.xlu1 %v414_v5, %s3254_s5  ;;  %420 = vrot.lane.b32.xlu0 %v413_v6, %s3254_s5  ;;  %v641_v5 = vsel %vm598_vm6, %v638_v3, %v640_v46  ;;  %v662_v6 = vrot.slane %v656_v0, 1 }
 0x116   : > { %440 = vrot.lane.b32.xlu1 %v433_v8, %s3255_s30  ;;  %438 = vrot.lane.b32.xlu0 %v432_v9, %s3255_s30  ;;  %v637_v8 = vrot.slane %v631_v2, 1  ;;  %v682_v9 = vmul.f32 %v680_v44, %v3484_v47  ;;  %v857_v2 = vmul.f32 %v855_v56, %v3484_v47 }
 0x118   : > { %v688_v15 = vrot.slane %v682_v9, 1  ;;  %v862_v9 = vrot.slane %v856_v1, 1 }
 0x11a   : > { %458 = vrot.lane.b32.xlu1 %v452_v11, %s3255_s30  ;;  %442 = vrot.lane.b32.xlu0 %v434_v12, %s3255_s30  ;;  %v664_v11 = vsel %vm598_vm6, %v662_v6, %v663_v7  ;;  %v639_v12 = vsel %vm598_vm6, %v637_v8, %v638_v3  ;;  %v880_v6 = vstv %s2850_s22  ;;  %s2858_s22 = sld [smem:[#allocation4 + $0x11]] }
 0x11e   : > { %462 = vrot.lane.b32.xlu1 %v454_v13, %s3255_s30  ;;  %460 = vrot.lane.b32.xlu0 %v453_v14, %s3255_s30  ;;  %v707_v13 = vmul.f32 %v705_v43, %v3484_v47  ;;  %v681_v14 = vmul.f32 %v680_v44, %v3487_v48  ;;  %v830_v43 = vstv %s2848_s7  ;;  %s2856_s7 = sld [smem:[#allocation4 + $0x10]] }
 0x11f   : > { %v832_v50 = vmul.f32 %v830_v43, %v3484_v47  ;;  %v831_v55 = vmul.f32 %v830_v43, %v3487_v48 }
 0x121   : > { %v837_v0 = vrot.slane %v831_v55, 1 }
 0x122   : > { %480 = vrot.lane.b32.xlu1 %v473_v16, %s3256_s25  ;;  %478 = vrot.lane.b32.xlu0 %v472_v17, %s3256_s25  ;;  %v712_v16 = vrot.slane %v706_v10, 1  ;;  %v691_v17 = vsel %vm598_vm6, %v688_v15, %v690_v54  ;;  %v863_v10 = vrot.slane %v857_v2, 1 }
 0x124   : > { %v1019_v2 = vstv %s2856_s7  ;;  %s2863_s7 = sld [smem:[#allocation4 + $0x44]] }
 0x126   : > { %498 = vrot.lane.b32.xlu1 %v492_v19, %s3256_s25  ;;  %482 = vrot.lane.b32.xlu0 %v474_v20, %s3256_s25  ;;  %v713_v19 = vrot.slane %v707_v13, 1  ;;  %v687_v20 = vrot.slane %v681_v14, 1  ;;  %v882_v13 = vmul.f32 %v880_v6, %v3484_v47  ;;  %v905_v14 = vstv %s2851_s24  ;;  %s2859_s24 = sld [smem:[#allocation4 + $0x42]] }
 0x128   : > { %v714_v23 = vsel %vm598_vm6, %v712_v16, %v713_v19 }
 0x12a   : > { %502 = vrot.lane.b32.xlu1 %v494_v21, %s3256_s25  ;;  %500 = vrot.lane.b32.xlu0 %v493_v22, %s3256_s25  ;;  %v732_v21 = vmul.f32 %v730_v52, %v3484_v47  ;;  %v756_v22 = vmul.f32 %v755_v51, %v3487_v48 }
 0x12c   : > { %v762_v31 = vrot.slane %v756_v22, 1  ;;  %v906_v22 = vmul.f32 %v905_v14, %v3487_v48 }
 0x12e   : > { %520 = vrot.lane.b32.xlu1 %v513_v24, %s3257_s4  ;;  %518 = vrot.lane.b32.xlu0 %v512_v25, %s3257_s4  ;;  %v689_v24 = vsel %vm598_vm6, %v687_v20, %v688_v15  ;;  %v757_v25 = vmul.f32 %v755_v51, %v3484_v47  ;;  %v833_v51 = vmul.f32 %v830_v43, %v3500_v58 }
 0x12f   : > { %v864_v15 = vsel %vm598_vm6, %v862_v9, %v863_v10 }
 0x132   : > { %538 = vrot.lane.b32.xlu1 %v532_v27, %s3257_s4  ;;  %522 = vrot.lane.b32.xlu0 %v514_v28, %s3257_s4  ;;  %v738_v27 = vrot.slane %v732_v21, 1  ;;  %v716_v28 = vsel %vm598_vm6, %v713_v19, %v715_v53  ;;  %v888_v21 = vrot.slane %v882_v13, 1  ;;  %v1021_v13 = vmul.f32 %v1019_v2, %v3484_v47 }
 0x136   : > { %542 = vrot.lane.b32.xlu1 %v534_v29, %s3257_s4  ;;  %540 = vrot.lane.b32.xlu0 %v533_v30, %s3257_s4  ;;  %v805_v29 = vstv %s2847_s0  ;;  %v741_v30 = vsel %vm598_vm6, %v738_v27, %v740_v62  ;;  %s2855_s0 = sld [smem:[#allocation4 + $0x40]] }
 0x137   : > { %v808_v49 = vmul.f32 %v805_v29, %v3500_v58 }
 0x13a   : > { %560 = vrot.lane.b32.xlu1 %v553_v32, %s3258_s3  ;;  %558 = vrot.lane.b32.xlu0 %v552_v33, %s3258_s3  ;;  %v763_v32 = vrot.slane %v757_v25, 1  ;;  %v737_v33 = vrot.slane %v731_v26, 1  ;;  %v907_v26 = vmul.f32 %v905_v14, %v3484_v47 }
 0x13c   : > { %v764_v37 = vsel %vm598_vm6, %v762_v31, %v763_v32  ;;  %v739_v38 = vsel %vm598_vm6, %v737_v33, %v738_v27  ;;  %v3681_v27 = vstv %s2888_s6  ;;  %v908_v31 = vmul.f32 %v905_v14, %v3500_v58  ;;  %s2860_s6 = sld [smem:[#allocation4 + $0x12]] }
 0x13d   : > { %v1022_v14 = vmul.f32 %v1019_v2, %v3500_v58 }
 0x13e   : > { %578 = vrot.lane.b32.xlu1 %v572_v35, %s3258_s3  ;;  %562 = vrot.lane.b32.xlu0 %v554_v36, %s3258_s3  ;;  %v806_v35 = vmul.f32 %v805_v29, %v3487_v48  ;;  %v807_v36 = vmul.f32 %v805_v29, %v3484_v47 }
 0x140   : > { %v812_v41 = vrot.slane %v806_v35, 1  ;;  %v813_v42 = vrot.slane %v807_v36, 1  ;;  %v912_v35 = vrot.slane %v906_v22, 1  ;;  %v913_v36 = vrot.slane %v907_v26, 1 }
 0x142   : > { %582 = vrot.lane.b32.xlu1 %v574_v39, %s3258_s3  ;;  %580 = vrot.lane.b32.xlu0 %v573_v40, %s3258_s3  ;;  %v781_v39 = vmul.f32 %v780_v60, %v3487_v48  ;;  %v788_v40 = vrot.slane %v782_v34, 1  ;;  %v814_v52 = vsel %vm598_vm6, %v812_v41, %v813_v42  ;;  %v915_v41 = vrot.slane %v908_v31, 1 }
 0x143   : > { %v914_v43 = vsel %vm598_vm6, %v912_v35, %v913_v36 }
 0x144   : > { %v791_v44 = vsel %vm598_vm6, %v788_v40, %v790_v4 }
 0x146   : > { %671 = vrot.lane.b32.xlu1 %v665_v45, %s3253_s8  ;;  %646 = vrot.lane.b32.xlu0 %v640_v46, %s3253_s8  ;;  %v766_v45 = vsel %vm598_vm6, %v763_v32, %v765_v61  ;;  %v787_v46 = vrot.slane %v781_v39, 1  ;;  %v969_v32 = vstv %s2854_s26  ;;  %s2861_s26 = sld [smem:[#allocation4 + $0x43]] }
 0x14a   : > { %721 = vrot.lane.b32.xlu1 %v715_v53, %s3254_s5  ;;  %696 = vrot.lane.b32.xlu0 %v690_v54, %s3254_s5  ;;  %v789_v53 = vsel %vm598_vm6, %v787_v46, %v788_v40  ;;  %v815_v54 = vrot.slane %v808_v49, 1  ;;  %v994_v49 = vstv %s2855_s0  ;;  %s2862_s0 = sld [smem:[#allocation4 + $0x13]] }
 0x14b   : > { %v997_v1 = vmul.f32 %v994_v49, %v3500_v58 }
 0x14c   : > { %v816_v63 = vsel %vm598_vm6, %v813_v42, %v815_v54  ;;  %v971_v42 = vmul.f32 %v969_v32, %v3484_v47 }
 0x14e   : > { %771 = vrot.lane.b32.xlu1 %v765_v61, %s3255_s30  ;;  %746 = vrot.lane.b32.xlu0 %v740_v62, %s3255_s30  ;;  %v838_v61 = vrot.slane %v832_v50, 1  ;;  %v840_v62 = vrot.slane %v833_v51, 1 }
 0x150   : > { %v841_v7 = vsel %vm598_vm6, %v838_v61, %v840_v62  ;;  %v839_v8 = vsel %vm598_vm6, %v837_v0, %v838_v61  ;;  %v995_v61 = vmul.f32 %v994_v49, %v3487_v48 }
 0x152   : > { %644 = vrot.lane.b32.xlu1 %v641_v5, %s3253_s8  ;;  %796 = vrot.lane.b32.xlu0 %v790_v4, %s3256_s25  ;;  %v858_v5 = vmul.f32 %v855_v56, %v3500_v58 }
 0x154   : > { %v865_v16 = vrot.slane %v858_v5, 1 }
 0x156   : > { %667 = vrot.lane.b32.xlu1 %v664_v11, %s3253_s8  ;;  %642 = vrot.lane.b32.xlu0 %v639_v12, %s3253_s8 }
 0x15a   : > { %694 = vrot.lane.b32.xlu1 %v691_v17, %s3254_s5  ;;  %669 = vrot.lane.b32.xlu0 %v666_v18, %s3253_s8  ;;  %v883_v17 = vmul.f32 %v880_v6, %v3500_v58  ;;  %v881_v18 = vmul.f32 %v880_v6, %v3487_v48 }
 0x15c   : > { %v887_v25 = vrot.slane %v881_v18, 1  ;;  %v1044_v18 = vstv %s2857_s21  ;;  %s2864_s21 = sld [smem:[#allocation4 + $0x14]] }
 0x15d   : > { %v1045_v31 = vmul.f32 %v1044_v18, %v3487_v48 }
 0x15e   : > { %717 = vrot.lane.b32.xlu1 %v714_v23, %s3254_s5  ;;  %692 = vrot.lane.b32.xlu0 %v689_v24, %s3254_s5  ;;  %v866_v23 = vsel %vm598_vm6, %v863_v10, %v865_v16  ;;  %v890_v24 = vrot.slane %v883_v17, 1  ;;  %v889_v34 = vsel %vm598_vm6, %v887_v25, %v888_v21  ;;  %v1020_v17 = vmul.f32 %v1019_v2, %v3487_v48 }
 0x160   : > { %v891_v33 = vsel %vm598_vm6, %v888_v21, %v890_v24  ;;  %v1026_v26 = vrot.slane %v1020_v17, 2 }
 0x162   : > { %744 = vrot.lane.b32.xlu1 %v741_v30, %s3255_s30  ;;  %719 = vrot.lane.b32.xlu0 %v716_v28, %s3254_s5  ;;  %v3685_v28 = vmul.f32 %v3681_v27, %v3500_v58 }
 0x166   : > { %767 = vrot.lane.b32.xlu1 %v764_v37, %s3255_s30  ;;  %742 = vrot.lane.b32.xlu0 %v739_v38, %s3255_s30  ;;  %v5041_v37 = vrot.slane %v3685_v28, 4  ;;  %v1744_v38 = vmul.f32 %v3681_v27, %v3497_v57 }
 0x168   : > { %v1751_v46 = vrot.slane %v1744_v38, 4 }
 0x16a   : > { %794 = vrot.lane.b32.xlu1 %v791_v44, %s3256_s25  ;;  %769 = vrot.lane.b32.xlu0 %v766_v45, %s3255_s30  ;;  %v972_v44 = vmul.f32 %v969_v32, %v3500_v58  ;;  %v970_v45 = vmul.f32 %v969_v32, %v3487_v48  ;;  %v3712_v50 = vsel %vm1559_vm7, %v5041_v37, %v1751_v46 }
 0x16b   : > { %5068 = vst [vmem:[#allocation17_spill] sm:$0xff] %v3712_v50  ;;  %v1046_v32 = vmul.f32 %v1044_v18, %v3484_v47 }
 0x16c   : > { %v979_v55 = vrot.slane %v972_v44, 2  ;;  %v976_v56 = vrot.slane %v970_v45, 2 }
 0x16e   : > { %817 = vrot.lane.b32.xlu1 %v814_v52, %s3256_s25  ;;  %792 = vrot.lane.b32.xlu0 %v789_v53, %s3256_s25  ;;  %v916_v53 = vsel %vm598_vm6, %v913_v36, %v915_v41  ;;  %v1069_v36 = vstv %s2858_s22  ;;  %s2865_s22 = sld [smem:[#allocation4 + $0x45]] }
 0x16f   : > { %v1071_v46 = vmul.f32 %v1069_v36, %v3484_v47 }
 0x170   : > { %v3644_v59 = vpop.permute.xlu1 %360  ;;  %v3646_v60 = vpop.permute.xlu0 %358 }
 0x172   : > { %821 = vrot.lane.b32.xlu1 %v815_v54, %s3256_s25  ;;  %819 = vrot.lane.b32.xlu0 %v816_v63, %s3256_s25  ;;  %v977_v54 = vrot.slane %v971_v42, 2  ;;  %v1052_v42 = vrot.slane %v1046_v32, 2 }
 0x174   : > { %v3653_v3 = vpop.permute.xlu1 %378  ;;  %v3655_v4 = vpop.permute.xlu0 %362  ;;  %v980_v5 = vsel %vm937_vm8, %v977_v54, %v979_v55  ;;  %v978_v6 = vsel %vm937_vm8, %v976_v56, %v977_v54  ;;  %v1070_v56 = vmul.f32 %v1069_v36, %v3487_v48 }
 0x176   : > { %844 = vrot.lane.b32.xlu1 %v841_v7, %s3257_s4  ;;  %842 = vrot.lane.b32.xlu0 %v839_v8, %s3257_s4  ;;  %v1001_v7 = vrot.slane %v995_v61, 2 }
 0x178   : > { %v3662_v11 = vpop.permute.xlu1 %382  ;;  %v3664_v12 = vpop.permute.xlu0 %380 }
 0x179   : > { %5066 = vst [vmem:[#allocation15_spill] sm:$0xff] %v3662_v11 }
 0x17a   : > { %867 = vrot.lane.b32.xlu1 %v864_v15, %s3257_s4  ;;  %846 = vrot.lane.b32.xlu0 %v840_v62, %s3257_s4  ;;  %v996_v62 = vmul.f32 %v994_v49, %v3484_v47  ;;  %v1094_v49 = vstv %s2859_s24  ;;  %s2868_s24 = sld [smem:[#allocation4 + $0x16]] }
 0x17b   : > { %v1096_v2 = vmul.f32 %v1094_v49, %v3484_v47 }
 0x17c   : > { %v3672_v19 = vpop.permute.xlu1 %400  ;;  %v3674_v20 = vpop.permute.xlu0 %398  ;;  %v1002_v8 = vrot.slane %v996_v62, 2 }
 0x17e   : > { %871 = vrot.lane.b32.xlu1 %v865_v16, %s3257_s4  ;;  %869 = vrot.lane.b32.xlu0 %v866_v23, %s3257_s4  ;;  %v1003_v15 = vsel %vm937_vm8, %v1001_v7, %v1002_v8  ;;  %v1004_v16 = vrot.slane %v997_v1, 2  ;;  %v1027_v23 = vrot.slane %v1021_v13, 2  ;;  %v1095_v1 = vmul.f32 %v1094_v49, %v3487_v48 }
 0x180   : > { %v3687_v29 = vpop.permute.xlu1 %418  ;;  %v3689_v30 = vpop.permute.xlu0 %402  ;;  %v1005_v25 = vsel %vm937_vm8, %v1002_v8, %v1004_v16  ;;  %v1028_v38 = vsel %vm937_vm8, %v1026_v26, %v1027_v23  ;;  %v1076_v8 = vrot.slane %v1070_v56, 2 }
 0x182   : > { %894 = vrot.lane.b32.xlu1 %v891_v33, %s3258_s3  ;;  %892 = vrot.lane.b32.xlu0 %v889_v34, %s3258_s3 }
 0x184   : > { %v3699_v39 = vpop.permute.xlu1 %422  ;;  %v3701_v40 = vpop.permute.xlu0 %420 }
 0x185   : > { %5067 = vst [vmem:[#allocation16_spill] sm:$0xff] %v3699_v39 }
 0x186   : > { %917 = vrot.lane.b32.xlu1 %v914_v43, %s3258_s3  ;;  %896 = vrot.lane.b32.xlu0 %v890_v24, %s3258_s3  ;;  %v1029_v24 = vrot.slane %v1022_v14, 2  ;;  %v1047_v43 = vmul.f32 %v1044_v18, %v3500_v58 }
 0x188   : > { %v3714_v51 = vpop.permute.xlu1 %440  ;;  %v3716_v52 = vpop.permute.xlu0 %438  ;;  %v1030_v35 = vsel %vm937_vm8, %v1027_v23, %v1029_v24  ;;  %v1054_v54 = vrot.slane %v1047_v43, 2  ;;  %v1102_v23 = vrot.slane %v1096_v2, 2 }
 0x18a   : > { %921 = vrot.lane.b32.xlu1 %v915_v41, %s3258_s3  ;;  %919 = vrot.lane.b32.xlu0 %v916_v53, %s3258_s3  ;;  %v1051_v41 = vrot.slane %v1045_v31, 2 }
 0x18c   : > { %v3723_v63 = vpop.permute.xlu1 %458  ;;  %v3725_v0 = vpop.permute.xlu0 %442  ;;  %v1053_v53 = vsel %vm937_vm8, %v1051_v41, %v1052_v42  ;;  %v1144_v41 = vstv %s2861_s26  ;;  %s334_s26 = sld [smem:[#allocation4]] }
 0x18d   : > { %v1146_v56 = vmul.f32 %v1144_v41, %v3484_v47 }
 0x18e   : > { %983 = vrot.lane.b32.xlu1 %v980_v5, %s3253_s8  ;;  %981 = vrot.lane.b32.xlu0 %v978_v6, %s3253_s8  ;;  %v1055_v5 = vsel %vm937_vm8, %v1052_v42, %v1054_v54  ;;  %v1077_v6 = vrot.slane %v1071_v46, 2 }
 0x190   : > { %v3732_v9 = vpop.permute.xlu1 %462  ;;  %v3734_v10 = vpop.permute.xlu0 %460  ;;  %v1078_v18 = vsel %vm937_vm8, %v1076_v8, %v1077_v6 }
 0x191   : > { %5069 = vst [vmem:[#allocation18_spill] sm:$0xff] %v3732_v9 }
 0x192   : > { %1006 = vrot.lane.b32.xlu1 %v1003_v15, %s3253_s8  ;;  %985 = vrot.lane.b32.xlu0 %v979_v55, %s3253_s8  ;;  %v1072_v55 = vmul.f32 %v1069_v36, %v3500_v58  ;;  %v1101_v15 = vrot.slane %v1095_v1, 2 }
 0x194   : > { %v3742_v21 = vpop.permute.xlu1 %480  ;;  %v3744_v22 = vpop.permute.xlu0 %478  ;;  %v1079_v7 = vrot.slane %v1072_v55, 2  ;;  %v1145_v55 = vmul.f32 %v1144_v41, %v3487_v48 }
 0x196   : > { %1010 = vrot.lane.b32.xlu1 %v1004_v16, %s3253_s8  ;;  %1008 = vrot.lane.b32.xlu0 %v1005_v25, %s3253_s8  ;;  %v1119_v16 = vstv %s2860_s6  ;;  %v1080_v17 = vsel %vm937_vm8, %v1077_v6, %v1079_v7  ;;  %v1169_v6 = vstv %s2862_s0  ;;  %v1151_v8 = vrot.slane %v1145_v55, 2  ;;  %s2869_s6 = sld [smem:[#allocation4 + $0x47]]  ;;  %s2825_s0 = sld [smem:[#allocation4 + $0x31]] }
 0x197   : > { %v1121_v31 = vmul.f32 %v1119_v16, %v3484_v47  ;;  %v1122_v32 = vmul.f32 %v1119_v16, %v3500_v58 }
 0x198   : > { %v3751_v33 = vpop.permute.xlu1 %498  ;;  %v3753_v34 = vpop.permute.xlu0 %482 }
 0x199   : > { %5070 = vst [vmem:[#allocation19_spill] sm:$0xff] %v3753_v34  ;;  %v1127_v46 = vrot.slane %v1121_v31, 2 }
 0x19a   : > { %1033 = vrot.lane.b32.xlu1 %v1030_v35, %s3254_s5  ;;  %1031 = vrot.lane.b32.xlu0 %v1028_v38, %s3254_s5  ;;  %v1103_v35 = vsel %vm937_vm8, %v1101_v15, %v1102_v23  ;;  %v1120_v38 = vmul.f32 %v1119_v16, %v3487_v48  ;;  %v1152_v15 = vrot.slane %v1146_v56, 2  ;;  %v1147_v16 = vmul.f32 %v1144_v41, %v3500_v58 }
 0x19c   : > { %v3760_v44 = vpop.permute.xlu1 %502  ;;  %v3762_v45 = vpop.permute.xlu0 %500  ;;  %v1153_v31 = vsel %vm937_vm8, %v1151_v8, %v1152_v15  ;;  %v1219_v8 = vstv %s2864_s21  ;;  %s2838_s21 = sld [smem:[#allocation4 + $0x7]] }
 0x19d   : > { %5071 = vst [vmem:[#allocation20_spill] sm:$0xff] %v3760_v44 }
 0x19e   : > { %1056 = vrot.lane.b32.xlu1 %v1053_v53, %s3254_s5  ;;  %1035 = vrot.lane.b32.xlu0 %v1029_v24, %s3254_s5  ;;  %v1097_v24 = vmul.f32 %v1094_v49, %v3500_v58  ;;  %v1129_v49 = vrot.slane %v1122_v32, 2  ;;  %v1154_v32 = vrot.slane %v1147_v16, 2 }
 0x1a0   : > { %v3770_v61 = vpop.permute.xlu1 %520  ;;  %v3772_v62 = vpop.permute.xlu0 %518  ;;  %v1104_v36 = vrot.slane %v1097_v24, 2  ;;  %v1194_v24 = vstv %s2863_s7  ;;  %s3885_s7 = sld [smem:[#allocation4 + $0x17]] }
 0x1a2   : > { %1060 = vrot.lane.b32.xlu1 %v1054_v54, %s3254_s5  ;;  %1058 = vrot.lane.b32.xlu0 %v1055_v5, %s3254_s5  ;;  %v1105_v53 = vsel %vm937_vm8, %v1102_v23, %v1104_v36  ;;  %v1126_v54 = vrot.slane %v1120_v38, 2  ;;  %v1130_v5 = vsel %vm937_vm8, %v1127_v46, %v1129_v49  ;;  %v1171_v23 = vmul.f32 %v1169_v6, %v3484_v47 }
 0x1a4   : > { %v3779_v13 = vpop.permute.xlu1 %538  ;;  %v3781_v14 = vpop.permute.xlu0 %522  ;;  %v1177_v55 = vrot.slane %v1171_v23, 2 }
 0x1a5   : > { %5072 = vst [vmem:[#allocation21_spill] sm:$0xff] %v3781_v14 }
 0x1a6   : > { %1083 = vrot.lane.b32.xlu1 %v1080_v17, %s3255_s30  ;;  %1081 = vrot.lane.b32.xlu0 %v1078_v18, %s3255_s30  ;;  %v1342_v44 = vstv %s3885_s7  ;;  %s3985_s7 = sld [smem:[#allocation4 + $0x3f]] }
 0x1a8   : > { %v3788_v25 = vpop.permute.xlu1 %542  ;;  %v3790_v26 = vpop.permute.xlu0 %540 }
 0x1a9   : > { %5073 = vst [vmem:[#allocation22_spill] sm:$0xff] %v3788_v25 }
 0x1aa   : > { %1106 = vrot.lane.b32.xlu1 %v1103_v35, %s3255_s30  ;;  %1085 = vrot.lane.b32.xlu0 %v1079_v7, %s3255_s30  ;;  %v1128_v7 = vsel %vm937_vm8, %v1126_v54, %v1127_v46  ;;  %v1172_v35 = vmul.f32 %v1169_v6, %v3500_v58  ;;  %v1195_v46 = vmul.f32 %v1194_v24, %v3487_v48 }
 0x1ab   : > { %v1155_v54 = vsel %vm937_vm8, %v1152_v15, %v1154_v32  ;;  %v1197_v15 = vmul.f32 %v1194_v24, %v3500_v58 }
 0x1ac   : > { %v3798_v42 = vpop.permute.xlu1 %560  ;;  %v3800_v43 = vpop.permute.xlu0 %558  ;;  %v1179_v56 = vrot.slane %v1172_v35, 2  ;;  %v1221_v35 = vmul.f32 %v1219_v8, %v3484_v47 }
 0x1ae   : > { %1110 = vrot.lane.b32.xlu1 %v1104_v36, %s3255_s30  ;;  %1108 = vrot.lane.b32.xlu0 %v1105_v53, %s3255_s30  ;;  %v1170_v36 = vmul.f32 %v1169_v6, %v3487_v48  ;;  %v1196_v53 = vmul.f32 %v1194_v24, %v3484_v47  ;;  %v1180_v16 = vsel %vm937_vm8, %v1177_v55, %v1179_v56 }
 0x1b0   : > { %v3807_v1 = vpop.permute.xlu1 %578  ;;  %v3809_v2 = vpop.permute.xlu0 %562  ;;  %v1202_v37 = vrot.slane %v1196_v53, 2  ;;  %v1220_v53 = vmul.f32 %v1219_v8, %v3487_v48 }
 0x1b1   : > { %5074 = vst [vmem:[#allocation23_spill] sm:$0xff] %v3809_v2 }
 0x1b2   : > { %1133 = vrot.lane.b32.xlu1 %v1130_v5, %s3256_s25  ;;  %1131 = vrot.lane.b32.xlu0 %v1128_v7, %s3256_s25  ;;  %v1176_v5 = vrot.slane %v1170_v36, 2  ;;  %v1201_v7 = vrot.slane %v1195_v46, 2  ;;  %v1244_v36 = vstv %s2865_s22  ;;  %s3895_s22 = sld [smem:[#allocation4 + $0x48]] }
 0x1b4   : > { %v3816_v17 = vpop.permute.xlu1 %582  ;;  %v3818_v18 = vpop.permute.xlu0 %580  ;;  %v1203_v46 = vsel %vm937_vm8, %v1201_v7, %v1202_v37 }
 0x1b5   : > { %5075 = vst [vmem:[#allocation24_spill] sm:$0xff] %v3816_v17 }
 0x1b6   : > { %1156 = vrot.lane.b32.xlu1 %v1153_v31, %s3256_s25  ;;  %1135 = vrot.lane.b32.xlu0 %v1129_v49, %s3256_s25  ;;  %v1178_v31 = vsel %vm937_vm8, %v1176_v5, %v1177_v55  ;;  %v1227_v5 = vrot.slane %v1221_v35, 2 }
 0x1b8   : > { %v3826_v38 = vpop.permute.xlu1 %671  ;;  %v3828_v41 = vpop.permute.xlu0 %646 }
 0x1b9   : > { %5076 = vst [vmem:[#allocation25_spill] sm:$0xff] %v3826_v38  ;;  %5077 = vst [vmem:[#allocation26_spill] sm:$0xff] %v3828_v41  ;;  %v1363_v41 = vstv %s3895_s22  ;;  %s4006_s22 = sld [smem:[#allocation4 + $0x4a]] }
 0x1ba   : > { %1160 = vrot.lane.b32.xlu1 %v1154_v32, %s3256_s25  ;;  %1158 = vrot.lane.b32.xlu0 %v1155_v54, %s3256_s25  ;;  %v1204_v54 = vrot.slane %v1197_v15, 2  ;;  %v1226_v15 = vrot.slane %v1220_v53, 2  ;;  %v1300_v53 = vstv %s2868_s24  ;;  %s2839_s24 = sld [smem:[#allocation4 + $0x38]] }
 0x1bc   : > { %v3835_v6 = vpop.permute.xlu1 %721  ;;  %v3837_v49 = vpop.permute.xlu0 %696  ;;  %v1228_v38 = vsel %vm937_vm8, %v1226_v15, %v1227_v5  ;;  %v1321_v15 = vstv %s2869_s6  ;;  %s3903_s6 = sld [smem:[#allocation4 + $0x18]] }
 0x1bd   : > { %5078 = vst [vmem:[#allocation27_spill] sm:$0xff] %v3835_v6  ;;  %5079 = vst [vmem:[#allocation28_spill] sm:$0xff] %v3837_v49  ;;  %v1222_v6 = vmul.f32 %v1219_v8, %v3500_v58 }
 0x1be   : > { %1183 = vrot.lane.b32.xlu1 %v1180_v16, %s3257_s4  ;;  %1181 = vrot.lane.b32.xlu0 %v1178_v31, %s3257_s4  ;;  %v1245_v16 = vmul.f32 %v1244_v36, %v3487_v48  ;;  %v1205_v31 = vsel %vm937_vm8, %v1202_v37, %v1204_v54 }
 0x1bf   : > { %v1229_v7 = vrot.slane %v1222_v6, 2 }
 0x1c0   : > { %v3844_v23 = vpop.permute.xlu1 %771  ;;  %v3846_v32 = vpop.permute.xlu0 %746  ;;  %v1251_v50 = vrot.slane %v1245_v16, 2 }
 0x1c1   : > { %5080 = vst [vmem:[#allocation29_spill] sm:$0xff] %v3844_v23  ;;  %5081 = vst [vmem:[#allocation30_spill] sm:$0xff] %v3846_v32  ;;  %v1246_v23 = vmul.f32 %v1244_v36, %v3484_v47  ;;  %v1230_v35 = vsel %vm937_vm8, %v1227_v5, %v1229_v7 }
 0x1c2   : > { %1206 = vrot.lane.b32.xlu1 %v1203_v46, %s3257_s4  ;;  %1185 = vrot.lane.b32.xlu0 %v1179_v56, %s3257_s4  ;;  %v1247_v46 = vmul.f32 %v1244_v36, %v3500_v58  ;;  %v1302_v36 = vmul.f32 %v1300_v53, %v3500_v58  ;;  %v1384_v14 = vstv %s3903_s6  ;;  %s4073_s6 = sld [smem:[#allocation4 + $0x4b]] }
 0x1c3   : > { %v1252_v37 = vrot.slane %v1246_v23, 2  ;;  %v1301_v23 = vmul.f32 %v1300_v53, %v3484_v47  ;;  %v1322_v53 = vmul.f32 %v1321_v15, %v3484_v47 }
 0x1c4   : > { %v3854_v24 = vpop.permute.xlu1 %644  ;;  %v3856_v55 = vpop.permute.xlu0 %796  ;;  %v1254_v17 = vrot.slane %v1247_v46, 2 }
 0x1c5   : > { %5082 = vst [vmem:[#allocation31_spill] sm:$0xff] %v3856_v55  ;;  %v1326_v25 = vrot.slane %v1322_v53, 3  ;;  %v591_v53 = vstv %s2838_s21  ;;  %v1343_v55 = vmul.f32 %v1342_v44, %v3484_v47  ;;  %s3987_s21 = sld [smem:[#allocation4 + $0x19]] }
 0x1c6   : > { %1210 = vrot.lane.b32.xlu1 %v1204_v54, %s3257_s4  ;;  %1208 = vrot.lane.b32.xlu0 %v1205_v31, %s3257_s4  ;;  %v1253_v31 = vsel %vm937_vm8, %v1251_v50, %v1252_v37  ;;  %v1255_v16 = vsel %vm937_vm8, %v1252_v37, %v1254_v17  ;;  %v1306_v50 = vrot.slane %v1302_v36, 3  ;;  %v3899_v36 = vstv %s334_s26  ;;  %s3942_s26 = sld [smem:[#allocation4 + $0x49]] }
 0x1c7   : > { %v336_v9 = vmul.f32 %v3899_v36, %v3487_v48 }
 0x1c8   : > { %v3863_v8 = vpop.permute.xlu1 %667  ;;  %v3865_v56 = vpop.permute.xlu0 %642 }
 0x1c9   : > { %v367_v11 = vadd.f32 %v3646_v60, %v336_v9  ;;  %v593_v60 = vmul.f32 %v591_v53, %v3484_v47  ;;  %v3934_v9 = vmul.f32 %v591_v53, %v3500_v58 }
 0x1ca   : > { %1233 = vrot.lane.b32.xlu1 %v1230_v35, %s3258_s3  ;;  %1231 = vrot.lane.b32.xlu0 %v1228_v38, %s3258_s3 }
 0x1cc   : > { %v3872_v6 = vpop.permute.xlu1 %694  ;;  %v3874_v54 = vpop.permute.xlu0 %669 }
 0x1ce   : > { %1256 = vrot.lane.b32.xlu1 %v1253_v31, %s3258_s3  ;;  %1235 = vrot.lane.b32.xlu0 %v1229_v7, %s3258_s3  ;;  %v1305_v7 = vrot.slane %v1301_v23, 3  ;;  %v1323_v31 = vmul.f32 %v1321_v15, %v3500_v58  ;;  %v337_v15 = vmul.f32 %v3899_v36, %v3484_v47 }
 0x1d0   : > { %v3881_v5 = vpop.permute.xlu1 %717  ;;  %v3883_v38 = vpop.permute.xlu0 %692  ;;  %v1307_v37 = vsel %vm1274_vm9, %v1305_v7, %v1306_v50  ;;  %v368_v39 = vadd.f32 %v3644_v59, %v337_v15 }
 0x1d2   : > { %1260 = vrot.lane.b32.xlu1 %v1254_v17, %s3258_s3  ;;  %1258 = vrot.lane.b32.xlu0 %v1255_v16, %s3258_s3  ;;  %v3905_v17 = vstv %s2825_s0  ;;  %v408_v2 = vadd.f32 %v3672_v19, %v368_v39  ;;  %s3944_s0 = sld [smem:[#allocation4 + $0xe]] }
 0x1d3   : > { %5083 = vst [vmem:[#allocation32_spill] sm:$0xff] %v3905_v17  ;;  %v344_v32 = vmul.f32 %v3905_v17, %v3487_v48  ;;  %v345_v39 = vmul.f32 %v3905_v17, %v3484_v47 }
 0x1d4   : > { %v3890_v46 = vpop.permute.xlu1 %744  ;;  %v3892_v35 = vpop.permute.xlu0 %719  ;;  %v448_v19 = vadd.f32 %v3714_v51, %v408_v2  ;;  %v1365_v51 = vmul.f32 %v1363_v41, %v3500_v58 }
 0x1d5   : > { %v387_v34 = vadd.f32 %v3653_v3, %v344_v32  ;;  %v1364_v3 = vmul.f32 %v1363_v41, %v3484_v47  ;;  %v388_v41 = vadd.f32 %v3664_v12, %v345_v39 }
 0x1d6   : > { %1310 = vrot.lane.b32.xlu1 %v1307_v37, %s3253_s8  ;;  %1308 = vrot.lane.b32.xlu0 %v1305_v7, %s3253_s8  ;;  %v1327_v37 = vrot.slane %v1323_v31, 3  ;;  %v1344_v7 = vmul.f32 %v1342_v44, %v3500_v58  ;;  %v611_v44 = vstv %s2839_s24  ;;  %v488_v2 = vadd.f32 %v3742_v21, %v448_v19  ;;  %s4053_s24 = sld [smem:[#allocation4 + $0x1a]] }
 0x1d7   : > { %v613_v17 = vmul.f32 %v611_v44, %v3484_v47  ;;  %v428_v12 = vadd.f32 %v3701_v40, %v388_v41 }
 0x1d8   : > { %v3907_v23 = vpop.permute.xlu1 %767  ;;  %v3909_v16 = vpop.permute.xlu0 %742  ;;  %v1328_v59 = vsel %vm1274_vm9, %v1326_v25, %v1327_v37  ;;  %v1348_v15 = vrot.slane %v1344_v7, 3  ;;  %v528_v21 = vadd.f32 %v3770_v61, %v488_v2 }
 0x1d9   : > { %v619_v39 = vrot.slane %v613_v17, 1  ;;  %v468_v40 = vadd.f32 %v3734_v10, %v428_v12  ;;  %v5084_v17 = vrot.slane %v3934_v9, 1 }
 0x1da   : > { %1329 = vrot.lane.b32.xlu1 %v1326_v25, %s3253_s8  ;;  %1312 = vrot.lane.b32.xlu0 %v1306_v50, %s3253_s8  ;;  %v407_v50 = vadd.f32 %v3674_v20, %v367_v11  ;;  %v1347_v20 = vrot.slane %v1343_v55, 3  ;;  %v592_v25 = vmul.f32 %v591_v53, %v3487_v48  ;;  %v612_v53 = vmul.f32 %v611_v44, %v3487_v48 }
 0x1db   : > { %v568_v61 = vadd.f32 %v3798_v42, %v528_v21  ;;  %v1405_v42 = vstv %s3942_s26  ;;  %s2878_s26 = sld [smem:[#allocation4 + $0x1b]] }
 0x1dc   : > { %v3924_v49 = vpop.permute.xlu1 %794  ;;  %v3926_v31 = vpop.permute.xlu0 %769  ;;  %v447_v11 = vadd.f32 %v3716_v52, %v407_v50  ;;  %v427_v52 = vadd.f32 %v3687_v29, %v387_v34  ;;  %v1349_v55 = vsel %vm1274_vm9, %v1347_v20, %v1348_v15  ;;  %v600_v50 = vrot.slane %v593_v60, 1 }
 0x1dd   : > { %v599_v34 = vrot.slane %v592_v25, 1  ;;  %v3980_v25 = vmul.f32 %v611_v44, %v3500_v58  ;;  %v1406_v21 = vmul.f32 %v1405_v42, %v3484_v47 }
 0x1de   : > { %1333 = vrot.lane.b32.xlu1 %v1327_v37, %s3253_s8  ;;  %1331 = vrot.lane.b32.xlu0 %v1328_v59, %s3253_s8  ;;  %v487_v32 = vadd.f32 %v3744_v22, %v447_v11  ;;  %v467_v29 = vadd.f32 %v3723_v63, %v427_v52  ;;  %v1368_v11 = vrot.slane %v1364_v3, 3  ;;  %v1369_v59 = vrot.slane %v1365_v51, 3 }
 0x1df   : > { %v1385_v3 = vmul.f32 %v1384_v14, %v3484_v47  ;;  %v603_v44 = vsel %vm598_vm6, %v600_v50, %v5084_v17  ;;  %v601_v51 = vsel %vm598_vm6, %v599_v34, %v600_v50 }
 0x1e0   : > { %v3949_v37 = vpop.permute.xlu1 %817  ;;  %v3951_v7 = vpop.permute.xlu0 %792  ;;  %v527_v22 = vadd.f32 %v3772_v62, %v487_v32  ;;  %v507_v63 = vadd.f32 %v3751_v33, %v467_v29  ;;  %v508_v32 = vadd.f32 %v3762_v45, %v468_v40  ;;  %v5044_v29 = vrot.slane %v3980_v25, 1 }
 0x1e1   : > { %v1389_v50 = vrot.slane %v1385_v3, 3  ;;  %v1410_v3 = vrot.slane %v1406_v21, 3  ;;  %v950_v40 = vstv %s3985_s7  ;;  %s2882_s7 = sld [smem:[#allocation4 + $0x1d]] }
 0x1e2   : > { %1352 = vrot.lane.b32.xlu1 %v1349_v55, %s3254_s5  ;;  %1350 = vrot.lane.b32.xlu0 %v1347_v20, %s3254_s5  ;;  %v3973_v55 = vmul.f32 %v1384_v14, %v3500_v58  ;;  %v567_v62 = vadd.f32 %v3800_v43, %v527_v22  ;;  %v618_v20 = vrot.slane %v612_v53, 1  ;;  %v547_v33 = vadd.f32 %v3779_v13, %v507_v63 }
 0x1e3   : > { %v930_v43 = vstv %s3944_s0  ;;  %v1370_v14 = vsel %vm1274_vm9, %v1368_v11, %v1369_v59  ;;  %v608_v53 = vadd.f32 %v603_v44, %v568_v61  ;;  %v548_v22 = vadd.f32 %v3790_v26, %v508_v32  ;;  %s2879_s0 = sld [smem:[#allocation4 + $0x4c]] }
 0x1e4   : > { %v3968_v60 = vpop.permute.xlu1 %821  ;;  %v3970_v19 = vpop.permute.xlu0 %819  ;;  %v1390_v2 = vrot.slane %v3973_v55, 3  ;;  %v607_v10 = vadd.f32 %v601_v51, %v567_v62  ;;  %v587_v13 = vadd.f32 %v3807_v1, %v547_v33  ;;  %v620_v41 = vsel %vm598_vm6, %v618_v20, %v619_v39 }
 0x1e5   : > { %v652_v45 = vadd.f32 %v3854_v24, %v608_v53  ;;  %v932_v1 = vmul.f32 %v930_v43, %v3484_v47  ;;  %v4016_v12 = vmul.f32 %v930_v43, %v3500_v58  ;;  %v931_v63 = vmul.f32 %v930_v43, %v3487_v48 }
 0x1e6   : > { %1371 = vrot.lane.b32.xlu1 %v1368_v11, %s3254_s5  ;;  %1354 = vrot.lane.b32.xlu0 %v1348_v15, %s3254_s5  ;;  %v651_v34 = vadd.f32 %v3865_v56, %v607_v10  ;;  %v1407_v26 = vmul.f32 %v1405_v42, %v3500_v58  ;;  %v626_v61 = vadd.f32 %v620_v41, %v587_v13  ;;  %v1426_v33 = vstv %s3987_s21  ;;  %s2883_s21 = sld [smem:[#allocation4 + $0x4e]] }
 0x1e7   : > { %v588_v24 = vadd.f32 %v3818_v18, %v548_v22  ;;  %v702_v56 = vadd.f32 %v3872_v6, %v652_v45  ;;  %v622_v20 = vsel %vm598_vm6, %v619_v39, %v5044_v29  ;;  %v939_v6 = vrot.slane %v932_v1, 2 }
 0x1e8   : > { %v845_v52 = vpop.permute.xlu1 %844  ;;  %v843_v15 = vpop.permute.xlu0 %842  ;;  %v701_v62 = vadd.f32 %v3883_v38, %v651_v34  ;;  %v676_v42 = vadd.f32 %v3863_v8, %v626_v61  ;;  %v5045_v39 = vrot.slane %v4016_v12, 2  ;;  %v938_v44 = vrot.slane %v931_v63, 2 }
 0x1e9   : > { %v752_v43 = vadd.f32 %v3890_v46, %v702_v56  ;;  %v1411_v51 = vrot.slane %v1407_v26, 3  ;;  %v627_v32 = vadd.f32 %v622_v20, %v588_v24  ;;  %v952_v10 = vmul.f32 %v950_v40, %v3484_v47 }
 0x1ea   : > { %1375 = vrot.lane.b32.xlu1 %v1369_v59, %s3254_s5  ;;  %1373 = vrot.lane.b32.xlu0 %v1370_v14, %s3254_s5  ;;  %v1391_v59 = vsel %vm1274_vm9, %v1389_v50, %v1390_v2  ;;  %v751_v18 = vadd.f32 %v3909_v16, %v701_v62  ;;  %v1428_v14 = vmul.f32 %v1426_v33, %v3500_v58  ;;  %v1447_v41 = vstv %s4006_s22  ;;  %s2884_s22 = sld [smem:[#allocation4 + $0x1e]] }
 0x1eb   : > { %v726_v53 = vadd.f32 %v3881_v5, %v676_v42  ;;  %v802_v8 = vadd.f32 %v3924_v49, %v752_v43  ;;  %v951_v16 = vmul.f32 %v950_v40, %v3487_v48  ;;  %v1427_v13 = vmul.f32 %v1426_v33, %v3484_v47 }
 0x1ec   : > { %v868_v11 = vpop.permute.xlu1 %867  ;;  %v4012_v55 = vpop.permute.xlu0 %846  ;;  %v801_v46 = vadd.f32 %v3951_v7, %v751_v18  ;;  %v942_v49 = vsel %vm937_vm8, %v939_v6, %v5045_v39  ;;  %v1412_v48 = vsel %vm1274_vm9, %v1410_v3, %v1411_v51  ;;  %v1432_v34 = vrot.slane %v1428_v14, 3 }
 0x1ed   : > { %v776_v21 = vadd.f32 %v3907_v23, %v726_v53  ;;  %v852_v5 = vadd.f32 %v845_v52, %v802_v8  ;;  %v1431_v63 = vrot.slane %v1427_v13, 3  ;;  %v4060_v26 = vmul.f32 %v950_v40, %v3500_v58 }
 0x1ee   : > { %1394 = vrot.lane.b32.xlu1 %v1391_v59, %s3255_s30  ;;  %1392 = vrot.lane.b32.xlu0 %v1389_v50, %s3255_s30  ;;  %v677_v50 = vadd.f32 %v3874_v54, %v627_v32  ;;  %v851_v22 = vadd.f32 %v843_v15, %v801_v46  ;;  %v957_v15 = vrot.slane %v951_v16, 2  ;;  %v958_v59 = vrot.slane %v952_v10, 2 }
 0x1ef   : > { %v826_v54 = vadd.f32 %v3949_v37, %v776_v21  ;;  %5085 = vst [vmem:[#allocation33_spill] sm:$0xff] %v4060_v26  ;;  %v1448_v20 = vmul.f32 %v1447_v41, %v3484_v47  ;;  %v1433_v42 = vsel %vm1274_vm9, %v1431_v63, %v1432_v34  ;;  %v1449_v40 = vmul.f32 %v1447_v41, %v3500_v58 }
 0x1f0   : > { %v4033_v38 = vpop.permute.xlu1 %871  ;;  %v870_v17 = vpop.permute.xlu0 %869  ;;  %v727_v1 = vadd.f32 %v3892_v35, %v677_v50  ;;  %v1489_v50 = vstv %s4073_s6  ;;  %s2886_s6 = sld [smem:[#allocation4 + $0x1f]] }
 0x1f1   : > { %v876_v24 = vadd.f32 %v868_v11, %v826_v54  ;;  %v5043_v11 = vrot.slane %v4060_v26, 2  ;;  %v1453_v32 = vrot.slane %v1449_v40, 3 }
 0x1f2   : > { %1413 = vrot.lane.b32.xlu1 %v1410_v3, %s3255_s30  ;;  %1396 = vrot.lane.b32.xlu0 %v1390_v2, %s3255_s30  ;;  %v940_v2 = vsel %vm937_vm8, %v938_v44, %v939_v6  ;;  %v777_v61 = vadd.f32 %v3926_v31, %v727_v1  ;;  %v959_v31 = vsel %vm937_vm8, %v957_v15, %v958_v59  ;;  %v1452_v44 = vrot.slane %v1448_v20, 3 }
 0x1f3   : > { %v961_v8 = vsel %vm937_vm8, %v958_v59, %v5043_v11  ;;  %v1510_v1 = vstv %s2878_s26  ;;  %s2887_s26 = sld [smem:[#allocation4 + $0x50]] }
 0x1f4   : > { %v895_v7 = vpop.permute.xlu1 %894  ;;  %v893_v45 = vpop.permute.xlu0 %892  ;;  %v827_v3 = vadd.f32 %v3970_v19, %v777_v61  ;;  %v1454_v13 = vsel %vm1274_vm9, %v1452_v44, %v1453_v32 }
 0x1f5   : > { %v902_v23 = vadd.f32 %v895_v7, %v852_v5  ;;  %v901_v52 = vadd.f32 %v893_v45, %v851_v22 }
 0x1f6   : > { %1417 = vrot.lane.b32.xlu1 %v1411_v51, %s3255_s30  ;;  %1415 = vrot.lane.b32.xlu0 %v1412_v48, %s3255_s30  ;;  %v877_v43 = vadd.f32 %v870_v17, %v827_v3  ;;  %v1468_v51 = vstv %s4053_s24  ;;  %s2885_s24 = sld [smem:[#allocation4 + $0x4f]] }
 0x1f7   : > { %v4063_v56 = vadd.f32 %v942_v49, %v902_v23  ;;  %v4065_v35 = vadd.f32 %v940_v2, %v901_v52  ;;  %v1470_v53 = vmul.f32 %v1468_v51, %v3500_v58  ;;  %v1469_v46 = vmul.f32 %v1468_v51, %v3484_v47 }
 0x1f8   : > { %v918_v37 = vpop.permute.xlu1 %917  ;;  %v4067_v62 = vpop.permute.xlu0 %896  ;;  %v1490_v49 = vmul.f32 %v1489_v50, %v3484_v47  ;;  %v1491_v2 = vmul.f32 %v1489_v50, %v3500_v58  ;;  %v1512_v23 = vmul.f32 %v1510_v1, %v3500_v58  ;;  %v1511_v52 = vmul.f32 %v1510_v1, %v3484_v47 }
 0x1f9   : > { %v926_v33 = vadd.f32 %v918_v37, %v876_v24  ;;  %v1474_v41 = vrot.slane %v1470_v53, 3  ;;  %v1473_v21 = vrot.slane %v1469_v46, 3  ;;  %v1531_v24 = vstv %s2879_s0  ;;  %s4192_s0 = sld [smem:[#allocation4 + $0x15]] }
 0x1fa   : > { %1436 = vrot.lane.b32.xlu1 %v1433_v42, %s3256_s25  ;;  %1434 = vrot.lane.b32.xlu0 %v1431_v63, %s3256_s25  ;;  %v1495_v54 = vrot.slane %v1491_v2, 3  ;;  %v1516_v61 = vrot.slane %v1512_v23, 3  ;;  %v1515_v37 = vrot.slane %v1511_v52, 3  ;;  %v1533_v40 = vmul.f32 %v1531_v24, %v3500_v58 }
 0x1fb   : > { %v4079_v18 = vadd.f32 %v959_v31, %v926_v33  ;;  %v1475_v7 = vsel %vm1274_vm9, %v1473_v21, %v1474_v41  ;;  %v1532_v33 = vmul.f32 %v1531_v24, %v3484_v47  ;;  %v1641_v24 = vstv %s2884_s22  ;;  %s4233_s22 = sld [smem:[#allocation4 + $0x52]] }
 0x1fc   : > { %v4081_v6 = vpop.permute.xlu1 %921  ;;  %v920_v19 = vpop.permute.xlu0 %919  ;;  %v1517_v42 = vsel %vm1274_vm9, %v1515_v37, %v1516_v61  ;;  %v1537_v51 = vrot.slane %v1533_v40, 3  ;;  %v1643_v40 = vmul.f32 %v1641_v24, %v3500_v58 }
 0x1fd   : > { %5086 = vst [vmem:[#allocation34_spill] sm:$0xff] %v4079_v18  ;;  %v927_v14 = vadd.f32 %v920_v19, %v877_v43  ;;  %v1536_v19 = vrot.slane %v1532_v33, 3 }
 0x1fe   : > { %1455 = vrot.lane.b32.xlu1 %v1452_v44, %s3256_s25  ;;  %1438 = vrot.lane.b32.xlu0 %v1432_v34, %s3256_s25  ;;  %v1494_v34 = vrot.slane %v1490_v49, 3  ;;  %v1591_v44 = vstv %s2882_s7  ;;  %s2889_s7 = sld [smem:[#allocation4 + $0x51]] }
 0x1ff   : > { %v4090_v17 = vadd.f32 %v961_v8, %v927_v14  ;;  %v1593_v14 = vmul.f32 %v1591_v44, %v3500_v58  ;;  %v1538_v46 = vsel %vm1274_vm9, %v1536_v19, %v1537_v51  ;;  %v1594_v50 = vmul.f32 %v1591_v44, %v3497_v57 }
 0x200   : > { %v4093_v16 = vpop.permute.xlu1 %983  ;;  %v4095_v10 = vpop.permute.xlu0 %981  ;;  %v1496_v63 = vsel %vm1274_vm9, %v1494_v34, %v1495_v54 }
 0x201   : > { %v1601_v1 = vrot.slane %v1594_v50, 4 }
 0x202   : > { %1459 = vrot.lane.b32.xlu1 %v1453_v32, %s3256_s25  ;;  %1457 = vrot.lane.b32.xlu0 %v1454_v13, %s3256_s25  ;;  %v1592_v32 = vmul.f32 %v1591_v44, %v3484_v47  ;;  %v1599_v13 = vrot.slane %v1593_v14, 4  ;;  %v1666_v14 = vstv %s2885_s24  ;;  %s2893_s24 = sld [smem:[#allocation4 + $0x53]] }
 0x204   : > { %v4101_v5 = vpop.permute.xlu1 %1006  ;;  %v4103_v22 = vpop.permute.xlu0 %985 }
 0x205   : > { %5087 = vst [vmem:[#allocation35_spill] sm:$0xff] %v4101_v5 }
 0x206   : > { %1478 = vrot.lane.b32.xlu1 %v1475_v7, %s3257_s4  ;;  %1476 = vrot.lane.b32.xlu0 %v1473_v21, %s3257_s4  ;;  %v1598_v21 = vrot.slane %v1592_v32, 4 }
 0x208   : > { %v4110_v45 = vpop.permute.xlu1 %1010  ;;  %v4112_v48 = vpop.permute.xlu0 %1008 }
 0x209   : > { %5088 = vst [vmem:[#allocation36_spill] sm:$0xff] %v4110_v45 }
 0x20a   : > { %1497 = vrot.lane.b32.xlu1 %v1494_v34, %s3257_s4  ;;  %1480 = vrot.lane.b32.xlu0 %v1474_v41, %s3257_s4  ;;  %v1616_v41 = vstv %s2883_s21  ;;  %v1600_v34 = vsel %vm1559_vm7, %v1598_v21, %v1599_v13  ;;  %s4215_s21 = sld [smem:[#allocation4 + $0x46]] }
 0x20b   : > { %v1617_v2 = vmul.f32 %v1616_v41, %v3484_v47  ;;  %v1619_v23 = vmul.f32 %v1616_v41, %v3497_v57 }
 0x20c   : > { %v4118_v15 = vpop.permute.xlu1 %1033  ;;  %v4120_v59 = vpop.permute.xlu0 %1031 }
 0x20e   : > { %1501 = vrot.lane.b32.xlu1 %v1495_v54, %s3257_s4  ;;  %1499 = vrot.lane.b32.xlu0 %v1496_v63, %s3257_s4  ;;  %v1618_v54 = vmul.f32 %v1616_v41, %v3500_v58  ;;  %v1644_v41 = vmul.f32 %v1641_v24, %v3497_v57 }
 0x210   : > { %v4125_v20 = vpop.permute.xlu1 %1056  ;;  %v4127_v3 = vpop.permute.xlu0 %1035  ;;  %v1624_v33 = vrot.slane %v1618_v54, 4  ;;  %v1651_v54 = vrot.slane %v1644_v41, 4 }
 0x211   : > { %5089 = vst [vmem:[#allocation37_spill] sm:$0xff] %v4125_v20 }
 0x212   : > { %1520 = vrot.lane.b32.xlu1 %v1517_v42, %s3258_s3  ;;  %1518 = vrot.lane.b32.xlu0 %v1515_v37, %s3258_s3  ;;  %v1602_v37 = vsel %vm1559_vm7, %v1599_v13, %v1601_v1  ;;  %v1626_v42 = vrot.slane %v1619_v23, 4  ;;  %v1649_v13 = vrot.slane %v1643_v40, 4  ;;  %v1668_v23 = vmul.f32 %v1666_v14, %v3500_v58 }
 0x214   : > { %v4134_v31 = vpop.permute.xlu1 %1060  ;;  %v4136_v43 = vpop.permute.xlu0 %1058  ;;  %v1627_v32 = vsel %vm1559_vm7, %v1624_v33, %v1626_v42  ;;  %v1691_v42 = vstv %s2886_s6  ;;  %v1652_v40 = vsel %vm1559_vm7, %v1649_v13, %v1651_v54  ;;  %s2897_s6 = sld [smem:[#allocation4 + $0x55]] }
 0x215   : > { %5090 = vst [vmem:[#allocation38_spill] sm:$0xff] %v4134_v31  ;;  %v1694_v54 = vmul.f32 %v1691_v42, %v3497_v57 }
 0x216   : > { %1539 = vrot.lane.b32.xlu1 %v1536_v19, %s3258_s3  ;;  %1522 = vrot.lane.b32.xlu0 %v1516_v61, %s3258_s3  ;;  %v1623_v61 = vrot.slane %v1617_v2, 4  ;;  %v1642_v19 = vmul.f32 %v1641_v24, %v3484_v47 }
 0x218   : > { %v4142_v53 = vpop.permute.xlu1 %1083  ;;  %v4144_v8 = vpop.permute.xlu0 %1081  ;;  %v1648_v50 = vrot.slane %v1642_v19, 4  ;;  %v1674_v19 = vrot.slane %v1668_v23, 4  ;;  %v991_v23 = vadd.f32 %v4093_v16, %v4063_v56 }
 0x21a   : > { %1543 = vrot.lane.b32.xlu1 %v1537_v51, %s3258_s3  ;;  %1541 = vrot.lane.b32.xlu0 %v1538_v46, %s3258_s3  ;;  %v1625_v46 = vsel %vm1559_vm7, %v1623_v61, %v1624_v33  ;;  %v1650_v1 = vsel %vm1559_vm7, %v1648_v50, %v1649_v13 }
 0x21c   : > { %v4150_v49 = vpop.permute.xlu1 %1106  ;;  %v4152_v7 = vpop.permute.xlu0 %1085 }
 0x21d   : > { %5091 = vst [vmem:[#allocation39_spill] sm:$0xff] %v4150_v49 }
 0x21e   : > { %1605 = vrot.lane.b32.xlu1 %v1600_v34, %s3253_s8  ;;  %1603 = vrot.lane.b32.xlu0 %v1598_v21, %s3253_s8  ;;  %v1667_v34 = vmul.f32 %v1666_v14, %v3484_v47 }
 0x220   : > { %v4160_v52 = vpop.permute.xlu1 %1110  ;;  %v4162_v63 = vpop.permute.xlu0 %1108  ;;  %v1673_v33 = vrot.slane %v1667_v34, 4  ;;  %v1716_v34 = vstv %s2887_s26  ;;  %s2899_s26 = sld [smem:[#allocation4 + $0x56]] }
 0x221   : > { %5092 = vst [vmem:[#allocation40_spill] sm:$0xff] %v4160_v52  ;;  %v1719_v56 = vmul.f32 %v1716_v34, %v3497_v57 }
 0x222   : > { %1628 = vrot.lane.b32.xlu1 %v1623_v61, %s3253_s8  ;;  %1607 = vrot.lane.b32.xlu0 %v1602_v37, %s3253_s8  ;;  %v1669_v61 = vmul.f32 %v1666_v14, %v3497_v57  ;;  %v1692_v14 = vmul.f32 %v1691_v42, %v3484_v47  ;;  %v1675_v11 = vsel %vm1559_vm7, %v1673_v33, %v1674_v19 }
 0x224   : > { %v4169_v44 = vpop.permute.xlu1 %1133  ;;  %v4171_v51 = vpop.permute.xlu0 %1131 }
 0x226   : > { %1632 = vrot.lane.b32.xlu1 %v1627_v32, %s3253_s8  ;;  %1630 = vrot.lane.b32.xlu0 %v1625_v46, %s3253_s8  ;;  %v1676_v32 = vrot.slane %v1669_v61, 4  ;;  %v1693_v46 = vmul.f32 %v1691_v42, %v3500_v58  ;;  %v1698_v61 = vrot.slane %v1692_v14, 4  ;;  %v1041_v42 = vadd.f32 %v4118_v15, %v991_v23 }
 0x228   : > { %v4178_v21 = vpop.permute.xlu1 %1156  ;;  %v4180_v2 = vpop.permute.xlu0 %1135  ;;  %v1699_v13 = vrot.slane %v1693_v46, 4  ;;  %v1701_v46 = vrot.slane %v1694_v54, 4  ;;  %v1091_v14 = vadd.f32 %v4142_v53, %v1041_v42 }
 0x229   : > { %5093 = vst [vmem:[#allocation41_spill] sm:$0xff] %v4178_v21 }
 0x22a   : > { %1655 = vrot.lane.b32.xlu1 %v1650_v1, %s3254_s5  ;;  %1653 = vrot.lane.b32.xlu0 %v1648_v50, %s3254_s5  ;;  %v1677_v1 = vsel %vm1559_vm7, %v1674_v19, %v1676_v32  ;;  %v1717_v32 = vmul.f32 %v1716_v34, %v3484_v47  ;;  %v1269_v19 = vstv %s4192_s0  ;;  %v1141_v54 = vadd.f32 %v4169_v44, %v1091_v14  ;;  %s2901_s0 = sld [smem:[#allocation4 + $0x57]] }
 0x22b   : > { %v4223_v16 = vmul.f32 %v1269_v19, %v3500_v58  ;;  %v4229_v15 = vmul.f32 %v1269_v19, %v3484_v47  ;;  %v1742_v44 = vmul.f32 %v3681_v27, %v3484_v47  ;;  %v1766_v19 = vstv %s2889_s7  ;;  %s2903_s7 = sld [smem:[#allocation4 + $0x58]] }
 0x22c   : > { %v4188_v24 = vpop.permute.xlu1 %1160  ;;  %v4190_v37 = vpop.permute.xlu0 %1158  ;;  %v1767_v27 = vmul.f32 %v1766_v19, %v3484_v47 }
 0x22d   : > { %5094 = vst [vmem:[#allocation42_spill] sm:$0xff] %v4188_v24 }
 0x22e   : > { %1678 = vrot.lane.b32.xlu1 %v1673_v33, %s3254_s5  ;;  %1657 = vrot.lane.b32.xlu0 %v1652_v40, %s3254_s5  ;;  %v1718_v33 = vmul.f32 %v1716_v34, %v3500_v58  ;;  %v1702_v34 = vsel %vm1559_vm7, %v1699_v13, %v1701_v46  ;;  %v5046_v46 = vrot.slane %v4229_v15, 3 }
 0x230   : > { %v1184_v41 = vpop.permute.xlu1 %1183  ;;  %v4199_v50 = vpop.permute.xlu0 %1181  ;;  %v1724_v23 = vrot.slane %v1718_v33, 4  ;;  %v1768_v33 = vmul.f32 %v1766_v19, %v3500_v58 }
 0x232   : > { %1682 = vrot.lane.b32.xlu1 %v1677_v1, %s3254_s5  ;;  %1680 = vrot.lane.b32.xlu0 %v1675_v11, %s3254_s5  ;;  %v1700_v11 = vsel %vm1559_vm7, %v1698_v61, %v1699_v13 }
 0x234   : > { %v4208_v40 = vpop.permute.xlu1 %1206  ;;  %v4210_v29 = vpop.permute.xlu0 %1185 }
 0x235   : > { %5095 = vst [vmem:[#allocation43_spill] sm:$0xff] %v4208_v40  ;;  %v1723_v40 = vrot.slane %v1717_v32, 4  ;;  %v1191_v32 = vadd.f32 %v1184_v41, %v1141_v54 }
 0x236   : > { %1705 = vrot.lane.b32.xlu1 %v1700_v11, %s3255_s30  ;;  %1703 = vrot.lane.b32.xlu0 %v1698_v61, %s3255_s30  ;;  %v1726_v11 = vrot.slane %v1719_v56, 4  ;;  %v1016_v61 = vadd.f32 %v4112_v48, %v4090_v17  ;;  %v1285_v56 = vstv %s4215_s21  ;;  %v5097_v48 = vrot.slane %v4223_v16, 3  ;;  %s2905_s21 = sld [smem:[#allocation4 + $0x59]] }
 0x237   : > { %v1725_v17 = vsel %vm1559_vm7, %v1723_v40, %v1724_v23 }
 0x238   : > { %v4226_v1 = vpop.permute.xlu1 %1210  ;;  %v1209_v39 = vpop.permute.xlu0 %1208  ;;  %v1066_v14 = vadd.f32 %v4136_v43, %v1016_v61  ;;  %v1727_v53 = vsel %vm1559_vm7, %v1724_v23, %v1726_v11  ;;  %v1277_v41 = vsel %vm1274_vm9, %v5046_v46, %v5097_v48  ;;  %v4259_v43 = vmul.f32 %v1285_v56, %v3500_v58 }
 0x239   : > { %5096 = vst [vmem:[#allocation44_spill] sm:$0xff] %v4226_v1  ;;  %v1748_v11 = vrot.slane %v1742_v44, 4  ;;  %v1774_v61 = vrot.slane %v1768_v33, 4  ;;  %v1816_v46 = vstv %s4233_s22  ;;  %v1773_v44 = vrot.slane %v1767_v27, 4  ;;  %s2907_s22 = sld [smem:[#allocation4 + $0x5a]] }
 0x23a   : > { %1728 = vrot.lane.b32.xlu1 %v1723_v40, %s3255_s30  ;;  %1707 = vrot.lane.b32.xlu0 %v1702_v34, %s3255_s30  ;;  %5098 = vst [vmem:[#allocation45_spill] sm:$0xff] %v4259_v43  ;;  %v1116_v54 = vadd.f32 %v4162_v63, %v1066_v14  ;;  %v1769_v63 = vmul.f32 %v1766_v19, %v3497_v57  ;;  %v5048_v33 = vrot.slane %v4259_v43, 3 }
 0x23c   : > { %v1234_v42 = vpop.permute.xlu1 %1233  ;;  %v4242_v13 = vpop.permute.xlu0 %1231  ;;  %v1776_v19 = vrot.slane %v1769_v63, 4  ;;  %v2155_v18 = vstv %s2905_s21  ;;  %s4431_s21 = sld [smem:[#allocation4 + $0x4d]] }
 0x23d   : > { %v1241_v34 = vadd.f32 %v1234_v42, %v1191_v32  ;;  %v4269_v32 = vmul.f32 %v1285_v56, %v3484_v47  ;;  %v1166_v42 = vadd.f32 %v4190_v37, %v1116_v54  ;;  %v1775_v37 = vsel %vm1559_vm7, %v1773_v44, %v1774_v61 }
 0x23e   : > { %1732 = vrot.lane.b32.xlu1 %v1727_v53, %s3255_s30  ;;  %1730 = vrot.lane.b32.xlu0 %v1725_v17, %s3255_s30  ;;  %v5101_v17 = vrot.slane %v3685_v28, 4  ;;  %v1817_v28 = vmul.f32 %v1816_v46, %v3484_v47  ;;  %v2156_v1 = vmul.f32 %v2155_v18, %v3484_v47 }
 0x23f   : > { %v4262_v40 = vadd.f32 %v1277_v41, %v1241_v34  ;;  %5100 = vst [vmem:[#allocation47_spill] sm:$0xff] %v4269_v32  ;;  %v1216_v14 = vadd.f32 %v1209_v39, %v1166_v42  ;;  %v5047_v41 = vrot.slane %v4269_v32, 3  ;;  %v2205_v24 = vstv %s2907_s22  ;;  %s4460_s22 = sld [smem:[#allocation4 + $0x60]] }
 0x240   : > { %v4264_v23 = vpop.permute.xlu1 %1256  ;;  %v4266_v53 = vpop.permute.xlu0 %1235  ;;  %v1750_v48 = vsel %vm1559_vm7, %v1748_v11, %v5101_v17  ;;  %v1818_v17 = vmul.f32 %v1816_v46, %v3500_v58  ;;  %v1823_v63 = vrot.slane %v1817_v28, 4 }
 0x241   : > { %5099 = vst [vmem:[#allocation46_spill] sm:$0xff] %v4264_v23  ;;  %v1292_v39 = vsel %vm1274_vm9, %v5047_v41, %v5048_v33  ;;  %v1955_v33 = vstv %s2897_s6  ;;  %s2913_s6 = sld [smem:[#allocation4 + $0x5d]] }
 0x242   : > { %1755 = vrot.lane.b32.xlu1 %v1750_v48, %s3256_s25  ;;  %1753 = vrot.lane.b32.xlu0 %v1748_v11, %s3256_s25  ;;  %v1819_v11 = vmul.f32 %v1816_v46, %v3497_v57  ;;  %v1777_v46 = vsel %vm1559_vm7, %v1774_v61, %v1776_v19 }
 0x244   : > { %v4280_v56 = vpop.permute.xlu1 %1260  ;;  %v1259_v34 = vpop.permute.xlu0 %1258 }
 0x245   : > { %5102 = vst [vmem:[#allocation48_spill] sm:$0xff] %v4280_v56  ;;  %v1266_v54 = vadd.f32 %v1259_v34, %v1216_v14  ;;  %v1866_v14 = vstv %s2893_s24  ;;  %v1824_v34 = vrot.slane %v1818_v17, 4  ;;  %s2911_s24 = sld [smem:[#allocation4 + $0x5c]] }
 0x246   : > { %1780 = vrot.lane.b32.xlu1 %v1775_v37, %s3256_s25  ;;  %1778 = vrot.lane.b32.xlu0 %v1773_v44, %s3256_s25  ;;  %v1826_v37 = vrot.slane %v1819_v11, 4  ;;  %v1868_v44 = vmul.f32 %v1866_v14, %v3500_v58  ;;  %v1867_v41 = vmul.f32 %v1866_v14, %v3484_v47  ;;  %v1869_v17 = vmul.f32 %v1866_v14, %v3497_v57 }
 0x247   : > { %v4294_v27 = vadd.f32 %v1292_v39, %v1266_v54  ;;  %v1825_v61 = vsel %vm1559_vm7, %v1823_v63, %v1824_v34 }
 0x248   : > { %v4296_v42 = vpop.permute.xlu1 %1310  ;;  %v4298_v48 = vpop.permute.xlu0 %1308  ;;  %v1827_v28 = vsel %vm1559_vm7, %v1824_v34, %v1826_v37  ;;  %v1874_v19 = vrot.slane %v1868_v44, 4  ;;  %v1873_v11 = vrot.slane %v1867_v41, 4  ;;  %v1876_v37 = vrot.slane %v1869_v17, 4 }
 0x249   : > { %v1958_v34 = vmul.f32 %v1955_v33, %v3497_v57 }
 0x24a   : > { %1828 = vrot.lane.b32.xlu1 %v1823_v63, %s3257_s4  ;;  %1782 = vrot.lane.b32.xlu0 %v1777_v46, %s3256_s25  ;;  %v1875_v23 = vsel %vm1559_vm7, %v1873_v11, %v1874_v19  ;;  %v1957_v63 = vmul.f32 %v1955_v33, %v3500_v58 }
 0x24b   : > { %v1965_v49 = vrot.slane %v1958_v34, 5 }
 0x24c   : > { %v4305_v54 = vpop.permute.xlu1 %1329  ;;  %v4307_v39 = vpop.permute.xlu0 %1312  ;;  %v1963_v21 = vrot.slane %v1957_v63, 5 }
 0x24d   : > { %5103 = vst [vmem:[#allocation49_spill] sm:$0xff] %v4305_v54  ;;  %v1956_v54 = vmul.f32 %v1955_v33, %v3484_v47 }
 0x24e   : > { %1832 = vrot.lane.b32.xlu1 %v1827_v28, %s3257_s4  ;;  %1830 = vrot.lane.b32.xlu0 %v1825_v61, %s3257_s4  ;;  %v2005_v28 = vstv %s2899_s26  ;;  %v1877_v61 = vsel %vm1559_vm7, %v1874_v19, %v1876_v37  ;;  %s2915_s26 = sld [smem:[#allocation4 + $0x5e]] }
 0x24f   : > { %v1962_v44 = vrot.slane %v1956_v54, 5  ;;  %v2007_v17 = vmul.f32 %v2005_v28, %v3500_v58  ;;  %v1966_v54 = vsel %vm1898_vm10, %v1963_v21, %v1965_v49  ;;  %v2008_v63 = vmul.f32 %v2005_v28, %v3497_v57 }
 0x250   : > { %v4314_v46 = vpop.permute.xlu1 %1333  ;;  %v4316_v32 = vpop.permute.xlu0 %1331 }
 0x251   : > { %5104 = vst [vmem:[#allocation50_spill] sm:$0xff] %v4314_v46  ;;  %v2055_v46 = vstv %s2901_s0  ;;  %v1964_v19 = vsel %vm1898_vm10, %v1962_v44, %v1963_v21  ;;  %v2013_v37 = vrot.slane %v2007_v17, 5  ;;  %v2015_v49 = vrot.slane %v2008_v63, 5  ;;  %s2880_s0 = sld [smem:[#allocation4 + $0x1c]] }
 0x252   : > { %1880 = vrot.lane.b32.xlu1 %v1875_v23, %s3258_s3  ;;  %1878 = vrot.lane.b32.xlu0 %v1873_v11, %s3258_s3  ;;  %v2006_v23 = vmul.f32 %v2005_v28, %v3484_v47  ;;  %v2057_v21 = vmul.f32 %v2055_v46, %v3500_v58 }
 0x254   : > { %v4324_v14 = vpop.permute.xlu1 %1352  ;;  %v4326_v41 = vpop.permute.xlu0 %1350  ;;  %v2012_v34 = vrot.slane %v2006_v23, 5 }
 0x256   : > { %1967 = vrot.lane.b32.xlu1 %v1962_v44, %s3253_s8  ;;  %1882 = vrot.lane.b32.xlu0 %v1877_v61, %s3258_s3  ;;  %v2014_v43 = vsel %vm1898_vm10, %v2012_v34, %v2013_v37  ;;  %v2058_v44 = vmul.f32 %v2055_v46, %v3497_v57 }
 0x258   : > { %v4333_v33 = vpop.permute.xlu1 %1371  ;;  %v4335_v11 = vpop.permute.xlu0 %1354  ;;  %v2065_v5 = vrot.slane %v2058_v44, 5  ;;  %v338_v44 = vmul.f32 %v3899_v36, %v3500_v58 }
 0x259   : > { %5105 = vst [vmem:[#allocation51_spill] sm:$0xff] %v4333_v33  ;;  %v2056_v33 = vmul.f32 %v2055_v46, %v3484_v47 }
 0x25a   : > { %1971 = vrot.lane.b32.xlu1 %v1966_v54, %s3253_s8  ;;  %1969 = vrot.lane.b32.xlu0 %v1964_v19, %s3253_s8  ;;  %v2105_v54 = vstv %s2903_s7  ;;  %v2016_v19 = vsel %vm1898_vm10, %v2013_v37, %v2015_v49  ;;  %s4425_s7 = sld [smem:[#allocation4 + $0x5f]] }
 0x25b   : > { %v2062_v23 = vrot.slane %v2056_v33, 5  ;;  %v2107_v63 = vmul.f32 %v2105_v54, %v3500_v58 }
 0x25c   : > { %v4342_v61 = vpop.permute.xlu1 %1375  ;;  %v4344_v20 = vpop.permute.xlu0 %1373 }
 0x25d   : > { %5106 = vst [vmem:[#allocation52_spill] sm:$0xff] %v4342_v61  ;;  %v2063_v61 = vrot.slane %v2057_v21, 5  ;;  %v2113_v49 = vrot.slane %v2107_v63, 5  ;;  %v2108_v21 = vmul.f32 %v2105_v54, %v3497_v57  ;;  %v2158_v63 = vmul.f32 %v2155_v18, %v3497_v57 }
 0x25e   : > { %2019 = vrot.lane.b32.xlu1 %v2014_v43, %s3254_s5  ;;  %2017 = vrot.lane.b32.xlu0 %v2012_v34, %s3254_s5  ;;  %v2106_v43 = vmul.f32 %v2105_v54, %v3484_v47 }
 0x25f   : > { %v2066_v33 = vsel %vm1898_vm10, %v2063_v61, %v2065_v5  ;;  %v2064_v37 = vsel %vm1898_vm10, %v2062_v23, %v2063_v61  ;;  %v2157_v5 = vmul.f32 %v2155_v18, %v3500_v58  ;;  %v369_v61 = vadd.f32 %v3655_v4, %v338_v44 }
 0x260   : > { %v4352_v28 = vpop.permute.xlu1 %1394  ;;  %v4354_v17 = vpop.permute.xlu0 %1392  ;;  %v2115_v54 = vrot.slane %v2108_v21, 5  ;;  %v2165_v21 = vrot.slane %v2158_v63, 5  ;;  %v2207_v18 = vmul.f32 %v2205_v24, %v3500_v58 }
 0x261   : > { %v409_v36 = vadd.f32 %v3689_v30, %v369_v61  ;;  %v2206_v61 = vmul.f32 %v2205_v24, %v3484_v47 }
 0x262   : > { %2067 = vrot.lane.b32.xlu1 %v2062_v23, %s3255_s30  ;;  %2021 = vrot.lane.b32.xlu0 %v2016_v19, %s3254_s5  ;;  %v2112_v19 = vrot.slane %v2106_v43, 5  ;;  %v2116_v44 = vsel %vm1898_vm10, %v2113_v49, %v2115_v54  ;;  %v2213_v52 = vrot.slane %v2207_v18, 5  ;;  %v5114_v18 = vrot.slane %v3934_v9, 1  ;;  %v5116_v9 = vld [vmem:[#allocation28_spill] sm:$0xff] }
 0x263   : > { %v449_v4 = vadd.f32 %v3725_v0, %v409_v36  ;;  %v2208_v0 = vmul.f32 %v2205_v24, %v3497_v57 }
 0x264   : > { %v4361_v46 = vpop.permute.xlu1 %1413  ;;  %v4363_v34 = vpop.permute.xlu0 %1396  ;;  %v2114_v23 = vsel %vm1898_vm10, %v2112_v19, %v2113_v49  ;;  %v5111_v49 = vld [vmem:[#allocation21_spill] sm:$0xff] }
 0x265   : > { %5107 = vst [vmem:[#allocation53_spill] sm:$0xff] %v4361_v46 }
 0x266   : > { %2071 = vrot.lane.b32.xlu1 %v2066_v33, %s3255_s30  ;;  %2069 = vrot.lane.b32.xlu0 %v2064_v37, %s3255_s30  ;;  %v2162_v37 = vrot.slane %v2156_v1, 5 }
 0x268   : > { %v4372_v46 = vpop.permute.xlu1 %1417  ;;  %v4374_v56 = vpop.permute.xlu0 %1415 }
 0x269   : > { %5108 = vst [vmem:[#allocation54_spill] sm:$0xff] %v4372_v46  ;;  %v2163_v46 = vrot.slane %v2157_v5, 5  ;;  %v2294_v5 = vstv %s2911_s24  ;;  %s4493_s24 = sld [smem:[#allocation4 + $0x61]] }
 0x26a   : > { %2119 = vrot.lane.b32.xlu1 %v2114_v23, %s3256_s25  ;;  %2117 = vrot.lane.b32.xlu0 %v2112_v19, %s3256_s25  ;;  %v5109_v19 = vld [vmem:[#allocation19_spill] sm:$0xff]  ;;  %v2295_v24 = vmul.f32 %v2294_v5, %v3484_v47 }
 0x26b   : > { %v489_v30 = vadd.f32 %v5109_v19, %v449_v4  ;;  %v2166_v63 = vsel %vm1898_vm10, %v2163_v46, %v2165_v21  ;;  %v2164_v36 = vsel %vm1898_vm10, %v2162_v37, %v2163_v46  ;;  %v5112_v4 = vld [vmem:[#allocation23_spill] sm:$0xff]  ;;  %v2212_v19 = vrot.slane %v2206_v61, 5 }
 0x26c   : > { %v4384_v43 = vpop.permute.xlu1 %1436  ;;  %v4386_v33 = vpop.permute.xlu0 %1434  ;;  %v2297_v21 = vmul.f32 %v2294_v5, %v3497_v57 }
 0x26d   : > { %v529_v54 = vadd.f32 %v5111_v49, %v489_v30  ;;  %v2296_v30 = vmul.f32 %v2294_v5, %v3500_v58  ;;  %v2214_v46 = vsel %vm1898_vm10, %v2212_v19, %v2213_v52 }
 0x26e   : > { %2167 = vrot.lane.b32.xlu1 %v2162_v37, %s3257_s4  ;;  %2121 = vrot.lane.b32.xlu0 %v2116_v44, %s3256_s25  ;;  %v2215_v37 = vrot.slane %v2208_v0, 5  ;;  %v2304_v26 = vrot.slane %v2297_v21, 6  ;;  %v4439_v21 = vstv %s2880_s0  ;;  %s4589_s0 = sld [smem:[#allocation4 + $0x24]] }
 0x26f   : > { %v569_v44 = vadd.f32 %v5112_v4, %v529_v54  ;;  %v2344_v4 = vstv %s2913_s6  ;;  %s4543_s6 = sld [smem:[#allocation4 + $0x21]] }
 0x270   : > { %v4395_v23 = vpop.permute.xlu1 %1455  ;;  %v4397_v1 = vpop.permute.xlu0 %1438  ;;  %v2216_v0 = vsel %vm1898_vm10, %v2213_v52, %v2215_v37  ;;  %v2346_v5 = vmul.f32 %v2344_v4, %v3500_v58  ;;  %v2347_v37 = vmul.f32 %v2344_v4, %v3497_v57 }
 0x271   : > { %5110 = vst [vmem:[#allocation19_spill] sm:$0xff] %v4395_v23  ;;  %v609_v61 = vadd.f32 %v5114_v18, %v569_v44  ;;  %v5118_v18 = vld [vmem:[#allocation30_spill] sm:$0xff] }
 0x272   : > { %2171 = vrot.lane.b32.xlu1 %v2166_v63, %s3257_s4  ;;  %2169 = vrot.lane.b32.xlu0 %v2164_v36, %s3257_s4  ;;  %v2301_v63 = vrot.slane %v2295_v24, 6  ;;  %v2302_v36 = vrot.slane %v2296_v30, 6  ;;  %v2345_v24 = vmul.f32 %v2344_v4, %v3484_v47 }
 0x274   : > { %v4406_v23 = vpop.permute.xlu1 %1459  ;;  %v4408_v31 = vpop.permute.xlu0 %1457  ;;  %v2303_v30 = vsel %vm2237_vm11, %v2301_v63, %v2302_v36 }
 0x275   : > { %5113 = vst [vmem:[#allocation21_spill] sm:$0xff] %v4406_v23  ;;  %v5115_v23 = vld [vmem:[#allocation26_spill] sm:$0xff] }
 0x276   : > { %2219 = vrot.lane.b32.xlu1 %v2214_v46, %s3258_s3  ;;  %2217 = vrot.lane.b32.xlu0 %v2212_v19, %s3258_s3  ;;  %v653_v45 = vadd.f32 %v5115_v23, %v609_v61  ;;  %v1318_v19 = vadd.f32 %v4296_v42, %v4262_v40  ;;  %v2394_v46 = vstv %s2915_s26  ;;  %v2305_v40 = vsel %vm2237_vm11, %v2302_v36, %v2304_v26  ;;  %s2892_s26 = sld [smem:[#allocation4 + $0x22]] }
 0x277   : > { %v2352_v42 = vrot.slane %v2346_v5, 6  ;;  %v2395_v26 = vmul.f32 %v2394_v46, %v3484_v47  ;;  %v2354_v36 = vrot.slane %v2347_v37, 6  ;;  %v2396_v5 = vmul.f32 %v2394_v46, %v3500_v58 }
 0x278   : > { %v1479_v49 = vpop.permute.xlu1 %1478  ;;  %v4418_v54 = vpop.permute.xlu0 %1476  ;;  %v703_v44 = vadd.f32 %v5116_v9, %v653_v45  ;;  %v1360_v61 = vadd.f32 %v4324_v14, %v1318_v19  ;;  %v4458_v19 = vmul.f32 %v4439_v21, %v3484_v47  ;;  %v2444_v37 = vstv %s4425_s7  ;;  %s4605_s7 = sld [smem:[#allocation4 + $0x25]] }
 0x27a   : > { %2306 = vrot.lane.b32.xlu1 %v2301_v63, %s3253_s8  ;;  %2221 = vrot.lane.b32.xlu0 %v2216_v0, %s3258_s3  ;;  %v753_v45 = vadd.f32 %v5118_v18, %v703_v44  ;;  %v4448_v0 = vmul.f32 %v4439_v21, %v3500_v58  ;;  %v5119_v63 = vld [vmem:[#allocation31_spill] sm:$0xff]  ;;  %v1402_v4 = vadd.f32 %v4352_v28, %v1360_v61 }
 0x27b   : > { %v2397_v18 = vmul.f32 %v2394_v46, %v3497_v57  ;;  %v2355_v46 = vsel %vm2237_vm11, %v2352_v42, %v2354_v36  ;;  %v2445_v36 = vmul.f32 %v2444_v37, %v3484_v47 }
 0x27c   : > { %v4433_v23 = vpop.permute.xlu1 %1497  ;;  %v4435_v52 = vpop.permute.xlu0 %1480  ;;  %v803_v9 = vadd.f32 %v5119_v63, %v753_v45  ;;  %v1444_v28 = vadd.f32 %v4384_v43, %v1402_v4  ;;  %v2401_v4 = vrot.slane %v2395_v26, 6 }
 0x27d   : > { %5117 = vst [vmem:[#allocation23_spill] sm:$0xff] %v4433_v23  ;;  %v2351_v23 = vrot.slane %v2345_v24, 6 }
 0x27e   : > { %2310 = vrot.lane.b32.xlu1 %v2305_v40, %s3253_s8  ;;  %2308 = vrot.lane.b32.xlu0 %v2303_v30, %s3253_s8  ;;  %v853_v30 = vadd.f32 %v4012_v55, %v803_v9  ;;  %v1339_v40 = vadd.f32 %v4316_v32, %v4294_v27  ;;  %v1486_v63 = vadd.f32 %v1479_v49, %v1444_v28  ;;  %v4474_v55 = vstv %s4431_s21  ;;  %s2900_s21 = sld [smem:[#allocation4 + $0x26]] }
 0x27f   : > { %v2353_v24 = vsel %vm2237_vm11, %v2351_v23, %v2352_v42  ;;  %v5121_v32 = vrot.slane %v4448_v0, 4  ;;  %v4491_v49 = vmul.f32 %v4474_v55, %v3500_v58 }
 0x280   : > { %v4452_v44 = vpop.permute.xlu1 %1501  ;;  %v1500_v14 = vpop.permute.xlu0 %1499  ;;  %v903_v61 = vadd.f32 %v4067_v62, %v853_v30  ;;  %v1381_v45 = vadd.f32 %v4344_v20, %v1339_v40  ;;  %v2402_v30 = vrot.slane %v2396_v5, 6  ;;  %v5122_v20 = vrot.slane %v4016_v12, 2 }
 0x281   : > { %5120 = vst [vmem:[#allocation26_spill] sm:$0xff] %v4452_v44  ;;  %v2404_v44 = vrot.slane %v2397_v18, 6 }
 0x282   : > { %2358 = vrot.lane.b32.xlu1 %v2353_v24, %s3254_s5  ;;  %2356 = vrot.lane.b32.xlu0 %v2351_v23, %s3254_s5  ;;  %v2446_v24 = vmul.f32 %v2444_v37, %v3500_v58  ;;  %v1560_v23 = vrot.slane %v4458_v19, 4  ;;  %v948_v42 = vadd.f32 %v5122_v20, %v903_v61  ;;  %v1423_v26 = vadd.f32 %v4374_v56, %v1381_v45 }
 0x283   : > { %v2405_v45 = vsel %vm2237_vm11, %v2402_v30, %v2404_v44  ;;  %v2403_v61 = vsel %vm2237_vm11, %v2401_v4, %v2402_v30 }
 0x284   : > { %v1521_v43 = vpop.permute.xlu1 %1520  ;;  %v4476_v9 = vpop.permute.xlu0 %1518  ;;  %v1562_v27 = vsel %vm1559_vm7, %v1560_v23, %v5121_v32  ;;  %v2452_v40 = vrot.slane %v2446_v24, 6  ;;  %v992_v12 = vadd.f32 %v4103_v22, %v948_v42  ;;  %v1465_v56 = vadd.f32 %v4408_v31, %v1423_v26 }
 0x285   : > { %v1528_v62 = vadd.f32 %v1521_v43, %v1486_v63  ;;  %v2494_v63 = vstv %s4460_s22  ;;  %v2447_v43 = vmul.f32 %v2444_v37, %v3497_v57  ;;  %v1580_v24 = vrot.slane %v4491_v49, 4  ;;  %v5123_v37 = vld [vmem:[#allocation32_spill] sm:$0xff]  ;;  %s2902_s22 = sld [smem:[#allocation4 + $0x27]] }
 0x286   : > { %2406 = vrot.lane.b32.xlu1 %v2401_v4, %s3255_s30  ;;  %2360 = vrot.lane.b32.xlu0 %v2355_v46, %s3254_s5  ;;  %v4509_v46 = vmul.f32 %v4474_v55, %v3484_v47  ;;  %v1042_v32 = vadd.f32 %v4127_v3, %v992_v12  ;;  %v2451_v22 = vrot.slane %v2445_v36, 6  ;;  %v2495_v44 = vmul.f32 %v2494_v63, %v3484_v47 }
 0x287   : > { %v4499_v5 = vadd.f32 %v1562_v27, %v1528_v62  ;;  %v346_v62 = vmul.f32 %v5123_v37, %v3500_v58  ;;  %v1507_v27 = vadd.f32 %v1500_v14, %v1465_v56  ;;  %v2454_v4 = vrot.slane %v2447_v43, 6  ;;  %v5124_v43 = vld [vmem:[#allocation15_spill] sm:$0xff] }
 0x288   : > { %v4501_v28 = vpop.permute.xlu1 %1539  ;;  %v4503_v18 = vpop.permute.xlu0 %1522  ;;  %v1579_v30 = vrot.slane %v4509_v46, 4  ;;  %v2496_v42 = vmul.f32 %v2494_v63, %v3500_v58  ;;  %v1092_v26 = vadd.f32 %v4152_v7, %v1042_v32  ;;  %v2497_v3 = vmul.f32 %v2494_v63, %v3497_v57 }
 0x289   : > { %v2544_v36 = vstv %s4493_s24  ;;  %v389_v12 = vadd.f32 %v5124_v43, %v346_v62  ;;  %v990_v7 = vadd.f32 %v4095_v10, %v4065_v35  ;;  %v5125_v62 = vld [vmem:[#allocation16_spill] sm:$0xff]  ;;  %s2904_s24 = sld [smem:[#allocation4 + $0x28]] }
 0x28a   : > { %2410 = vrot.lane.b32.xlu1 %v2405_v45, %s3255_s30  ;;  %2408 = vrot.lane.b32.xlu0 %v2403_v61, %s3255_s30  ;;  %v2453_v61 = vsel %vm2237_vm11, %v2451_v22, %v2452_v40  ;;  %v1581_v14 = vsel %vm1559_vm7, %v1579_v30, %v1580_v24  ;;  %v1142_v56 = vadd.f32 %v4180_v2, %v1092_v26  ;;  %v2504_v2 = vrot.slane %v2497_v3, 6  ;;  %v5127_v3 = vld [vmem:[#allocation20_spill] sm:$0xff] }
 0x28b   : > { %v429_v43 = vadd.f32 %v5125_v62, %v389_v12  ;;  %v1040_v35 = vadd.f32 %v4120_v59, %v990_v7  ;;  %v2545_v26 = vmul.f32 %v2544_v36, %v3484_v47 }
 0x28c   : > { %v4521_v20 = vpop.permute.xlu1 %1543  ;;  %v1542_v31 = vpop.permute.xlu0 %1541  ;;  %v1192_v10 = vadd.f32 %v4210_v29, %v1142_v56 }
 0x28d   : > { %v1549_v45 = vadd.f32 %v1542_v31, %v1507_v27  ;;  %v2501_v27 = vrot.slane %v2495_v44, 6  ;;  %v2502_v31 = vrot.slane %v2496_v42, 6 }
 0x28e   : > { %2458 = vrot.lane.b32.xlu1 %v2453_v61, %s3256_s25  ;;  %2456 = vrot.lane.b32.xlu0 %v2451_v22, %s3256_s25  ;;  %v2455_v22 = vsel %vm2237_vm11, %v2452_v40, %v2454_v4  ;;  %v2546_v61 = vmul.f32 %v2544_v36, %v3500_v58  ;;  %v1090_v40 = vadd.f32 %v4144_v8, %v1040_v35  ;;  %v2551_v8 = vrot.slane %v2545_v26, 6 }
 0x28f   : > { %v4541_v37 = vadd.f32 %v1581_v14, %v1549_v45  ;;  %v5126_v45 = vld [vmem:[#allocation18_spill] sm:$0xff]  ;;  %v1242_v4 = vadd.f32 %v4266_v53, %v1192_v10  ;;  %v2503_v29 = vsel %vm2237_vm11, %v2501_v27, %v2502_v31  ;;  %v2505_v56 = vsel %vm2237_vm11, %v2502_v31, %v2504_v2  ;;  %v5130_v2 = vld [vmem:[#allocation24_spill] sm:$0xff] }
 0x290   : > { %v4545_v63 = vpop.permute.xlu1 %1605  ;;  %v4547_v32 = vpop.permute.xlu0 %1603  ;;  %v469_v44 = vadd.f32 %v5126_v45, %v429_v43  ;;  %v2552_v59 = vrot.slane %v2546_v61, 6  ;;  %v1140_v7 = vadd.f32 %v4171_v51, %v1090_v40  ;;  %v5128_v53 = vld [vmem:[#allocation22_spill] sm:$0xff]  ;;  %v1791_v35 = vstv %s4543_s6  ;;  %s2906_s6 = sld [smem:[#allocation4 + $0x29]] }
 0x292   : > { %2506 = vrot.lane.b32.xlu1 %v2501_v27, %s3257_s4  ;;  %2460 = vrot.lane.b32.xlu0 %v2455_v22, %s3256_s25  ;;  %v509_v12 = vadd.f32 %v5127_v3, %v469_v44  ;;  %v2547_v22 = vmul.f32 %v2544_v36, %v3497_v57  ;;  %v1190_v43 = vadd.f32 %v4199_v50, %v1140_v7  ;;  %v5129_v27 = vrot.slane %v4223_v16, 3 }
 0x293   : > { %v2553_v31 = vsel %vm2237_vm11, %v2551_v8, %v2552_v59  ;;  %v1793_v36 = vmul.f32 %v1791_v35, %v3500_v58  ;;  %v1792_v50 = vmul.f32 %v1791_v35, %v3484_v47 }
 0x294   : > { %v4560_v42 = vpop.permute.xlu1 %1628  ;;  %v4562_v14 = vpop.permute.xlu0 %1607  ;;  %v549_v62 = vadd.f32 %v5128_v53, %v509_v12  ;;  %v1283_v61 = vadd.f32 %v5129_v27, %v1242_v4  ;;  %v1240_v26 = vadd.f32 %v4242_v13, %v1190_v43  ;;  %v2554_v40 = vrot.slane %v2547_v22, 6 }
 0x295   : > { %v1799_v3 = vrot.slane %v1793_v36, 4  ;;  %v1841_v12 = vstv %s2892_s26  ;;  %v1794_v13 = vmul.f32 %v1791_v35, %v3497_v57  ;;  %v1798_v43 = vrot.slane %v1792_v50, 4  ;;  %s4721_s26 = sld [smem:[#allocation4 + $0x2b]] }
 0x296   : > { %2510 = vrot.lane.b32.xlu1 %v2505_v56, %s3257_s4  ;;  %2508 = vrot.lane.b32.xlu0 %v2503_v29, %s3257_s4  ;;  %v589_v45 = vadd.f32 %v5130_v2, %v549_v62  ;;  %v1319_v44 = vadd.f32 %v4307_v39, %v1283_v61  ;;  %v5131_v39 = vrot.slane %v3980_v25, 1  ;;  %v5132_v56 = vrot.slane %v4229_v15, 3  ;;  %v5133_v62 = vld [vmem:[#allocation17_spill] sm:$0xff] }
 0x297   : > { %v2555_v53 = vsel %vm2237_vm11, %v2552_v59, %v2554_v40  ;;  %v1800_v59 = vsel %vm1559_vm7, %v1798_v43, %v1799_v3  ;;  %v1843_v61 = vmul.f32 %v1841_v12, %v3500_v58  ;;  %v1844_v35 = vmul.f32 %v1841_v12, %v3497_v57 }
 0x298   : > { %v4576_v10 = vpop.permute.xlu1 %1632  ;;  %v4578_v51 = vpop.permute.xlu0 %1630  ;;  %v1361_v16 = vadd.f32 %v4335_v11, %v1319_v44  ;;  %v628_v7 = vadd.f32 %v5131_v39, %v589_v45  ;;  %v1281_v22 = vadd.f32 %v5132_v56, %v1240_v26  ;;  %v1555_v11 = vmul.f32 %v4439_v21, %v3497_v57  ;;  %v5135_v26 = vld [vmem:[#allocation27_spill] sm:$0xff]  ;;  %v5136_v56 = vld [vmem:[#allocation29_spill] sm:$0xff] }
 0x299   : > { %v1842_v21 = vmul.f32 %v1841_v12, %v3484_v47  ;;  %v1801_v45 = vrot.slane %v1794_v13, 4  ;;  %v1851_v13 = vrot.slane %v1844_v35, 4 }
 0x29a   : > { %2558 = vrot.lane.b32.xlu1 %v2553_v31, %s3258_s3  ;;  %2556 = vrot.lane.b32.xlu0 %v2551_v8, %s3258_s3  ;;  %v1403_v8 = vadd.f32 %v4363_v34, %v1361_v16  ;;  %v1317_v25 = vadd.f32 %v4298_v48, %v1281_v22  ;;  %v5134_v31 = vld [vmem:[#allocation25_spill] sm:$0xff]  ;;  %v1930_v16 = vstv %s4589_s0  ;;  %s4730_s0 = sld [smem:[#allocation4 + $0x2c]] }
 0x29b   : > { %v678_v36 = vadd.f32 %v5134_v31, %v628_v7  ;;  %v1932_v7 = vmul.f32 %v1930_v16, %v3500_v58 }
 0x29c   : > { %v1656_v4 = vpop.permute.xlu1 %1655  ;;  %v4591_v29 = vpop.permute.xlu0 %1653  ;;  %v1445_v15 = vadd.f32 %v4397_v1, %v1403_v8  ;;  %v1359_v2 = vadd.f32 %v4326_v41, %v1317_v25  ;;  %v1563_v1 = vrot.slane %v1555_v11, 4  ;;  %v1848_v41 = vrot.slane %v1842_v21, 4 }
 0x29d   : > { %v728_v44 = vadd.f32 %v5135_v26, %v678_v36  ;;  %v1938_v21 = vrot.slane %v1932_v7, 5  ;;  %v2030_v7 = vstv %s2900_s21  ;;  %s4769_s21 = sld [smem:[#allocation4 + $0x2d]] }
 0x29e   : > { %1757 = vrot.lane.b32.xlu1 %v5133_v62, %s3256_s25  ;;  %2560 = vrot.lane.b32.xlu0 %v2555_v53, %s3258_s3  ;;  %v1487_v48 = vadd.f32 %v4435_v52, %v1445_v15  ;;  %v1401_v40 = vadd.f32 %v4354_v17, %v1359_v2  ;;  %v1849_v52 = vrot.slane %v1843_v61, 4  ;;  %v1613_v17 = vadd.f32 %v4545_v63, %v4499_v5 }
 0x29f   : > { %v778_v22 = vadd.f32 %v5136_v56, %v728_v44  ;;  %v5137_v53 = vrot.slane %v4448_v0, 4  ;;  %v1931_v62 = vmul.f32 %v1930_v16, %v3484_v47  ;;  %v1933_v61 = vmul.f32 %v1930_v16, %v3497_v57  ;;  %v5140_v56 = vld [vmem:[#allocation36_spill] sm:$0xff] }
 0x2a0   : > { %v4609_v27 = vpop.permute.xlu1 %1678  ;;  %v1658_v34 = vpop.permute.xlu0 %1657  ;;  %v1529_v50 = vadd.f32 %v4503_v18, %v1487_v48  ;;  %v1443_v8 = vadd.f32 %v4386_v33, %v1401_v40  ;;  %v1802_v18 = vsel %vm1559_vm7, %v1799_v3, %v1801_v45  ;;  %v1852_v3 = vsel %vm1559_vm7, %v1849_v52, %v1851_v13 }
 0x2a1   : > { %v1564_v11 = vsel %vm1559_vm7, %v5137_v53, %v1563_v1  ;;  %v828_v25 = vadd.f32 %v3968_v60, %v778_v22  ;;  %v1850_v0 = vsel %vm1559_vm7, %v1848_v41, %v1849_v52  ;;  %v1937_v2 = vrot.slane %v1931_v62, 5 }
 0x2a2   : > { %1805 = vrot.lane.b32.xlu1 %v1800_v59, %s3257_s4  ;;  %1803 = vrot.lane.b32.xlu0 %v1798_v43, %s3257_s4  ;;  %v1980_v43 = vstv %s4605_s7  ;;  %v1485_v33 = vadd.f32 %v4418_v54, %v1443_v8  ;;  %v1570_v15 = vadd.f32 %v1564_v11, %v1529_v50  ;;  %v1663_v59 = vadd.f32 %v1656_v4, %v1613_v17  ;;  %s4748_s7 = sld [smem:[#allocation4 + $0x54]] }
 0x2a3   : > { %v878_v35 = vadd.f32 %v4033_v38, %v828_v25  ;;  %v1981_v1 = vmul.f32 %v1980_v43, %v3484_v47  ;;  %v1982_v38 = vmul.f32 %v1980_v43, %v3500_v58  ;;  %v1939_v44 = vsel %vm1898_vm10, %v1937_v2, %v1938_v21 }
 0x2a4   : > { %v4624_v12 = vpop.permute.xlu1 %1682  ;;  %v4626_v39 = vpop.permute.xlu0 %1680  ;;  %v1527_v31 = vadd.f32 %v4476_v9, %v1485_v33  ;;  %v1614_v60 = vadd.f32 %v4562_v14, %v1570_v15  ;;  %v1983_v9 = vmul.f32 %v1980_v43, %v3497_v57  ;;  %v2031_v62 = vmul.f32 %v2030_v7, %v3484_v47 }
 0x2a5   : > { %v928_v54 = vadd.f32 %v4081_v6, %v878_v35  ;;  %v1940_v6 = vrot.slane %v1933_v61, 5  ;;  %v1987_v19 = vrot.slane %v1981_v1, 5 }
 0x2a6   : > { %1853 = vrot.lane.b32.xlu1 %v1848_v41, %s3258_s3  ;;  %1807 = vrot.lane.b32.xlu0 %v1802_v18, %s3257_s4  ;;  %v1664_v4 = vadd.f32 %v1658_v34, %v1614_v60  ;;  %v1568_v14 = vadd.f32 %v1560_v23, %v1527_v31  ;;  %v5138_v34 = vld [vmem:[#allocation33_spill] sm:$0xff]  ;;  %v1988_v23 = vrot.slane %v1982_v38, 5  ;;  %v1990_v13 = vrot.slane %v1983_v9, 5 }
 0x2a7   : > { %v5139_v40 = vrot.slane %v5138_v34, 2  ;;  %v1941_v17 = vsel %vm1898_vm10, %v1938_v21, %v1940_v6  ;;  %v2032_v18 = vmul.f32 %v2030_v7, %v3500_v58  ;;  %v2037_v31 = vrot.slane %v2031_v62, 5 }
 0x2a8   : > { %v1706_v5 = vpop.permute.xlu1 %1705  ;;  %v1704_v63 = vpop.permute.xlu0 %1703  ;;  %v1612_v16 = vadd.f32 %v4547_v32, %v1568_v14  ;;  %v5141_v32 = vld [vmem:[#allocation38_spill] sm:$0xff]  ;;  %v1991_v33 = vsel %vm1898_vm10, %v1988_v23, %v1990_v13  ;;  %v1989_v15 = vsel %vm1898_vm10, %v1987_v19, %v1988_v23  ;;  %v5145_v14 = vld [vmem:[#allocation48_spill] sm:$0xff] }
 0x2a9   : > { %v1713_v36 = vadd.f32 %v1706_v5, %v1663_v59  ;;  %v967_v50 = vadd.f32 %v5139_v40, %v928_v54  ;;  %v2033_v59 = vmul.f32 %v2030_v7, %v3497_v57  ;;  %v5142_v5 = vld [vmem:[#allocation40_spill] sm:$0xff]  ;;  %v2038_v61 = vrot.slane %v2032_v18, 5  ;;  %v5146_v7 = vld [vmem:[#allocation34_spill] sm:$0xff] }
 0x2aa   : > { %1857 = vrot.lane.b32.xlu1 %v1852_v3, %s3258_s3  ;;  %1855 = vrot.lane.b32.xlu0 %v1850_v0, %s3258_s3  ;;  %v1662_v8 = vadd.f32 %v4591_v29, %v1612_v16  ;;  %v2080_v29 = vstv %s2902_s22  ;;  %s4791_s22 = sld [smem:[#allocation4 + $0x2e]] }
 0x2ab   : > { %v1017_v22 = vadd.f32 %v5140_v56, %v967_v50  ;;  %v2039_v38 = vsel %vm1898_vm10, %v2037_v31, %v2038_v61  ;;  %v2040_v9 = vrot.slane %v2033_v59, 5  ;;  %v5147_v56 = vld [vmem:[#allocation35_spill] sm:$0xff] }
 0x2ac   : > { %v4652_v48 = vpop.permute.xlu1 %1728  ;;  %v1708_v45 = vpop.permute.xlu0 %1707  ;;  %v1712_v11 = vadd.f32 %v1704_v63, %v1662_v8  ;;  %v5143_v63 = vld [vmem:[#allocation42_spill] sm:$0xff]  ;;  %v5148_v8 = vld [vmem:[#allocation45_spill] sm:$0xff] }
 0x2ad   : > { %v4659_v26 = vadd.f32 %v1708_v45, %v1664_v4  ;;  %v1067_v53 = vadd.f32 %v5141_v32, %v1017_v22  ;;  %v2081_v4 = vmul.f32 %v2080_v29, %v3484_v47  ;;  %v5144_v45 = vld [vmem:[#allocation44_spill] sm:$0xff]  ;;  %v2041_v23 = vsel %vm1898_vm10, %v2038_v61, %v2040_v9  ;;  %v5152_v61 = vld [vmem:[#allocation39_spill] sm:$0xff]  ;;  %v5154_v9 = vld [vmem:[#allocation41_spill] sm:$0xff] }
 0x2ae   : > { %1944 = vrot.lane.b32.xlu1 %v1939_v44, %s3253_s8  ;;  %1942 = vrot.lane.b32.xlu0 %v1937_v2, %s3253_s8  ;;  %v2082_v2 = vmul.f32 %v2080_v29, %v3500_v58  ;;  %v1015_v22 = vadd.f32 %v5147_v56, %v5146_v7  ;;  %v5157_v7 = vld [vmem:[#allocation21_spill] sm:$0xff] }
 0x2af   : > { %v1117_v3 = vadd.f32 %v5142_v5, %v1067_v53  ;;  %v2087_v40 = vrot.slane %v2081_v4, 5 }
 0x2b0   : > { %v4667_v41 = vpop.permute.xlu1 %1732  ;;  %v4669_v52 = vpop.permute.xlu0 %1730  ;;  %v2088_v50 = vrot.slane %v2082_v2, 5 }
 0x2b1   : > { %v1167_v35 = vadd.f32 %v5143_v63, %v1117_v3 }
 0x2b2   : > { %1992 = vrot.lane.b32.xlu1 %v1987_v19, %s3254_s5  ;;  %1946 = vrot.lane.b32.xlu0 %v1941_v17, %s3253_s8  ;;  %v2130_v19 = vstv %s2904_s24  ;;  %v5149_v17 = vrot.slane %v5148_v8, 3  ;;  %s4803_s24 = sld [smem:[#allocation4 + $0x2f]] }
 0x2b3   : > { %v1217_v1 = vadd.f32 %v5144_v45, %v1167_v35  ;;  %v2132_v13 = vmul.f32 %v2130_v19, %v3500_v58  ;;  %v2131_v32 = vmul.f32 %v2130_v19, %v3484_v47  ;;  %v2133_v3 = vmul.f32 %v2130_v19, %v3497_v57  ;;  %v5153_v35 = vld [vmem:[#allocation52_spill] sm:$0xff] }
 0x2b4   : > { %v1756_v43 = vpop.permute.xlu1 %1755  ;;  %v1754_v25 = vpop.permute.xlu0 %1753  ;;  %v1575_v19 = vmul.f32 %v4474_v55, %v3497_v57  ;;  %v5158_v55 = vld [vmem:[#allocation46_spill] sm:$0xff] }
 0x2b5   : > { %v4683_v0 = vadd.f32 %v1756_v43, %v1713_v36  ;;  %v4685_v21 = vadd.f32 %v1754_v25, %v1712_v11  ;;  %v2083_v36 = vmul.f32 %v2080_v29, %v3497_v57  ;;  %v1267_v44 = vadd.f32 %v5145_v14, %v1217_v1  ;;  %v5151_v29 = vld [vmem:[#allocation50_spill] sm:$0xff] }
 0x2b6   : > { %1996 = vrot.lane.b32.xlu1 %v1991_v33, %s3254_s5  ;;  %1994 = vrot.lane.b32.xlu0 %v1989_v15, %s3254_s5  ;;  %v2089_v43 = vsel %vm1898_vm10, %v2087_v40, %v2088_v50  ;;  %v2180_v25 = vstv %s2906_s6  ;;  %v5150_v33 = vld [vmem:[#allocation37_spill] sm:$0xff]  ;;  %v2138_v5 = vrot.slane %v2132_v13, 5  ;;  %v2137_v4 = vrot.slane %v2131_v32, 5 }
 0x2b7   : > { %v2090_v16 = vrot.slane %v2083_v36, 5  ;;  %v1298_v18 = vadd.f32 %v5149_v17, %v1267_v44  ;;  %v1065_v15 = vadd.f32 %v5150_v33, %v1015_v22  ;;  %v2181_v45 = vmul.f32 %v2180_v25, %v3484_v47  ;;  %v5155_v44 = vld [vmem:[#allocation54_spill] sm:$0xff] }
 0x2b8   : > { %v4690_v60 = vpop.permute.xlu1 %1780  ;;  %v4692_v54 = vpop.permute.xlu0 %1778  ;;  %v2182_v1 = vmul.f32 %v2180_v25, %v3500_v58 }
 0x2b9   : > { %v2091_v62 = vsel %vm1898_vm10, %v2088_v50, %v2090_v16  ;;  %v1340_v59 = vadd.f32 %v5151_v29, %v1298_v18  ;;  %v1115_v63 = vadd.f32 %v5152_v61, %v1065_v15  ;;  %v2139_v50 = vsel %vm1898_vm10, %v2137_v4, %v2138_v5 }
 0x2ba   : > { %2044 = vrot.lane.b32.xlu1 %v2039_v38, %s3255_s30  ;;  %2042 = vrot.lane.b32.xlu0 %v2037_v31, %s3255_s30  ;;  %v2183_v38 = vmul.f32 %v2180_v25, %v3497_v57  ;;  %v2140_v16 = vrot.slane %v2133_v3, 5  ;;  %v2187_v17 = vrot.slane %v2181_v45, 5  ;;  %v2188_v18 = vrot.slane %v2182_v1, 5  ;;  %v5159_v25 = vld [vmem:[#allocation26_spill] sm:$0xff] }
 0x2bb   : > { %v1382_v31 = vadd.f32 %v5153_v35, %v1340_v59  ;;  %v1165_v14 = vadd.f32 %v5154_v9, %v1115_v63  ;;  %v1582_v59 = vrot.slane %v1575_v19, 4  ;;  %v2319_v63 = vstv %s4730_s0 }
 0x2bc   : > { %v4702_v6 = vpop.permute.xlu1 %1828  ;;  %v4704_v34 = vpop.permute.xlu0 %1782  ;;  %v2190_v32 = vrot.slane %v2183_v38, 5  ;;  %v2141_v15 = vsel %vm1898_vm10, %v2138_v5, %v2140_v16  ;;  %v5160_v5 = vld [vmem:[#allocation47_spill] sm:$0xff]  ;;  %v2189_v9 = vsel %vm1898_vm10, %v2187_v17, %v2188_v18  ;;  %v1638_v19 = vadd.f32 %v4578_v51, %v4541_v37 }
 0x2bd   : > { %v5161_v45 = vrot.slane %v5160_v5, 3 }
 0x2be   : > { %2092 = vrot.lane.b32.xlu1 %v2087_v40, %s3256_s25  ;;  %2046 = vrot.lane.b32.xlu0 %v2041_v23, %s3255_s30  ;;  %v1424_v40 = vadd.f32 %v5155_v44, %v1382_v31  ;;  %v5156_v23 = vld [vmem:[#allocation43_spill] sm:$0xff]  ;;  %v2191_v38 = vsel %vm1898_vm10, %v2188_v18, %v2190_v32  ;;  %v2320_v44 = vmul.f32 %v2319_v63, %v3484_v47 }
 0x2bf   : > { %v1215_v13 = vadd.f32 %v5156_v23, %v1165_v14  ;;  %v1583_v14 = vsel %vm1559_vm7, %v1580_v24, %v1582_v59  ;;  %v2321_v24 = vmul.f32 %v2319_v63, %v3500_v58  ;;  %v5163_v18 = vld [vmem:[#allocation51_spill] sm:$0xff]  ;;  %v1688_v37 = vadd.f32 %v4626_v39, %v1638_v19 }
 0x2c0   : > { %v4715_v53 = vpop.permute.xlu1 %1832  ;;  %v4717_v11 = vpop.permute.xlu0 %1830  ;;  %v1466_v56 = vadd.f32 %v5157_v7, %v1424_v40  ;;  %v5162_v40 = vld [vmem:[#allocation49_spill] sm:$0xff] }
 0x2c2   : > { %2096 = vrot.lane.b32.xlu1 %v2091_v62, %s3256_s25  ;;  %2094 = vrot.lane.b32.xlu0 %v2089_v43, %s3256_s25  ;;  %v2269_v62 = vstv %s4721_s26  ;;  %v1265_v43 = vadd.f32 %v5158_v55, %v1215_v13  ;;  %v1508_v33 = vadd.f32 %v5159_v25, %v1466_v56  ;;  %v1911_v13 = vstv %s4748_s7 }
 0x2c3   : > { %v2271_v29 = vmul.f32 %v2269_v62, %v3500_v58  ;;  %v2270_v61 = vmul.f32 %v2269_v62, %v3484_v47  ;;  %v1913_v55 = vmul.f32 %v1911_v13, %v3500_v58 }
 0x2c4   : > { %v4732_v2 = vpop.permute.xlu1 %1880  ;;  %v4734_v36 = vpop.permute.xlu0 %1878  ;;  %v1550_v3 = vadd.f32 %v4521_v20, %v1508_v33  ;;  %v1296_v1 = vadd.f32 %v5161_v45, %v1265_v43  ;;  %v5164_v43 = vld [vmem:[#allocation53_spill] sm:$0xff] }
 0x2c5   : > { %v2277_v20 = vrot.slane %v2271_v29, 6  ;;  %v2276_v23 = vrot.slane %v2270_v61, 6  ;;  %v2326_v29 = vrot.slane %v2320_v44, 6 }
 0x2c6   : > { %2144 = vrot.lane.b32.xlu1 %v2139_v50, %s3257_s4  ;;  %2142 = vrot.lane.b32.xlu0 %v2137_v4, %s3257_s4  ;;  %v2272_v4 = vmul.f32 %v2269_v62, %v3497_v57  ;;  %v1338_v50 = vadd.f32 %v5162_v40, %v1296_v1  ;;  %v1589_v16 = vadd.f32 %v1583_v14, %v1550_v3  ;;  %v2327_v3 = vrot.slane %v2321_v24, 6 }
 0x2c7   : > { %v2278_v51 = vsel %vm2237_vm11, %v2276_v23, %v2277_v20  ;;  %v4816_v1 = vmul.f32 %v1911_v13, %v3484_v47 }
 0x2c8   : > { %v4750_v22 = vpop.permute.xlu1 %1967  ;;  %v4752_v8 = vpop.permute.xlu0 %1882  ;;  %v2279_v49 = vrot.slane %v2272_v4, 6  ;;  %v1380_v32 = vadd.f32 %v5163_v18, %v1338_v50  ;;  %v1639_v62 = vadd.f32 %v4576_v10, %v1589_v16  ;;  %v5165_v4 = vld [vmem:[#allocation19_spill] sm:$0xff]  ;;  %v2328_v19 = vsel %vm2237_vm11, %v2326_v29, %v2327_v3 }
 0x2ca   : > { %2192 = vrot.lane.b32.xlu1 %v2187_v17, %s3258_s3  ;;  %2146 = vrot.lane.b32.xlu0 %v2141_v15, %s3257_s4  ;;  %v2322_v17 = vmul.f32 %v2319_v63, %v3497_v57  ;;  %v1422_v25 = vadd.f32 %v5164_v43, %v1380_v32  ;;  %v1689_v33 = vadd.f32 %v4624_v12, %v1639_v62  ;;  %v2369_v63 = vstv %s4769_s21 }
 0x2cb   : > { %v1738_v15 = vadd.f32 %v4669_v52, %v1688_v37  ;;  %v2280_v59 = vsel %vm2237_vm11, %v2277_v20, %v2279_v49  ;;  %v2371_v52 = vmul.f32 %v2369_v63, %v3500_v58  ;;  %v5166_v20 = vld [vmem:[#allocation23_spill] sm:$0xff]  ;;  %v2469_v37 = vstv %s4803_s24 }
 0x2cc   : > { %v4764_v35 = vpop.permute.xlu1 %1971  ;;  %v4766_v31 = vpop.permute.xlu0 %1969  ;;  %v2329_v61 = vrot.slane %v2322_v17, 6  ;;  %v1464_v5 = vadd.f32 %v5165_v4, %v1422_v25  ;;  %v1739_v45 = vadd.f32 %v4667_v41, %v1689_v33  ;;  %v1918_v17 = vrot.slane %v4816_v1, 5 }
 0x2cd   : > { %v1788_v12 = vadd.f32 %v4690_v60, %v1738_v15  ;;  %v2370_v60 = vmul.f32 %v2369_v63, %v3484_v47 }
 0x2ce   : > { %2196 = vrot.lane.b32.xlu1 %v2191_v38, %s3258_s3  ;;  %2194 = vrot.lane.b32.xlu0 %v2189_v9, %s3258_s3  ;;  %v1914_v38 = vmul.f32 %v1911_v13, %v3497_v57  ;;  %v1919_v9 = vrot.slane %v1913_v55, 5  ;;  %v1506_v14 = vadd.f32 %v5166_v20, %v1464_v5  ;;  %v1789_v44 = vadd.f32 %v4704_v34, %v1739_v45 }
 0x2cf   : > { %v1838_v41 = vadd.f32 %v4717_v11, %v1788_v12  ;;  %v2330_v16 = vsel %vm2237_vm11, %v2327_v3, %v2329_v61  ;;  %v2372_v13 = vmul.f32 %v2369_v63, %v3497_v57  ;;  %v2377_v11 = vrot.slane %v2371_v52, 6 }
 0x2d0   : > { %v4785_v7 = vpop.permute.xlu1 %2019  ;;  %v4787_v56 = vpop.permute.xlu0 %2017  ;;  %v1548_v49 = vadd.f32 %v4501_v28, %v1506_v14  ;;  %v1839_v24 = vadd.f32 %v4715_v53, %v1789_v44  ;;  %v1921_v18 = vrot.slane %v1914_v38, 5  ;;  %v2376_v62 = vrot.slane %v2370_v60, 6 }
 0x2d1   : > { %v1888_v34 = vadd.f32 %v4732_v2, %v1838_v41  ;;  %v1920_v28 = vsel %vm1898_vm10, %v1918_v17, %v1919_v9  ;;  %v2379_v15 = vrot.slane %v2372_v13, 6  ;;  %v2472_v13 = vmul.f32 %v2469_v37, %v3497_v57 }
 0x2d2   : > { %2283 = vrot.lane.b32.xlu1 %v2278_v51, %s3253_s8  ;;  %2281 = vrot.lane.b32.xlu0 %v2276_v23, %s3253_s8  ;;  %v2419_v23 = vstv %s4791_s22  ;;  %v1889_v32 = vadd.f32 %v4752_v8, %v1839_v24  ;;  %v1587_v25 = vadd.f32 %v1579_v30, %v1548_v49  ;;  %v2378_v8 = vsel %vm2237_vm11, %v2376_v62, %v2377_v11 }
 0x2d3   : > { %v2420_v51 = vmul.f32 %v2419_v23, %v3484_v47  ;;  %v2421_v55 = vmul.f32 %v2419_v23, %v3500_v58  ;;  %v2422_v43 = vmul.f32 %v2419_v23, %v3497_v57  ;;  %v1927_v33 = vadd.f32 %v1920_v28, %v1888_v34 }
 0x2d4   : > { %v4805_v10 = vpop.permute.xlu1 %2067  ;;  %v4807_v39 = vpop.permute.xlu0 %2021  ;;  %v1637_v3 = vadd.f32 %v4560_v42, %v1587_v25  ;;  %v2471_v30 = vmul.f32 %v2469_v37, %v3500_v58 }
 0x2d5   : > { %v1977_v46 = vadd.f32 %v4766_v31, %v1927_v33  ;;  %v2426_v5 = vrot.slane %v2420_v51, 6  ;;  %v2427_v45 = vrot.slane %v2421_v55, 6  ;;  %v2429_v12 = vrot.slane %v2422_v43, 6 }
 0x2d6   : > { %2331 = vrot.lane.b32.xlu1 %v2326_v29, %s3254_s5  ;;  %2285 = vrot.lane.b32.xlu0 %v2280_v59, %s3253_s8  ;;  %s4834_s8 = sld [smem:[#allocation4 + $0x5b]]  ;;  %v1922_v29 = vsel %vm1898_vm10, %v1919_v9, %v1921_v18  ;;  %v2470_v59 = vmul.f32 %v2469_v37, %v3484_v47  ;;  %v1687_v52 = vadd.f32 %v4609_v27, %v1637_v3  ;;  %v2477_v60 = vrot.slane %v2471_v30, 6 }
 0x2d7   : > { %v1928_v61 = vadd.f32 %v1922_v29, %v1889_v32  ;;  %v2027_v38 = vadd.f32 %v4785_v7, %v1977_v46  ;;  %v2380_v9 = vsel %vm2237_vm11, %v2377_v11, %v2379_v15  ;;  %v2430_v7 = vsel %vm2237_vm11, %v2427_v45, %v2429_v12 }
 0x2d8   : > { %v4825_v40 = vpop.permute.xlu1 %2071  ;;  %v2070_v50 = vpop.permute.xlu0 %2069  ;;  %v2476_v42 = vrot.slane %v2470_v59, 6  ;;  %v1737_v14 = vadd.f32 %v4652_v48, %v1687_v52 }
 0x2d9   : > { %v1978_v44 = vadd.f32 %v4764_v35, %v1928_v61  ;;  %v2077_v41 = vadd.f32 %v2070_v50, %v2027_v38 }
 0x2da   : > { %2335 = vrot.lane.b32.xlu1 %v2330_v16, %s3254_s5  ;;  %2333 = vrot.lane.b32.xlu0 %v2328_v19, %s3254_s5  ;;  %s4852_s5 = sld [smem:[#allocation4 + $0x30]]  ;;  %v2428_v19 = vsel %vm2237_vm11, %v2426_v5, %v2427_v45  ;;  %v1787_v49 = vadd.f32 %v4692_v54, %v1737_v14 }
 0x2db   : > { %v2028_v24 = vadd.f32 %v4807_v39, %v1978_v44 }
 0x2dc   : > { %v2120_v53 = vpop.permute.xlu1 %2119  ;;  %v4844_v2 = vpop.permute.xlu0 %2117  ;;  %v2250_v20 = vstv %s4834_s8  ;;  %v1837_v11 = vadd.f32 %v4702_v6, %v1787_v49 }
 0x2dd   : > { %v2252_v31 = vmul.f32 %v2250_v20, %v3500_v58  ;;  %v2251_v23 = vmul.f32 %v2250_v20, %v3484_v47  ;;  %v2127_v34 = vadd.f32 %v2120_v53, %v2077_v41  ;;  %v2253_v35 = vmul.f32 %v2250_v20, %v3497_v57 }
 0x2de   : > { %2383 = vrot.lane.b32.xlu1 %v2378_v8, %s3255_s30  ;;  %2381 = vrot.lane.b32.xlu0 %v2376_v62, %s3255_s30  ;;  %v2078_v18 = vadd.f32 %v4825_v40, %v2028_v24  ;;  %v2478_v62 = vsel %vm2237_vm11, %v2476_v42, %v2477_v60  ;;  %v2479_v53 = vrot.slane %v2472_v13, 6  ;;  %v1887_v55 = vadd.f32 %v4734_v36, %v1837_v11 }
 0x2df   : > { %v2258_v50 = vrot.slane %v2252_v31, 6  ;;  %v2257_v28 = vrot.slane %v2251_v23, 6  ;;  %v2260_v6 = vrot.slane %v2253_v35, 6 }
 0x2e0   : > { %v4861_v63 = vpop.permute.xlu1 %2167  ;;  %v2122_v4 = vpop.permute.xlu0 %2121  ;;  %v2519_v48 = vstv %s4852_s5  ;;  %v2480_v61 = vsel %vm2237_vm11, %v2477_v60, %v2479_v53  ;;  %v1926_v36 = vadd.f32 %v1918_v17, %v1887_v55 }
 0x2e1   : > { %v2520_v39 = vmul.f32 %v2519_v48, %v3484_v47  ;;  %v2521_v51 = vmul.f32 %v2519_v48, %v3500_v58  ;;  %v2128_v43 = vadd.f32 %v2122_v4, %v2078_v18  ;;  %v2522_v33 = vmul.f32 %v2519_v48, %v3497_v57 }
 0x2e2   : > { %2431 = vrot.lane.b32.xlu1 %v2426_v5, %s3256_s25  ;;  %2385 = vrot.lane.b32.xlu0 %v2380_v9, %s3255_s30  ;;  %v2259_v40 = vsel %vm2237_vm11, %v2257_v28, %v2258_v50  ;;  %v2261_v5 = vsel %vm2237_vm11, %v2258_v50, %v2260_v6  ;;  %v1976_v38 = vadd.f32 %v4750_v22, %v1926_v36  ;;  %s3259_s30 = smov 106  }
 0x2e3   : > { %v2526_v3 = vrot.slane %v2520_v39, 6  ;;  %v2527_v30 = vrot.slane %v2521_v51, 6  ;;  %v2529_v4 = vrot.slane %v2522_v33, 6 }
 0x2e4   : > { %v2172_v27 = vpop.permute.xlu1 %2171  ;;  %v2170_v16 = vpop.permute.xlu0 %2169  ;;  %v2026_v1 = vadd.f32 %v4787_v56, %v1976_v38 }
 0x2e5   : > { %v2177_v32 = vadd.f32 %v2170_v16, %v2127_v34  ;;  %v2178_v8 = vadd.f32 %v2172_v27, %v2128_v43  ;;  %v2530_v9 = vsel %vm2237_vm11, %v2527_v30, %v2529_v4  ;;  %v2528_v20 = vsel %vm2237_vm11, %v2526_v3, %v2527_v30 }
 0x2e6   : > { %2435 = vrot.lane.b32.xlu1 %v2430_v7, %s3256_s25  ;;  %2433 = vrot.lane.b32.xlu0 %v2428_v19, %s3256_s25  ;;  %v2076_v31 = vadd.f32 %v4805_v10, %v2026_v1  ;;  %s2894_s25 = sld [smem:[#allocation4 + $0x23]] }
 0x2e8   : > { %v2220_v37 = vpop.permute.xlu1 %2219  ;;  %v2218_v54 = vpop.permute.xlu0 %2217  ;;  %v2126_v14 = vadd.f32 %v4844_v2, %v2076_v31 }
 0x2e9   : > { %v2227_v25 = vadd.f32 %v2220_v37, %v2177_v32 }
 0x2ea   : > { %2483 = vrot.lane.b32.xlu1 %v2478_v62, %s3257_s4  ;;  %2481 = vrot.lane.b32.xlu0 %v2476_v42, %s3257_s4  ;;  %v2176_v22 = vadd.f32 %v4861_v63, %v2126_v14 }
 0x2eb   : > { %v2266_v15 = vadd.f32 %v2259_v40, %v2227_v25 }
 0x2ec   : > { %v2307_v29 = vpop.permute.xlu1 %2306  ;;  %v2222_v59 = vpop.permute.xlu0 %2221  ;;  %v2226_v60 = vadd.f32 %v2218_v54, %v2176_v22 }
 0x2ed   : > { %v2228_v46 = vadd.f32 %v2222_v59, %v2178_v8 }
 0x2ee   : > { %2531 = vrot.lane.b32.xlu1 %v2526_v3, %s3258_s3  ;;  %2485 = vrot.lane.b32.xlu0 %v2480_v61, %s3257_s4  ;;  %v2265_v7 = vadd.f32 %v2257_v28, %v2226_v60  ;;  %s2908_s4 = sld [smem:[#allocation4 + $0x2a]] }
 0x2ef   : > { %v2267_v45 = vadd.f32 %v2261_v5, %v2228_v46 }
 0x2f0   : > { %v2311_v12 = vpop.permute.xlu1 %2310  ;;  %v2309_v52 = vpop.permute.xlu0 %2308  ;;  %v2315_v13 = vadd.f32 %v2307_v29, %v2265_v7 }
 0x2f1   : > { %v2316_v49 = vadd.f32 %v2309_v52, %v2266_v15  ;;  %v2317_v35 = vadd.f32 %v2311_v12, %v2267_v45  ;;  %v1891_v45 = vstv %s2894_s25 }
 0x2f2   : > { %2535 = vrot.lane.b32.xlu1 %v2530_v9, %s3258_s3  ;;  %2533 = vrot.lane.b32.xlu0 %v2528_v20, %s3258_s3  ;;  %v1893_v12 = vmul.f32 %v1891_v45, %v3500_v58  ;;  %v1892_v52 = vmul.f32 %v1891_v45, %v3484_v47  ;;  %v1894_v38 = vmul.f32 %v1891_v45, %v3497_v57 }
 0x2f4   : > { %v2359_v17 = vpop.permute.xlu1 %2358  ;;  %v2357_v42 = vpop.permute.xlu0 %2356 }
 0x2f5   : > { %v2366_v34 = vadd.f32 %v2359_v17, %v2316_v49  ;;  %v2365_v48 = vadd.f32 %v2357_v42, %v2315_v13  ;;  %v1900_v42 = vrot.slane %v1893_v12, 5 }
 0x2f8   : > { %v2407_v44 = vpop.permute.xlu1 %2406  ;;  %v2361_v41 = vpop.permute.xlu0 %2360 }
 0x2f9   : > { %v2415_v10 = vadd.f32 %v2407_v44, %v2365_v48  ;;  %v2367_v18 = vadd.f32 %v2361_v41, %v2317_v35  ;;  %v1899_v44 = vrot.slane %v1892_v52, 5  ;;  %v1902_v41 = vrot.slane %v1894_v38, 5 }
 0x2fa   : > { %v2230_v35 = vstv %s2908_s4 }
 0x2fc   : > { %v2411_v27 = vpop.permute.xlu1 %2410  ;;  %v2409_v16 = vpop.permute.xlu0 %2408 }
 0x2fd   : > { %v2416_v50 = vadd.f32 %v2409_v16, %v2366_v34  ;;  %v2417_v62 = vadd.f32 %v2411_v27, %v2367_v18  ;;  %v1901_v16 = vsel %vm1898_vm10, %v1899_v44, %v1900_v42 }
 0x300   : > { %v2459_v19 = vpop.permute.xlu1 %2458  ;;  %v2457_v23 = vpop.permute.xlu0 %2456 }
 0x301   : > { %v2466_v32 = vadd.f32 %v2459_v19, %v2416_v50  ;;  %v2465_v63 = vadd.f32 %v2457_v23, %v2415_v10  ;;  %v1903_v19 = vsel %vm1898_vm10, %v1900_v42, %v1902_v41  ;;  %v2232_v10 = vmul.f32 %v2230_v35, %v3500_v58 }
 0x302   : > { %v2233_v50 = vmul.f32 %v2230_v35, %v3497_v57 }
 0x304   : > { %v2507_v24 = vpop.permute.xlu1 %2506  ;;  %v2461_v56 = vpop.permute.xlu0 %2460 }
 0x305   : > { %v2515_v37 = vadd.f32 %v2507_v24, %v2465_v63  ;;  %v2467_v53 = vadd.f32 %v2461_v56, %v2417_v62  ;;  %v2231_v63 = vmul.f32 %v2230_v35, %v3484_v47 }
 0x308   : > { %v2511_v2 = vpop.permute.xlu1 %2510  ;;  %v2509_v11 = vpop.permute.xlu0 %2508 }
 0x309   : > { %v2516_v54 = vadd.f32 %v2509_v11, %v2466_v32  ;;  %v2517_v43 = vadd.f32 %v2511_v2, %v2467_v53 }
 0x30c   : > { %v2559_v28 = vpop.permute.xlu1 %2558  ;;  %v2557_v39 = vpop.permute.xlu0 %2556 }
 0x30d   : > { %v2566_v51 = vadd.f32 %v2559_v28, %v2516_v54  ;;  %v2565_v55 = vadd.f32 %v2557_v39, %v2515_v37  ;;  %v2239_v54 = vrot.slane %v2232_v10, 6  ;;  %v2241_v28 = vrot.slane %v2233_v50, 6 }
 0x30f   : > { %2573 = vrot.lane.b32.xlu1 %v2566_v51, %s3259_s30  ;;  %2571 = vrot.lane.b32.xlu0 %v2565_v55, %s3259_s30  ;;  %v2242_v57 = vsel %vm2237_vm11, %v2239_v54, %v2241_v28 }
 0x310   : > { %v1758_v25 = vpop.permute.xlu1 %1757  ;;  %v2561_v33 = vpop.permute.xlu0 %2560 }
 0x311   : > { %v2567_v6 = vadd.f32 %v2561_v33, %v2517_v43  ;;  %v1764_v1 = vadd.f32 %v1758_v25, %v4659_v26  ;;  %v2238_v43 = vrot.slane %v2231_v63, 6 }
 0x313   : > { %2575 = vrot.lane.b32.xlu0 %v2567_v6, %s3259_s30  ;;  %v2240_v58 = vsel %vm2237_vm11, %v2238_v43, %v2239_v54 }
 0x314   : > { %v1806_v40 = vpop.permute.xlu1 %1805  ;;  %v4907_v8 = vpop.permute.xlu0 %1803 }
 0x315   : > { %v1813_v17 = vadd.f32 %v1806_v40, %v4683_v0 }
 0x318   : > { %v4909_v15 = vpop.permute.xlu1 %1853  ;;  %v1808_v29 = vpop.permute.xlu0 %1807 }
 0x319   : > { %v1814_v31 = vadd.f32 %v1808_v29, %v1764_v1 }
 0x31c   : > { %v1858_v59 = vpop.permute.xlu1 %1857  ;;  %v1856_v3 = vpop.permute.xlu0 %1855 }
 0x31d   : > { %v1863_v14 = vadd.f32 %v1856_v3, %v1813_v17  ;;  %v1864_v27 = vadd.f32 %v1858_v59, %v1814_v31 }
 0x31f   : > { %v1908_v7 = vadd.f32 %v1901_v16, %v1863_v14  ;;  %v1909_v49 = vadd.f32 %v1903_v19, %v1864_v27 }
 0x320   : > { %v1945_v61 = vpop.permute.xlu1 %1944  ;;  %v4911_v36 = vpop.permute.xlu0 %1942 }
 0x321   : > { %v1952_v26 = vadd.f32 %v1945_v61, %v1908_v7 }
 0x324   : > { %v4913_v46 = vpop.permute.xlu1 %1992  ;;  %v1947_v30 = vpop.permute.xlu0 %1946 }
 0x325   : > { %v1953_v24 = vadd.f32 %v1947_v30, %v1909_v49 }
 0x328   : > { %v1997_v4 = vpop.permute.xlu1 %1996  ;;  %v1995_v5 = vpop.permute.xlu0 %1994 }
 0x329   : > { %v2003_v34 = vadd.f32 %v1997_v4, %v1953_v24  ;;  %v2002_v48 = vadd.f32 %v1995_v5, %v1952_v26  ;;  %v1812_v4 = vadd.f32 %v4907_v8, %v4685_v21 }
 0x32b   : > { %v1862_v12 = vadd.f32 %v4909_v15, %v1812_v4 }
 0x32c   : > { %v2045_v9 = vpop.permute.xlu1 %2044  ;;  %v2043_v20 = vpop.permute.xlu0 %2042 }
 0x32d   : > { %v2052_v2 = vadd.f32 %v2045_v9, %v2002_v48  ;;  %v1907_v52 = vadd.f32 %v1899_v44, %v1862_v12 }
 0x32f   : > { %v1951_v1 = vadd.f32 %v4911_v36, %v1907_v52 }
 0x330   : > { %v2093_v22 = vpop.permute.xlu1 %2092  ;;  %v2047_v60 = vpop.permute.xlu0 %2046 }
 0x331   : > { %v2053_v11 = vadd.f32 %v2047_v60, %v2003_v34  ;;  %v2001_v17 = vadd.f32 %v4913_v46, %v1951_v1  ;;  %v2606_v1 = vld [vmem:[#allocation3 + $0x28] sm:$0xff] }
 0x333   : > { %v2051_v42 = vadd.f32 %v2043_v20, %v2001_v17  ;;  %v2608_v17 = vld [vmem:[#allocation3 + $0x38] sm:$0xff] }
 0x334   : > { %v2097_v23 = vpop.permute.xlu1 %2096  ;;  %v2095_v13 = vpop.permute.xlu0 %2094 }
 0x335   : > { %v2103_v62 = vadd.f32 %v2097_v23, %v2053_v11  ;;  %v2102_v37 = vadd.f32 %v2095_v13, %v2052_v2  ;;  %v2101_v41 = vadd.f32 %v2093_v22, %v2051_v42 }
 0x338   : > { %v2145_v0 = vpop.permute.xlu1 %2144  ;;  %v2143_v56 = vpop.permute.xlu0 %2142 }
 0x339   : > { %v2152_v39 = vadd.f32 %v2145_v0, %v2102_v37  ;;  %v2151_v60 = vadd.f32 %v2143_v56, %v2101_v41 }
 0x33c   : > { %v2193_v18 = vpop.permute.xlu1 %2192  ;;  %v2147_v32 = vpop.permute.xlu0 %2146 }
 0x33d   : > { %v2153_v53 = vadd.f32 %v2147_v32, %v2103_v62  ;;  %v2201_v27 = vadd.f32 %v2193_v18, %v2151_v60 }
 0x33f   : > { %v2246_v21 = vadd.f32 %v2238_v43, %v2201_v27 }
 0x340   : > { %v2197_v51 = vpop.permute.xlu1 %2196  ;;  %v2195_v55 = vpop.permute.xlu0 %2194 }
 0x341   : > { %v2203_v25 = vadd.f32 %v2197_v51, %v2153_v53  ;;  %v2202_v33 = vadd.f32 %v2195_v55, %v2152_v39 }
 0x343   : > { %v2247_v6 = vadd.f32 %v2240_v58, %v2202_v33  ;;  %v2248_v40 = vadd.f32 %v2242_v57, %v2203_v25 }
 0x344   : > { %v2284_v29 = vpop.permute.xlu1 %2283  ;;  %v2282_v59 = vpop.permute.xlu0 %2281 }
 0x345   : > { %v2291_v8 = vadd.f32 %v2284_v29, %v2247_v6  ;;  %v2290_v19 = vadd.f32 %v2282_v59, %v2246_v21  ;;  %v2601_v29 = vld [vmem:[#allocation3] sm:$0xff]  ;;  %v2603_v59 = vld [vmem:[#allocation3 + $0x10] sm:$0xff] }
 0x348   : > { %v2332_v47 = vpop.permute.xlu1 %2331  ;;  %v2286_v3 = vpop.permute.xlu0 %2285 }
 0x349   : > { %v2340_v44 = vadd.f32 %v2332_v47, %v2290_v19  ;;  %v2292_v49 = vadd.f32 %v2286_v3, %v2248_v40  ;;  %v2605_v47 = vld [vmem:[#allocation3 + $0x20] sm:$0xff]  ;;  %v2607_v3 = vld [vmem:[#allocation3 + $0x30] sm:$0xff] }
 0x34c   : > { %v2336_v61 = vpop.permute.xlu1 %2335  ;;  %v2334_v30 = vpop.permute.xlu0 %2333 }
 0x34d   : > { %v2341_v13 = vadd.f32 %v2334_v30, %v2291_v8  ;;  %v2342_v24 = vadd.f32 %v2336_v61, %v2292_v49 }
 0x350   : > { %v2384_v5 = vpop.permute.xlu1 %2383  ;;  %v2382_v45 = vpop.permute.xlu0 %2381 }
 0x351   : > { %v2391_v26 = vadd.f32 %v2384_v5, %v2341_v13  ;;  %v2390_v36 = vadd.f32 %v2382_v45, %v2340_v44 }
 0x354   : > { %v2432_v38 = vpop.permute.xlu1 %2431  ;;  %v2386_v9 = vpop.permute.xlu0 %2385 }
 0x355   : > { %v2440_v46 = vadd.f32 %v2432_v38, %v2390_v36  ;;  %v2392_v22 = vadd.f32 %v2386_v9, %v2342_v24  ;;  %v2602_v38 = vld [vmem:[#allocation3 + $0x8] sm:$0xff]  ;;  %v2604_v9 = vld [vmem:[#allocation3 + $0x18] sm:$0xff] }
 0x358   : > { %v2436_v31 = vpop.permute.xlu1 %2435  ;;  %v2434_v14 = vpop.permute.xlu0 %2433 }
 0x359   : > { %v2441_v20 = vadd.f32 %v2434_v14, %v2391_v26  ;;  %v2442_v35 = vadd.f32 %v2436_v31, %v2392_v22 }
 0x35c   : > { %v2484_v16 = vpop.permute.xlu1 %2483  ;;  %v2482_v7 = vpop.permute.xlu0 %2481 }
 0x35d   : > { %v2491_v56 = vadd.f32 %v2484_v16, %v2441_v20  ;;  %v2490_v48 = vadd.f32 %v2482_v7, %v2440_v46 }
 0x360   : > { %v2532_v23 = vpop.permute.xlu1 %2531  ;;  %v2486_v15 = vpop.permute.xlu0 %2485 }
 0x361   : > { %v2540_v10 = vadd.f32 %v2532_v23, %v2490_v48  ;;  %v2492_v18 = vadd.f32 %v2486_v15, %v2442_v35 }
 0x364   : > { %v2536_v0 = vpop.permute.xlu1 %2535  ;;  %v2534_v34 = vpop.permute.xlu0 %2533 }
 0x365   : > { %v2541_v50 = vadd.f32 %v2534_v34, %v2491_v56  ;;  %v2542_v62 = vadd.f32 %v2536_v0, %v2492_v18 }
 0x381   : > { %v2574_v2 = vpop.permute.xlu1 %2573  ;;  %v2572_v11 = vpop.permute.xlu0 %2571 }
 0x382   : > { %v2581_v32 = vadd.f32 %v2574_v2, %v2541_v50  ;;  %v2580_v63 = vadd.f32 %v2572_v11, %v2540_v10 }
 0x384   : > { %v2923_v37 = vmul.f32 -1.442695, %v2581_v32  ;;  %v2922_v54 = vmul.f32 -1.442695, %v2580_v63 }
 0x385   : > { %v2576_v28 = vpop.permute.xlu0 %2575 }
 0x386   : > { %3060 = vpow2.f32 %v2923_v37  ;;  %v2582_v39 = vadd.f32 %v2576_v28, %v2542_v62 }
 0x387   : > { %3062 = vpow2.f32 %v2922_v54 }
 0x388   : > { %v2924_v53 = vmul.f32 -1.442695, %v2582_v39 }
 0x38a   : > { %3064 = vpow2.f32 %v2924_v53 }
 0x390   : > { %v3061_v51 = vpop.eup %3060 }
 0x391   : > { %v3063_v55 = vpop.eup %3062  ;;  %v2593_v43 = vadd.f32 1.0, %v3061_v51 }
 0x392   : > { %v2592_v25 = vadd.f32 1.0, %v3063_v55 }
 0x393   : > { %3066 = vrcp.f32 %v2593_v43 }
 0x394   : > { %v3065_v33 = vpop.eup %3064  ;;  %3068 = vrcp.f32 %v2592_v25 }
 0x395   : > { %v2594_v58 = vadd.f32 1.0, %v3065_v33 }
 0x397   : > { %3070 = vrcp.f32 %v2594_v58 }
 0x39d   : > { %v3067_v57 = vpop.eup %3066 }
 0x39e   : > { %v3069_v6 = vpop.eup %3068  ;;  %v2613_v40 = vrot.slane %v3067_v57, 5 }
 0x39f   : > { %v2612_v61 = vrot.slane %v3069_v6, 5 }
 0x3a1   : > { %v3071_v30 = vpop.eup %3070  ;;  %v2614_v4 = vsel %vm1898_vm10, %v2612_v61, %v2613_v40 }
 0x3a2   : > { %v2619_v5 = vmul.f32 %v2614_v4, %v2601_v29  ;;  %v2621_v45 = vmul.f32 %v2614_v4, %v2603_v59  ;;  %v2623_v12 = vmul.f32 %v2614_v4, %v2605_v47  ;;  %v2625_v52 = vmul.f32 %v2614_v4, %v2607_v3 }
 0x3a3   : > { %v2615_v42 = vrot.slane %v3071_v30, 5 }
 0x3a4   : > { %2628 = vst.msk [vmem:[%s3457_s23] sm:$0xff] %vm2627_vm12, %v2619_v5  ;;  %2630 = vst.msk [vmem:[%s3457_s23 + $0x10] sm:$0xff] %vm2627_vm12, %v2621_v45 }
 0x3a5   : > { %2632 = vst.msk [vmem:[%s3457_s23 + $0x20] sm:$0xff] %vm2627_vm12, %v2623_v12  ;;  %2634 = vst.msk [vmem:[%s3457_s23 + $0x30] sm:$0xff] %vm2627_vm12, %v2625_v52  ;;  %v2616_v31 = vsel %vm1898_vm10, %v2613_v40, %v2615_v42 }
 0x3a6   : > { %v2620_v14 = vmul.f32 %v2616_v31, %v2602_v38  ;;  %v2622_v41 = vmul.f32 %v2616_v31, %v2604_v9  ;;  %v2624_v60 = vmul.f32 %v2616_v31, %v2606_v1  ;;  %v2626_v27 = vmul.f32 %v2616_v31, %v2608_v17 }
 0x3a8   : > { %2629 = vst.msk [vmem:[%s3457_s23 + $0x8] sm:$0xff] %vm2627_vm12, %v2620_v14  ;;  %2631 = vst.msk [vmem:[%s3457_s23 + $0x18] sm:$0xff] %vm2627_vm12, %v2622_v41 }
 0x3a9   : > { %2633 = vst.msk [vmem:[%s3457_s23 + $0x28] sm:$0xff] %vm2627_vm12, %v2624_v60  ;;  %2635 = vst.msk [vmem:[%s3457_s23 + $0x38] sm:$0xff] %vm2627_vm12, %v2626_v27 }
 0x3aa PF: > { %2638 = sbr.rel (%p2804_p7) target bundleno = 945 (0x3b1), region = 52  ;;  %v2639_v16 = vld [vmem:[%s3448_s20] sm:$0xff] (!%p2804_p7)  ;;  %vm2647_vm13 = vcmask (!%p2804_p7), 130048   ;;  %v2640_v7 = vld [vmem:[%s3448_s20 + $0x8] sm:$0xff] (!%p2804_p7)  ;;  %v2641_v21 = vld [vmem:[%s3448_s20 + $0x10] sm:$0xff] (!%p2804_p7) }
 0x3ab   : > { %2648 = vst.msk [vmem:[#allocation3] sm:$0xff] (!%p2804_p7), %vm2647_vm13, %v2639_v16  ;;  %2649 = vst.msk [vmem:[#allocation3 + $0x8] sm:$0xff] (!%p2804_p7), %vm2647_vm13, %v2640_v7  ;;  %v2642_v8 = vld [vmem:[%s3448_s20 + $0x18] sm:$0xff] (!%p2804_p7)  ;;  %v2643_v19 = vld [vmem:[%s3448_s20 + $0x20] sm:$0xff] (!%p2804_p7) }
 0x3ac   : > { %2650 = vst.msk [vmem:[#allocation3 + $0x10] sm:$0xff] (!%p2804_p7), %vm2647_vm13, %v2641_v21  ;;  %v2644_v23 = vld [vmem:[%s3448_s20 + $0x28] sm:$0xff] (!%p2804_p7)  ;;  %2651 = vst.msk [vmem:[#allocation3 + $0x18] sm:$0xff] (!%p2804_p7), %vm2647_vm13, %v2642_v8  ;;  %v2645_v15 = vld [vmem:[%s3448_s20 + $0x30] sm:$0xff] (!%p2804_p7) }
 0x3ad   : > { %2652 = vst.msk [vmem:[#allocation3 + $0x20] sm:$0xff] (!%p2804_p7), %vm2647_vm13, %v2643_v19  ;;  %2653 = vst.msk [vmem:[#allocation3 + $0x28] sm:$0xff] (!%p2804_p7), %vm2647_vm13, %v2644_v23  ;;  %v2646_v44 = vld [vmem:[%s3448_s20 + $0x38] sm:$0xff] (!%p2804_p7) }
 0x3ae   : > { %2654 = vst.msk [vmem:[#allocation3 + $0x30] sm:$0xff] (!%p2804_p7), %vm2647_vm13, %v2645_v15  ;;  %2655 = vst.msk [vmem:[#allocation3 + $0x38] sm:$0xff] (!%p2804_p7), %vm2647_vm13, %v2646_v44 }
 0x3b1 PF: > { %s2927_s3 = sadd.s32 4294967295, %s3228_s15  ;;  %s2929_s6 = sshll.u32 %s3232_s16, 3 }
 0x3b2   : > { %p2665_p13 = scmp.gt.s32.totalorder %s2927_s3, 0  ;;  %s2675_s26 = sshll.u32 %s3457_s23, 4  ;;  %s4963_s26 = int_to_ptr.vmem [resolvable:$true] %s2675_s26 }
 0x3b3   : > { %s5167_s8 = sand.u32 1, %s3208_s10   ;;  %s3117_s15 = scalar_lea.vmem %s4963_s26, 1024 }
 0x3b4   : > { %s5189_s3 = smov (!%p2665_p13, %s2927_s3), 0  ;;  %s4972_s5 = scalar_lea.sflag [#allocation6], %s5167_s8 }
 0x3b5   : > { %s2928_s0 = sshll.u32 %s5189_s3, 1  ;;  %p3118_p4 = scmp.ne.s32.totalorder %s4963_s26, %s3117_s15 }
 0x3b6   : > { %s2672_s20 = sadd.s32 %s2929_s6, %s2928_s0  ;;  %p5168_p6 = scmp.ne.s32.totalorder %s5057_s27, 0 }
 0x3b7   : > { %s2930_s7 = sshll.u32 %s2672_s20, 7  ;;  %s3260_s16 = smov [#allocation9]  }
 0x3b8   : > { %s4968_s24 = scalar_lea.hbm %s5035_s2, %s2930_s7  ;;  %p3119_p10 = pnand %p3118_p4, %p5168_p6 }
 0x3b9   : > { %s3121_s23 = sshll.u32 %s3260_s16, 4  ;;  %s3122_s23 = int_to_ptr.vmem [resolvable:$false] %s3121_s23 }
 0x3ba   : > { %p3120_p12 = pneg %p3119_p10  ;;  %s3123_s30 = scalar_lea.vmem %s3122_s23, 2048 }
 0x3bb   : > { %p3124_p1 = scmp.lt.s32.totalorder %s4963_s26, %s3122_s23  ;;  %p3125_p5 = scmp.lt.s32.totalorder %s3123_s30, %s3117_s15 }
 0x3bd   : > { %p3126_p8 = por %p3125_p5, %p3124_p1 }
 0x3bf   : > { %p3127_p9 = pnand %p3126_p8, %p3120_p12 }
 0x3c1   : > { %3130 = shalt.err (!%p3127_p9)
}
 0x3c2   : > { %s3131_s25 = scalar_lea.hbm %s4968_s24, 1024  ;;  %s3135_s6 = scalar_lea.hbm %s5035_s2, 2048 }
 0x3c3   : > { %p3132_p0 = scmp.ne.s32.totalorder %s4968_s24, %s3131_s25  ;;  %p3136_p7 = scmp.lt.u32.totalorder %s4968_s24, %s5035_s2 }
 0x3c4   : > { %p3137_p11 = scmp.lt.u32.totalorder %s3135_s6, %s3131_s25  ;;  %p3139_p4 = scmp.lt.u32.totalorder %s3131_s25, %s4968_s24 }
 0x3c5   : > { %p3133_p2 = pnand %p3132_p0, %p5168_p6 }
 0x3c6   : > { %p3138_p13 = por %p3137_p11, %p3136_p7 }
 0x3c7   : > { %p3134_p3 = pneg %p3133_p2 }
 0x3c8   : > { %p3140_p10 = por %p3139_p4, %p3138_p13 }
 0x3ca   : > { %p3141_p12 = pnand %p3140_p10, %p3134_p3 }
 0x3cc   : > { %3144 = shalt.err (!%p3141_p12)
}
 0x3cd   : > { %s3261_s7 = smov 128   ;;  %s3262_s21 = smov 8  }
 0x3ce   : > { %2939 = dma.vmem_to_hbm [thread:$0]  (%p5168_p6), %s4963_s26, 1024, %s4968_s24, %s4972_s5, %s3261_s7, %s3261_s7, %s3262_s21  }
 0x3cf PF: > { %p2956_p1 = scmp.ge.s32.totalorder %s3244_s19, 2  ;;  %s2690_s22 = sand.u32 1, %s3204_s9  }
 0x3d0   : > { %p5169_p5 = scmp.ne.s32.totalorder %s5058_s28, 0  ;;  %s2691_s8 = scalar_lea.sflag [#allocation6], %s2690_s22 }
 0x3d2   : > { %p2950_p8 = pnand %p2956_p1, %p5169_p5 }
 0x3d4   : > { %3198 = dma.done.wait (!%p2950_p8), %s2691_s8, 1024  }
 0x3d5   : > { %3200 = vsyncadd (!%p2950_p8), %s2691_s8, 4294966272  ;;  %s19_s19 = sadd.s32 1, %s3244_s19   ;;  %s5170_s15 = sld [smem:[#allocation13_spill]] }
 0x3d6   : > { %p16_p9 = scmp.ge.s32.totalorder %s19_s19, 6   ;;  %s5171_s27 = sld [smem:[#allocation14_spill]] }
 0x3d7   : > { %s5172_s26 = smov %s5187_s12  ;;  %s5173_s9 = smov %s3208_s10 }
 0x3d8   : > { %s5174_s10 = smov %s3212_s11  ;;  %s5175_s11 = smov %s3409_s17 }
 0x3d9   : > { %s5176_s12 = smov %s3220_s13  ;;  %s5177_s13 = smov %s3224_s14 }
 0x3da   : > { %s5178_s14 = smov %s3398_s29  ;;  %s5179_s16 = smov %s3240_s18 }
 0x3db   : > { %s5181_s18 = smov %s5172_s26  ;;  %18 = sbr.rel (!%p16_p9) target bundleno = 12 (0xc), region = 101 }
 0x3dc   : > { %s5180_s17 = smov %s5171_s27 }
 0x3e2   :  { %2696 = vsyncpa [#allocation5], 1 }
 0x3e3   :  { %2698 = vsyncpa [#allocation5 + $0x1], 1 }
 0x3e4   :  { %2699 = vsyncpa [#allocation6], 1 }
 0x3e5   :  { %2701 = vsyncpa [#allocation6 + $0x1], 1 }
 0x3e6   :  { %2702 = vsyncpa [#allocation7], 1 }
 0x3e7   :  { %2704 = vsyncpa [#allocation7 + $0x1], 1 }

</bundles_post_ra>
